<compile_context>
chip_gen: v7x
topology: tpu7x:2x2x1
jax: 0.10.0
libtpu: 0.0.40
codegen_flags: <defaults>
</compile_context>

<pallas_src>
import math

import jax
import jax.numpy as jnp
from jax.experimental import pallas as pl
from jax.experimental.pallas import tpu as pltpu  # noqa: F401

HIDDEN_DIM = 16                 # Net(hidden_dim=16)
GRU_H = HIDDEN_DIM // 2         # 8
NUM_HEADS = 2
HEAD_DIM = HIDDEN_DIM // NUM_HEADS
MIX_HIDDEN = HIDDEN_DIM // 4    # 4
MIX_DEPTH = 2
N_EXPERTS = 32
MOE_HID = 16
LN_EPS = 1e-5
_LANE = 128


def _round_up(c, m=_LANE):
    return ((c + m - 1) // m) * m


# ------------------------------ in-kernel math helpers ------------------------------
def _sigmoid(x):
    # exact sigmoid as a single EUP tanh (no approx reciprocal on the GRU recurrence)
    return 0.5 * (jnp.tanh(0.5 * x) + 1.0)


def _gelu(x):
    # TODO(synk): tanh-approximate GELU; PyTorch nn.GELU() uses exact erf (|diff| ~1e-3).
    c = 0.7978845608028654  # sqrt(2/pi)
    return 0.5 * x * (1.0 + jnp.tanh(c * (x + 0.044715 * x * x * x)))


def _layer_norm(x, w, b):
    mu = jnp.mean(x, axis=-1, keepdims=True)
    var = jnp.mean(jnp.square(x - mu), axis=-1, keepdims=True)
    return (x - mu) * jax.lax.rsqrt(var + LN_EPS) * w + b


def _softmax_last(x):
    m = jnp.max(x, axis=-1, keepdims=True)
    e = jnp.exp(x - m)
    return e * pl.reciprocal(jnp.sum(e, axis=-1, keepdims=True), approx=True)


# ------------------------- joint bidirectional GRU recurrence ------------------------
def _bigru_steps(gxc_all, whh_pk, bhh_n, B, T):
    """Forward+backward GRU in lockstep.  Carry h = [h_fwd | h_bwd] (B,16); one
    (B,16)@(16,48) recurrent matmul per step.  gxc_all[:, s] holds the gate-major
    interleaved input preactivations [r_f r_b | z_f z_b | n_f n_b] of time s (fwd half)
    and time T-1-s (bwd half), with input + r/z hidden biases already folded in.
    Returns the per-step carries stacked along axis 1 (step order)."""
    H = GRU_H
    h = jnp.zeros((B, 2 * H), jnp.float32)
    hs = []
    for s in range(T):
        gx = gxc_all[:, s, :]                                        # (B, 48)
        gh = jnp.dot(h, whh_pk, preferred_element_type=jnp.float32)  # (B, 48)
        rz = _sigmoid(gx[:, 0:4 * H] + gh[:, 0:4 * H])               # fused r|z sigmoid
        r = rz[:, 0:2 * H]
        z = rz[:, 2 * H:4 * H]
        n = jnp.tanh(gx[:, 4 * H:6 * H] + r * (gh[:, 4 * H:6 * H] + bhh_n))
        h = n + z * (h - n)
        hs.append(h)
    return jnp.stack(hs, axis=1)                                     # (B, T, 16)


# ----------------------------------- kernel ------------------------------------------
def _make_kernel(B, T, wmap, vmap):
    D = HIDDEN_DIM
    H = GRU_H
    hd = HEAD_DIM

    def kernel(x2_ref, wbuf_ref, vbuf_ref, w2_ref, o_ref):
        def W(name):                      # 2-D weight block (lane-aligned column segment)
            ro, co, r, c = wmap[name]
            return wbuf_ref[ro:ro + r, co:co + c]

        def V(name):                      # (1, c) bias / scale row
            row, c = vmap[name]
            return vbuf_ref[row:row + 1, 0:c]

        # time-reversal along axis 1 as an antidiagonal batched matmul (idle MXU)
        rev_pb = jnp.broadcast_to(W('rev_p')[None, :, :], (B, T, T))

        def rev_t(v):
            return jnp.einsum('bts,bsc->btc', rev_pb, v,
                              preferred_element_type=jnp.float32)

        x = x2_ref[:, :, 0:1]             # (B, T, 1)
        xr = x2_ref[:, :, 1:2]            # time-reversed copy of x (built in the wrapper)

        # ---------------- GRU encoder: 2 layers, fwd+bwd in lockstep -----------------
        # layer 0 (input size 1): gate-scattered input rows give the interleaved layout
        gxc0 = x * V('gru0_wih_f') + xr * V('gru0_wih_b') + V('gru0_bih')   # (B, T, 48)
        st0 = _bigru_steps(gxc0, W('gru0_whh'), V('gru0_bhh_n'), B, T)
        st0r = rev_t(st0)
        out0 = jnp.concatenate([st0[:, :, 0:H], st0r[:, :, H:2 * H]], axis=-1)   # natural
        out0r = jnp.concatenate([st0r[:, :, 0:H], st0[:, :, H:2 * H]], axis=-1)  # reversed

        # layer 1: input projections hoisted out of the recurrence (gate-scattered cols)
        gx1 = (jnp.dot(out0.reshape(B * T, D), W('gru1_wih_f'),
                       preferred_element_type=jnp.float32)
               + jnp.dot(out0r.reshape(B * T, D), W('gru1_wih_b'),
                         preferred_element_type=jnp.float32))
        gxc1 = gx1.reshape(B, T, 6 * H) + V('gru1_bih')
        st1 = _bigru_steps(gxc1, W('gru1_whh'), V('gru1_bhh_n'), B, T)
        st1r = rev_t(st1)
        xs = jnp.concatenate([st1[:, :, 0:H], st1r[:, :, H:2 * H]], axis=-1)     # (B,T,16)

        # ---------------- multi-head self-attention (heads stacked on batch) ----------
        qkv = (jnp.dot(xs.reshape(B * T, D), W('attn_wqkv'),
                       preferred_element_type=jnp.float32)
               + V('attn_bqkv')).reshape(B, T, 3 * D)      # head-major [q0 k0 v0|q1 k1 v1]
        ph = 3 * hd
        qkv_s = jnp.concatenate(
            [qkv[:, :, h * ph:(h + 1) * ph] for h in range(NUM_HEADS)], axis=0)  # (2B,T,24)
        qh = qkv_s[:, :, 0:hd]                              # q-scale folded in at pack time
        kh = qkv_s[:, :, hd:2 * hd]
        vh = qkv_s[:, :, 2 * hd:3 * hd]
        sc = jnp.einsum('btd,bsd->bts', qh, kh, preferred_element_type=jnp.float32)
        attn = _softmax_last(sc)
        oh = jnp.einsum('bts,bsd->btd', attn, vh, preferred_element_type=jnp.float32)
        wo = W('attn_wo')                                   # (16, 16)
        xs = (jnp.dot(oh[0:B].reshape(B * T, hd), wo[0:hd, :],
                      preferred_element_type=jnp.float32)
              + jnp.dot(oh[B:2 * B].reshape(B * T, hd), wo[hd:D, :],
                        preferred_element_type=jnp.float32)
              + V('attn_bo')).reshape(B, T, D)

        # ---------------- MixerMLP (depth 2), no activation transposes ----------------
        for i in range(MIX_DEPTH):
            pre = 'mix%d_' % i
            # token mixer: left-multiply over the time axis via batched matmuls
            y = _layer_norm(xs, V(pre + 'ln1_w'), V(pre + 'ln1_b'))
            w1b = jnp.broadcast_to(W(pre + 'tw1t')[None, :, :], (B, MIX_HIDDEN, T))
            w2b = jnp.broadcast_to(W(pre + 'tw2t')[None, :, :], (B, T, MIX_HIDDEN))
            h1 = _gelu(jnp.einsum('bht,btd->bhd', w1b, y,
                                  preferred_element_type=jnp.float32)
                       + W(pre + 'tb1c')[None, :, :])
            tm = (jnp.einsum('bth,bhd->btd', w2b, h1,
                             preferred_element_type=jnp.float32)
                  + W(pre + 'tb2c')[None, :, :])
            xs = xs + V(pre + 'a1') * tm
            # channel mixer: MLP over the feature axis
            y2 = _layer_norm(xs, V(pre + 'ln2_w'), V(pre + 'ln2_b'))
            h2 = _gelu(jnp.dot(y2.reshape(B * T, D), W(pre + 'cw1'),
                               preferred_element_type=jnp.float32) + V(pre + 'cb1'))
            cm = jnp.dot(h2, W(pre + 'cw2'),
                         preferred_element_type=jnp.float32) + V(pre + 'cb2')
            xs = xs + V(pre + 'a2') * cm.reshape(B, T, D)

        # ---------------- mean over time + fused 32-expert MoE ------------------------
        xm = jnp.mean(xs, axis=1)                                      # (B, 16)
        moe_w = W('moe_win')                                           # (17, 544): W | bias
        fused = (jnp.dot(xm, moe_w[0:D, :], preferred_element_type=jnp.float32)
                 + moe_w[D:D + 1, :])                                  # (B, 544)
        hexp = _gelu(fused[:, 0:N_EXPERTS * MOE_HID])                  # (B, 512)
        gate = _softmax_last(fused[:, N_EXPERTS * MOE_HID:])           # (B, 32)
        eo = jnp.dot(hexp, w2_ref[...],
                     preferred_element_type=jnp.float32) + V('moe_b2')  # (B, 32)
        o_ref[...] = jnp.sum(gate * eo, axis=-1, keepdims=True)        # (B, 1)

    return kernel


# ----------------------------- parameter construction --------------------------------
def init_params(key, window_size):
    """Deterministic synthetic parameters (weights pre-transposed for x @ W)."""
    T, D, H = window_size, HIDDEN_DIM, GRU_H
    params = {}

    def nxt():
        nonlocal key
        key, sub = jax.random.split(key)
        return sub

    def rnd(shape, scale=0.1):
        return scale * jax.random.normal(nxt(), shape, dtype=jnp.float32)

    for layer, in_dim in ((0, 1), (1, D)):
        for d in ('f', 'b'):
            params[f'gru{layer}{d}_wih'] = rnd((in_dim, 3 * H))
            params[f'gru{layer}{d}_whh'] = rnd((H, 3 * H))
            params[f'gru{layer}{d}_bih'] = rnd((1, 3 * H), 0.01)
            params[f'gru{layer}{d}_bhh'] = rnd((1, 3 * H), 0.01)
    params['attn_wqkv'] = rnd((D, 3 * D))
    params['attn_bqkv'] = rnd((1, 3 * D), 0.01)
    params['attn_wo'] = rnd((D, D))
    params['attn_bo'] = rnd((1, D), 0.01)
    for i in range(MIX_DEPTH):
        pre = f'mix{i}_'
        params[pre + 'ln1_w'] = jnp.ones((1, D), jnp.float32)
        params[pre + 'ln1_b'] = jnp.zeros((1, D), jnp.float32)
        params[pre + 'ln2_w'] = jnp.ones((1, D), jnp.float32)
        params[pre + 'ln2_b'] = jnp.zeros((1, D), jnp.float32)
        params[pre + 'a1'] = jnp.ones((1, D), jnp.float32)
        params[pre + 'a2'] = jnp.ones((1, D), jnp.float32)
        params[pre + 'tw1'] = rnd((T, MIX_HIDDEN))
        params[pre + 'tb1'] = rnd((1, MIX_HIDDEN), 0.01)
        params[pre + 'tw2'] = rnd((MIX_HIDDEN, T))
        params[pre + 'tb2'] = rnd((1, T), 0.01)
        params[pre + 'cw1'] = rnd((D, MIX_HIDDEN))
        params[pre + 'cb1'] = rnd((1, MIX_HIDDEN), 0.01)
        params[pre + 'cw2'] = rnd((MIX_HIDDEN, D))
        params[pre + 'cb2'] = rnd((1, D), 0.01)
    params['moe_gate_w'] = rnd((D, N_EXPERTS))
    params['moe_e_w1'] = rnd((N_EXPERTS, D, MOE_HID))
    params['moe_e_b1'] = rnd((N_EXPERTS, MOE_HID), 0.01)
    params['moe_e_w2'] = rnd((N_EXPERTS, MOE_HID))
    params['moe_e_b2'] = rnd((1, N_EXPERTS), 0.01)
    return params


# ----------------------------- parameter packing (init-time) --------------------------
def _pack_whh(wf, wb):
    """Block-diagonal joint recurrent weight: rows [h_f | h_b], gate-major columns
    [r_f r_b | z_f z_b | n_f n_b]."""
    H = GRU_H
    Wp = jnp.zeros((2 * H, 6 * H), jnp.float32)
    for g in range(3):
        Wp = Wp.at[0:H, 2 * g * H:(2 * g + 1) * H].set(wf[:, g * H:(g + 1) * H])
        Wp = Wp.at[H:2 * H, (2 * g + 1) * H:(2 * g + 2) * H].set(wb[:, g * H:(g + 1) * H])
    return Wp


def _scatter_gate_cols(w, direction):
    """Scatter a per-direction [r|z|n] weight (rows, 3H) into the joint gate-major
    column layout (rows, 6H): fwd in even gate slots, bwd in odd gate slots."""
    H = GRU_H
    out = jnp.zeros((w.shape[0], 6 * H), jnp.float32)
    for g in range(3):
        dst = (2 * g + direction) * H
        out = out.at[:, dst:dst + H].set(w[:, g * H:(g + 1) * H])
    return out


def _gate_major(vf, vb):
    H = GRU_H
    return jnp.concatenate([vf[:, 0:H], vb[:, 0:H],
                            vf[:, H:2 * H], vb[:, H:2 * H],
                            vf[:, 2 * H:3 * H], vb[:, 2 * H:3 * H]], axis=1)


def _head_major(w):
    """Reorder QKV columns [Q|K|V] (heads interleaved inside each) into the
    head-major layout [q0 k0 v0 | q1 k1 v1]."""
    D, hd = HIDDEN_DIM, HEAD_DIM
    pieces = []
    for h in range(NUM_HEADS):
        for g in range(3):
            pieces.append(w[..., g * D + h * hd:g * D + h * hd + hd])
    return jnp.concatenate(pieces, axis=-1)


def _pack_mat_buffer(mats):
    """128-lane-aligned column segments; small matrices share a segment's rows
    (first-fit) so the slab stays compact."""
    n_rows = max(m.shape[0] for m in mats.values())
    segs = []                                    # [{'width', 'rows', 'entries'}]
    for name, m in mats.items():
        r, c = m.shape
        w = _round_up(c)
        placed = False
        for seg in segs:
            if seg['width'] == w and seg['rows'] + r <= n_rows:
                seg['entries'].append((name, seg['rows'], m))
                seg['rows'] += r
                placed = True
                break
        if not placed:
            segs.append({'width': w, 'rows': r, 'entries': [(name, 0, m)]})
    total = sum(s['width'] for s in segs)
    buf = jnp.zeros((n_rows, total), jnp.float32)
    layout, col = {}, 0
    for seg in segs:
        for name, ro, m in seg['entries']:
            r, c = m.shape
            buf = buf.at[ro:ro + r, col:col + c].set(m)
            layout[name] = (ro, col, r, c)
        col += seg['width']
    return buf, layout


def _pack_vec_buffer(vecs):
    """Each (1, c) vector occupies one row of a 128-lane-wide slab."""
    width = _round_up(max(v.shape[-1] for v in vecs.values()))
    rows, layout = [], {}
    for i, (name, v) in enumerate(vecs.items()):
        c = v.shape[-1]
        rows.append(jnp.zeros((1, width), jnp.float32).at[:, :c].set(v.reshape(1, c)))
        layout[name] = (i, c)
    return jnp.concatenate(rows, axis=0), layout


def pack_params(params):
    """One-time packing of all parameters into 2 slabs + the block-diag MoE W2.
    Runs once at init, NOT inside the jitted per-call path."""
    D, H, hd = HIDDEN_DIM, GRU_H, HEAD_DIM
    T = params['mix0_tw1'].shape[0]
    mats, vecs = {}, {}

    # --- GRU: gate-scattered input cols, block-diag W_hh, folded r/z hidden biases ---
    vecs['gru0_wih_f'] = _scatter_gate_cols(params['gru0f_wih'], 0)      # (1, 48)
    vecs['gru0_wih_b'] = _scatter_gate_cols(params['gru0b_wih'], 1)
    mats['gru1_wih_f'] = _scatter_gate_cols(params['gru1f_wih'], 0)      # (16, 48)
    mats['gru1_wih_b'] = _scatter_gate_cols(params['gru1b_wih'], 1)
    for L in (0, 1):
        mats[f'gru{L}_whh'] = _pack_whh(params[f'gru{L}f_whh'], params[f'gru{L}b_whh'])
        bih = _gate_major(params[f'gru{L}f_bih'], params[f'gru{L}b_bih'])
        bhh = _gate_major(params[f'gru{L}f_bhh'], params[f'gru{L}b_bhh'])
        # r/z hidden biases fold into the input bias; b_hn stays inside the r*(...) term
        vecs[f'gru{L}_bih'] = bih.at[:, 0:4 * H].add(bhh[:, 0:4 * H])
        vecs[f'gru{L}_bhh_n'] = bhh[:, 4 * H:6 * H]

    # --- time-reversal permutation (antidiagonal) used for the bi-GRU assembly ---
    mats['rev_p'] = jnp.fliplr(jnp.eye(T, dtype=jnp.float32))

    # --- attention: head-major QKV with the 1/sqrt(d) q-scale folded in ---
    scale = 1.0 / math.sqrt(hd)
    qscale = jnp.concatenate(
        [jnp.concatenate([jnp.full((hd,), scale, jnp.float32),
                          jnp.ones((2 * hd,), jnp.float32)]) for _ in range(NUM_HEADS)])
    mats['attn_wqkv'] = _head_major(params['attn_wqkv']) * qscale[None, :]
    vecs['attn_bqkv'] = _head_major(params['attn_bqkv']) * qscale[None, :]
    mats['attn_wo'] = params['attn_wo']
    vecs['attn_bo'] = params['attn_bo']

    # --- mixer: token-MLP weights stored transposed (left-multiplication), column biases ---
    for i in range(MIX_DEPTH):
        pre = f'mix{i}_'
        mats[pre + 'tw1t'] = params[pre + 'tw1'].T                       # (4, T)
        mats[pre + 'tw2t'] = params[pre + 'tw2'].T                       # (T, 4)
        mats[pre + 'tb1c'] = params[pre + 'tb1'].reshape(MIX_HIDDEN, 1)
        mats[pre + 'tb2c'] = params[pre + 'tb2'].reshape(T, 1)
        mats[pre + 'cw1'] = params[pre + 'cw1']
        mats[pre + 'cw2'] = params[pre + 'cw2']
        for nm in ('ln1_w', 'ln1_b', 'a1', 'ln2_w', 'ln2_b', 'a2', 'cb1', 'cb2'):
            vecs[pre + nm] = params[pre + nm]

    # --- MoE: 32 experts + gating fused into one lane-dense matmul; bias = 17th row ---
    w1p = jnp.transpose(params['moe_e_w1'], (1, 0, 2)).reshape(D, N_EXPERTS * MOE_HID)
    moe_w = jnp.concatenate([w1p, params['moe_gate_w']], axis=1)          # (16, 544)
    moe_b = jnp.concatenate([params['moe_e_b1'].reshape(1, N_EXPERTS * MOE_HID),
                             jnp.zeros((1, N_EXPERTS), jnp.float32)], axis=1)
    mats['moe_win'] = jnp.concatenate([moe_w, moe_b], axis=0)             # (17, 544)
    vecs['moe_b2'] = params['moe_e_b2']
    # TODO(synk): the (512,32) block-diagonal W2 stays a separate 4th input; folding it
    # into the weight slab would need >17 rows or a minor-dim-splitting reshape in-kernel.
    w2_blk = (params['moe_e_w2'][:, :, None]
              * jnp.eye(N_EXPERTS, dtype=jnp.float32)[:, None, :]).reshape(
                  N_EXPERTS * MOE_HID, N_EXPERTS)

    wbuf, wmap = _pack_mat_buffer(mats)
    vbuf, vmap = _pack_vec_buffer(vecs)
    return wbuf, wmap, vbuf, vmap, w2_blk


# ----------------------------------- wrapper ------------------------------------------
def make_forward(B, T, wmap, vmap):
    """Builds the jitted forward.  The packed parameter slabs are passed in as ready
    device arrays (packing runs once at init, not per call)."""
    kernel = _make_kernel(B, T, wmap, vmap)

    @jax.jit
    def forward(x, wbuf, vbuf, w2_blk):
        # x: (B, 1, T) float32 — PyTorch 'b n t' layout with a single feature channel.
        xt = jnp.transpose(x, (0, 2, 1)).astype(jnp.float32)        # (B, T, 1)
        x2 = jnp.concatenate([xt, xt[:, ::-1, :]], axis=-1)         # (B, T, 2): fwd | rev
        # TODO(synk): for non-toy batch sizes add a batch grid with
        # dimension_semantics=("parallel",) so v7x's second TensorCore contributes and
        # re-size blocks against its 64 MiB VMEM.
        return pl.pallas_call(
            kernel,
            out_shape=jax.ShapeDtypeStruct((B, 1), jnp.float32),
        )(x2, wbuf, vbuf, w2_blk)

    return forward


if __name__ == "__main__":
    B, T = 2, 8                                 # batch=2, window_size=8
    root = jax.random.PRNGKey(0)
    kp, kx = jax.random.split(root)
    params = init_params(kp, window_size=T)
    wbuf, wmap, vbuf, vmap, w2_blk = pack_params(params)           # once, at init
    forward = make_forward(B, T, wmap, vmap)
    x = jax.random.normal(kx, (B, 1, T), dtype=jnp.float32)
    out = jax.block_until_ready(forward(x, wbuf, vbuf, w2_blk))
    assert out.shape == (B, 1) and bool(jnp.all(jnp.isfinite(out)))
    # TODO(synk): dropout layers (p=0.5 in MLP blocks, p=0.2 in MHA) run as
    # inference-mode identities; training-mode stochastic masking is not modeled.
    print("KERNEL_OK")
</pallas_src>

<mosaic_0001>
module attributes {stable_mosaic.version = 11 : i64} {
  func.func @kernel(%arg0: memref<2x8x2xf32, #tpu.memory_space<vmem>>, %arg1: memref<17x2176xf32, #tpu.memory_space<vmem>>, %arg2: memref<25x128xf32, #tpu.memory_space<vmem>>, %arg3: memref<512x32xf32, #tpu.memory_space<vmem>>, %arg4: memref<2x1xf32, #tpu.memory_space<vmem>>) attributes {dimension_semantics = [], scalar_prefetch = 0 : i64, scratch_operands = 0 : i64, tpu.core_type = #tpu.core_type<tc>} {
    %c0 = arith.constant 0 : index
    %c512 = arith.constant 512 : index
    %0 = vector.load %arg1[%c0, %c512] : memref<17x2176xf32, #tpu.memory_space<vmem>>, vector<8x8xf32>
    %1 = vector.shape_cast %0 : vector<8x8xf32> to vector<1x8x8xf32>
    %2 = vector.shape_cast %1 : vector<1x8x8xf32> to vector<1x8x8xf32>
    %3 = vector.broadcast %2 : vector<1x8x8xf32> to vector<2x8x8xf32>
    %c0_0 = arith.constant 0 : index
    %c0_1 = arith.constant 0 : index
    %c0_2 = arith.constant 0 : index
    %4 = vector.load %arg0[%c0_0, %c0_1, %c0_2] : memref<2x8x2xf32, #tpu.memory_space<vmem>>, vector<2x8x1xf32>
    %c0_3 = arith.constant 0 : index
    %c0_4 = arith.constant 0 : index
    %c1 = arith.constant 1 : index
    %5 = vector.load %arg0[%c0_3, %c0_4, %c1] : memref<2x8x2xf32, #tpu.memory_space<vmem>>, vector<2x8x1xf32>
    %c0_5 = arith.constant 0 : index
    %c0_6 = arith.constant 0 : index
    %6 = vector.load %arg2[%c0_5, %c0_6] : memref<25x128xf32, #tpu.memory_space<vmem>>, vector<1x48xf32>
    %7 = vector.shape_cast %6 : vector<1x48xf32> to vector<1x1x48xf32>
    %8 = vector.broadcast %4 : vector<2x8x1xf32> to vector<2x8x48xf32>
    %9 = vector.broadcast %7 : vector<1x1x48xf32> to vector<2x8x48xf32>
    %10 = arith.mulf %8, %9 : vector<2x8x48xf32>
    %c1_7 = arith.constant 1 : index
    %c0_8 = arith.constant 0 : index
    %11 = vector.load %arg2[%c1_7, %c0_8] : memref<25x128xf32, #tpu.memory_space<vmem>>, vector<1x48xf32>
    %12 = vector.shape_cast %11 : vector<1x48xf32> to vector<1x1x48xf32>
    %13 = vector.broadcast %5 : vector<2x8x1xf32> to vector<2x8x48xf32>
    %14 = vector.broadcast %12 : vector<1x1x48xf32> to vector<2x8x48xf32>
    %15 = arith.mulf %13, %14 : vector<2x8x48xf32>
    %16 = arith.addf %10, %15 : vector<2x8x48xf32>
    %c2 = arith.constant 2 : index
    %c0_9 = arith.constant 0 : index
    %17 = vector.load %arg2[%c2, %c0_9] : memref<25x128xf32, #tpu.memory_space<vmem>>, vector<1x48xf32>
    %18 = vector.shape_cast %17 : vector<1x48xf32> to vector<1x1x48xf32>
    %19 = vector.broadcast %18 : vector<1x1x48xf32> to vector<2x8x48xf32>
    %20 = arith.addf %16, %19 : vector<2x8x48xf32>
    %c0_10 = arith.constant 0 : index
    %c256 = arith.constant 256 : index
    %21 = vector.load %arg1[%c0_10, %c256] : memref<17x2176xf32, #tpu.memory_space<vmem>>, vector<16x48xf32>
    %c3 = arith.constant 3 : index
    %c0_11 = arith.constant 0 : index
    %22 = vector.load %arg2[%c3, %c0_11] : memref<25x128xf32, #tpu.memory_space<vmem>>, vector<1x16xf32>
    %cst = arith.constant 0.000000e+00 : f32
    %23 = vector.broadcast %cst : f32 to vector<2x16xf32>
    %24 = vector.extract_strided_slice %20 {offsets = [0, 0, 0], sizes = [2, 1, 48], strides = [1, 1, 1]} : vector<2x8x48xf32> to vector<2x1x48xf32>
    %25 = vector.shape_cast %24 : vector<2x1x48xf32> to vector<2x48xf32>
    %cst_12 = arith.constant dense<0.000000e+00> : vector<2x48xf32>
    %26 = tpu.matmul %23, %21, %cst_12 {dimension_numbers = #tpu.dot_dimension_numbers<[1], [0], [0], [1], [0, 0, 1, 1], [], []>} : vector<2x16xf32>, vector<16x48xf32>, vector<2x48xf32> -> vector<2x48xf32>
    %27 = vector.extract_strided_slice %25 {offsets = [0, 0], sizes = [2, 32], strides = [1, 1]} : vector<2x48xf32> to vector<2x32xf32>
    %28 = vector.extract_strided_slice %26 {offsets = [0, 0], sizes = [2, 32], strides = [1, 1]} : vector<2x48xf32> to vector<2x32xf32>
    %29 = arith.addf %27, %28 : vector<2x32xf32>
    %cst_13 = arith.constant 5.000000e-01 : f32
    %30 = vector.broadcast %cst_13 : f32 to vector<2x32xf32>
    %31 = arith.mulf %30, %29 : vector<2x32xf32>
    %32 = math.tanh %31 : vector<2x32xf32>
    %cst_14 = arith.constant 1.000000e+00 : f32
    %33 = vector.broadcast %cst_14 : f32 to vector<2x32xf32>
    %34 = arith.addf %32, %33 : vector<2x32xf32>
    %cst_15 = arith.constant 5.000000e-01 : f32
    %35 = vector.broadcast %cst_15 : f32 to vector<2x32xf32>
    %36 = arith.mulf %35, %34 : vector<2x32xf32>
    %37 = vector.extract_strided_slice %36 {offsets = [0, 0], sizes = [2, 16], strides = [1, 1]} : vector<2x32xf32> to vector<2x16xf32>
    %38 = vector.extract_strided_slice %36 {offsets = [0, 16], sizes = [2, 16], strides = [1, 1]} : vector<2x32xf32> to vector<2x16xf32>
    %39 = vector.extract_strided_slice %25 {offsets = [0, 32], sizes = [2, 16], strides = [1, 1]} : vector<2x48xf32> to vector<2x16xf32>
    %40 = vector.extract_strided_slice %26 {offsets = [0, 32], sizes = [2, 16], strides = [1, 1]} : vector<2x48xf32> to vector<2x16xf32>
    %41 = vector.broadcast %22 : vector<1x16xf32> to vector<2x16xf32>
    %42 = arith.addf %40, %41 : vector<2x16xf32>
    %43 = arith.mulf %37, %42 : vector<2x16xf32>
    %44 = arith.addf %39, %43 : vector<2x16xf32>
    %45 = math.tanh %44 : vector<2x16xf32>
    %46 = arith.subf %23, %45 : vector<2x16xf32>
    %47 = arith.mulf %38, %46 : vector<2x16xf32>
    %48 = arith.addf %45, %47 : vector<2x16xf32>
    %49 = vector.extract_strided_slice %20 {offsets = [0, 1, 0], sizes = [2, 1, 48], strides = [1, 1, 1]} : vector<2x8x48xf32> to vector<2x1x48xf32>
    %50 = vector.shape_cast %49 : vector<2x1x48xf32> to vector<2x48xf32>
    %cst_16 = arith.constant dense<0.000000e+00> : vector<2x48xf32>
    %51 = tpu.matmul %48, %21, %cst_16 {dimension_numbers = #tpu.dot_dimension_numbers<[1], [0], [0], [1], [0, 0, 1, 1], [], []>} : vector<2x16xf32>, vector<16x48xf32>, vector<2x48xf32> -> vector<2x48xf32>
    %52 = vector.extract_strided_slice %50 {offsets = [0, 0], sizes = [2, 32], strides = [1, 1]} : vector<2x48xf32> to vector<2x32xf32>
    %53 = vector.extract_strided_slice %51 {offsets = [0, 0], sizes = [2, 32], strides = [1, 1]} : vector<2x48xf32> to vector<2x32xf32>
    %54 = arith.addf %52, %53 : vector<2x32xf32>
    %cst_17 = arith.constant 5.000000e-01 : f32
    %55 = vector.broadcast %cst_17 : f32 to vector<2x32xf32>
    %56 = arith.mulf %55, %54 : vector<2x32xf32>
    %57 = math.tanh %56 : vector<2x32xf32>
    %cst_18 = arith.constant 1.000000e+00 : f32
    %58 = vector.broadcast %cst_18 : f32 to vector<2x32xf32>
    %59 = arith.addf %57, %58 : vector<2x32xf32>
    %cst_19 = arith.constant 5.000000e-01 : f32
    %60 = vector.broadcast %cst_19 : f32 to vector<2x32xf32>
    %61 = arith.mulf %60, %59 : vector<2x32xf32>
    %62 = vector.extract_strided_slice %61 {offsets = [0, 0], sizes = [2, 16], strides = [1, 1]} : vector<2x32xf32> to vector<2x16xf32>
    %63 = vector.extract_strided_slice %61 {offsets = [0, 16], sizes = [2, 16], strides = [1, 1]} : vector<2x32xf32> to vector<2x16xf32>
    %64 = vector.extract_strided_slice %50 {offsets = [0, 32], sizes = [2, 16], strides = [1, 1]} : vector<2x48xf32> to vector<2x16xf32>
    %65 = vector.extract_strided_slice %51 {offsets = [0, 32], sizes = [2, 16], strides = [1, 1]} : vector<2x48xf32> to vector<2x16xf32>
    %66 = vector.broadcast %22 : vector<1x16xf32> to vector<2x16xf32>
    %67 = arith.addf %65, %66 : vector<2x16xf32>
    %68 = arith.mulf %62, %67 : vector<2x16xf32>
    %69 = arith.addf %64, %68 : vector<2x16xf32>
    %70 = math.tanh %69 : vector<2x16xf32>
    %71 = arith.subf %48, %70 : vector<2x16xf32>
    %72 = arith.mulf %63, %71 : vector<2x16xf32>
    %73 = arith.addf %70, %72 : vector<2x16xf32>
    %74 = vector.extract_strided_slice %20 {offsets = [0, 2, 0], sizes = [2, 1, 48], strides = [1, 1, 1]} : vector<2x8x48xf32> to vector<2x1x48xf32>
    %75 = vector.shape_cast %74 : vector<2x1x48xf32> to vector<2x48xf32>
    %cst_20 = arith.constant dense<0.000000e+00> : vector<2x48xf32>
    %76 = tpu.matmul %73, %21, %cst_20 {dimension_numbers = #tpu.dot_dimension_numbers<[1], [0], [0], [1], [0, 0, 1, 1], [], []>} : vector<2x16xf32>, vector<16x48xf32>, vector<2x48xf32> -> vector<2x48xf32>
    %77 = vector.extract_strided_slice %75 {offsets = [0, 0], sizes = [2, 32], strides = [1, 1]} : vector<2x48xf32> to vector<2x32xf32>
    %78 = vector.extract_strided_slice %76 {offsets = [0, 0], sizes = [2, 32], strides = [1, 1]} : vector<2x48xf32> to vector<2x32xf32>
    %79 = arith.addf %77, %78 : vector<2x32xf32>
    %cst_21 = arith.constant 5.000000e-01 : f32
    %80 = vector.broadcast %cst_21 : f32 to vector<2x32xf32>
    %81 = arith.mulf %80, %79 : vector<2x32xf32>
    %82 = math.tanh %81 : vector<2x32xf32>
    %cst_22 = arith.constant 1.000000e+00 : f32
    %83 = vector.broadcast %cst_22 : f32 to vector<2x32xf32>
    %84 = arith.addf %82, %83 : vector<2x32xf32>
    %cst_23 = arith.constant 5.000000e-01 : f32
    %85 = vector.broadcast %cst_23 : f32 to vector<2x32xf32>
    %86 = arith.mulf %85, %84 : vector<2x32xf32>
    %87 = vector.extract_strided_slice %86 {offsets = [0, 0], sizes = [2, 16], strides = [1, 1]} : vector<2x32xf32> to vector<2x16xf32>
    %88 = vector.extract_strided_slice %86 {offsets = [0, 16], sizes = [2, 16], strides = [1, 1]} : vector<2x32xf32> to vector<2x16xf32>
    %89 = vector.extract_strided_slice %75 {offsets = [0, 32], sizes = [2, 16], strides = [1, 1]} : vector<2x48xf32> to vector<2x16xf32>
    %90 = vector.extract_strided_slice %76 {offsets = [0, 32], sizes = [2, 16], strides = [1, 1]} : vector<2x48xf32> to vector<2x16xf32>
    %91 = vector.broadcast %22 : vector<1x16xf32> to vector<2x16xf32>
    %92 = arith.addf %90, %91 : vector<2x16xf32>
    %93 = arith.mulf %87, %92 : vector<2x16xf32>
    %94 = arith.addf %89, %93 : vector<2x16xf32>
    %95 = math.tanh %94 : vector<2x16xf32>
    %96 = arith.subf %73, %95 : vector<2x16xf32>
    %97 = arith.mulf %88, %96 : vector<2x16xf32>
    %98 = arith.addf %95, %97 : vector<2x16xf32>
    %99 = vector.extract_strided_slice %20 {offsets = [0, 3, 0], sizes = [2, 1, 48], strides = [1, 1, 1]} : vector<2x8x48xf32> to vector<2x1x48xf32>
    %100 = vector.shape_cast %99 : vector<2x1x48xf32> to vector<2x48xf32>
    %cst_24 = arith.constant dense<0.000000e+00> : vector<2x48xf32>
    %101 = tpu.matmul %98, %21, %cst_24 {dimension_numbers = #tpu.dot_dimension_numbers<[1], [0], [0], [1], [0, 0, 1, 1], [], []>} : vector<2x16xf32>, vector<16x48xf32>, vector<2x48xf32> -> vector<2x48xf32>
    %102 = vector.extract_strided_slice %100 {offsets = [0, 0], sizes = [2, 32], strides = [1, 1]} : vector<2x48xf32> to vector<2x32xf32>
    %103 = vector.extract_strided_slice %101 {offsets = [0, 0], sizes = [2, 32], strides = [1, 1]} : vector<2x48xf32> to vector<2x32xf32>
    %104 = arith.addf %102, %103 : vector<2x32xf32>
    %cst_25 = arith.constant 5.000000e-01 : f32
    %105 = vector.broadcast %cst_25 : f32 to vector<2x32xf32>
    %106 = arith.mulf %105, %104 : vector<2x32xf32>
    %107 = math.tanh %106 : vector<2x32xf32>
    %cst_26 = arith.constant 1.000000e+00 : f32
    %108 = vector.broadcast %cst_26 : f32 to vector<2x32xf32>
    %109 = arith.addf %107, %108 : vector<2x32xf32>
    %cst_27 = arith.constant 5.000000e-01 : f32
    %110 = vector.broadcast %cst_27 : f32 to vector<2x32xf32>
    %111 = arith.mulf %110, %109 : vector<2x32xf32>
    %112 = vector.extract_strided_slice %111 {offsets = [0, 0], sizes = [2, 16], strides = [1, 1]} : vector<2x32xf32> to vector<2x16xf32>
    %113 = vector.extract_strided_slice %111 {offsets = [0, 16], sizes = [2, 16], strides = [1, 1]} : vector<2x32xf32> to vector<2x16xf32>
    %114 = vector.extract_strided_slice %100 {offsets = [0, 32], sizes = [2, 16], strides = [1, 1]} : vector<2x48xf32> to vector<2x16xf32>
    %115 = vector.extract_strided_slice %101 {offsets = [0, 32], sizes = [2, 16], strides = [1, 1]} : vector<2x48xf32> to vector<2x16xf32>
    %116 = vector.broadcast %22 : vector<1x16xf32> to vector<2x16xf32>
    %117 = arith.addf %115, %116 : vector<2x16xf32>
    %118 = arith.mulf %112, %117 : vector<2x16xf32>
    %119 = arith.addf %114, %118 : vector<2x16xf32>
    %120 = math.tanh %119 : vector<2x16xf32>
    %121 = arith.subf %98, %120 : vector<2x16xf32>
    %122 = arith.mulf %113, %121 : vector<2x16xf32>
    %123 = arith.addf %120, %122 : vector<2x16xf32>
    %124 = vector.extract_strided_slice %20 {offsets = [0, 4, 0], sizes = [2, 1, 48], strides = [1, 1, 1]} : vector<2x8x48xf32> to vector<2x1x48xf32>
    %125 = vector.shape_cast %124 : vector<2x1x48xf32> to vector<2x48xf32>
    %cst_28 = arith.constant dense<0.000000e+00> : vector<2x48xf32>
    %126 = tpu.matmul %123, %21, %cst_28 {dimension_numbers = #tpu.dot_dimension_numbers<[1], [0], [0], [1], [0, 0, 1, 1], [], []>} : vector<2x16xf32>, vector<16x48xf32>, vector<2x48xf32> -> vector<2x48xf32>
    %127 = vector.extract_strided_slice %125 {offsets = [0, 0], sizes = [2, 32], strides = [1, 1]} : vector<2x48xf32> to vector<2x32xf32>
    %128 = vector.extract_strided_slice %126 {offsets = [0, 0], sizes = [2, 32], strides = [1, 1]} : vector<2x48xf32> to vector<2x32xf32>
    %129 = arith.addf %127, %128 : vector<2x32xf32>
    %cst_29 = arith.constant 5.000000e-01 : f32
    %130 = vector.broadcast %cst_29 : f32 to vector<2x32xf32>
    %131 = arith.mulf %130, %129 : vector<2x32xf32>
    %132 = math.tanh %131 : vector<2x32xf32>
    %cst_30 = arith.constant 1.000000e+00 : f32
    %133 = vector.broadcast %cst_30 : f32 to vector<2x32xf32>
    %134 = arith.addf %132, %133 : vector<2x32xf32>
    %cst_31 = arith.constant 5.000000e-01 : f32
    %135 = vector.broadcast %cst_31 : f32 to vector<2x32xf32>
    %136 = arith.mulf %135, %134 : vector<2x32xf32>
    %137 = vector.extract_strided_slice %136 {offsets = [0, 0], sizes = [2, 16], strides = [1, 1]} : vector<2x32xf32> to vector<2x16xf32>
    %138 = vector.extract_strided_slice %136 {offsets = [0, 16], sizes = [2, 16], strides = [1, 1]} : vector<2x32xf32> to vector<2x16xf32>
    %139 = vector.extract_strided_slice %125 {offsets = [0, 32], sizes = [2, 16], strides = [1, 1]} : vector<2x48xf32> to vector<2x16xf32>
    %140 = vector.extract_strided_slice %126 {offsets = [0, 32], sizes = [2, 16], strides = [1, 1]} : vector<2x48xf32> to vector<2x16xf32>
    %141 = vector.broadcast %22 : vector<1x16xf32> to vector<2x16xf32>
    %142 = arith.addf %140, %141 : vector<2x16xf32>
    %143 = arith.mulf %137, %142 : vector<2x16xf32>
    %144 = arith.addf %139, %143 : vector<2x16xf32>
    %145 = math.tanh %144 : vector<2x16xf32>
    %146 = arith.subf %123, %145 : vector<2x16xf32>
    %147 = arith.mulf %138, %146 : vector<2x16xf32>
    %148 = arith.addf %145, %147 : vector<2x16xf32>
    %149 = vector.extract_strided_slice %20 {offsets = [0, 5, 0], sizes = [2, 1, 48], strides = [1, 1, 1]} : vector<2x8x48xf32> to vector<2x1x48xf32>
    %150 = vector.shape_cast %149 : vector<2x1x48xf32> to vector<2x48xf32>
    %cst_32 = arith.constant dense<0.000000e+00> : vector<2x48xf32>
    %151 = tpu.matmul %148, %21, %cst_32 {dimension_numbers = #tpu.dot_dimension_numbers<[1], [0], [0], [1], [0, 0, 1, 1], [], []>} : vector<2x16xf32>, vector<16x48xf32>, vector<2x48xf32> -> vector<2x48xf32>
    %152 = vector.extract_strided_slice %150 {offsets = [0, 0], sizes = [2, 32], strides = [1, 1]} : vector<2x48xf32> to vector<2x32xf32>
    %153 = vector.extract_strided_slice %151 {offsets = [0, 0], sizes = [2, 32], strides = [1, 1]} : vector<2x48xf32> to vector<2x32xf32>
    %154 = arith.addf %152, %153 : vector<2x32xf32>
    %cst_33 = arith.constant 5.000000e-01 : f32
    %155 = vector.broadcast %cst_33 : f32 to vector<2x32xf32>
    %156 = arith.mulf %155, %154 : vector<2x32xf32>
    %157 = math.tanh %156 : vector<2x32xf32>
    %cst_34 = arith.constant 1.000000e+00 : f32
    %158 = vector.broadcast %cst_34 : f32 to vector<2x32xf32>
    %159 = arith.addf %157, %158 : vector<2x32xf32>
    %cst_35 = arith.constant 5.000000e-01 : f32
    %160 = vector.broadcast %cst_35 : f32 to vector<2x32xf32>
    %161 = arith.mulf %160, %159 : vector<2x32xf32>
    %162 = vector.extract_strided_slice %161 {offsets = [0, 0], sizes = [2, 16], strides = [1, 1]} : vector<2x32xf32> to vector<2x16xf32>
    %163 = vector.extract_strided_slice %161 {offsets = [0, 16], sizes = [2, 16], strides = [1, 1]} : vector<2x32xf32> to vector<2x16xf32>
    %164 = vector.extract_strided_slice %150 {offsets = [0, 32], sizes = [2, 16], strides = [1, 1]} : vector<2x48xf32> to vector<2x16xf32>
    %165 = vector.extract_strided_slice %151 {offsets = [0, 32], sizes = [2, 16], strides = [1, 1]} : vector<2x48xf32> to vector<2x16xf32>
    %166 = vector.broadcast %22 : vector<1x16xf32> to vector<2x16xf32>
    %167 = arith.addf %165, %166 : vector<2x16xf32>
    %168 = arith.mulf %162, %167 : vector<2x16xf32>
    %169 = arith.addf %164, %168 : vector<2x16xf32>
    %170 = math.tanh %169 : vector<2x16xf32>
    %171 = arith.subf %148, %170 : vector<2x16xf32>
    %172 = arith.mulf %163, %171 : vector<2x16xf32>
    %173 = arith.addf %170, %172 : vector<2x16xf32>
    %174 = vector.extract_strided_slice %20 {offsets = [0, 6, 0], sizes = [2, 1, 48], strides = [1, 1, 1]} : vector<2x8x48xf32> to vector<2x1x48xf32>
    %175 = vector.shape_cast %174 : vector<2x1x48xf32> to vector<2x48xf32>
    %cst_36 = arith.constant dense<0.000000e+00> : vector<2x48xf32>
    %176 = tpu.matmul %173, %21, %cst_36 {dimension_numbers = #tpu.dot_dimension_numbers<[1], [0], [0], [1], [0, 0, 1, 1], [], []>} : vector<2x16xf32>, vector<16x48xf32>, vector<2x48xf32> -> vector<2x48xf32>
    %177 = vector.extract_strided_slice %175 {offsets = [0, 0], sizes = [2, 32], strides = [1, 1]} : vector<2x48xf32> to vector<2x32xf32>
    %178 = vector.extract_strided_slice %176 {offsets = [0, 0], sizes = [2, 32], strides = [1, 1]} : vector<2x48xf32> to vector<2x32xf32>
    %179 = arith.addf %177, %178 : vector<2x32xf32>
    %cst_37 = arith.constant 5.000000e-01 : f32
    %180 = vector.broadcast %cst_37 : f32 to vector<2x32xf32>
    %181 = arith.mulf %180, %179 : vector<2x32xf32>
    %182 = math.tanh %181 : vector<2x32xf32>
    %cst_38 = arith.constant 1.000000e+00 : f32
    %183 = vector.broadcast %cst_38 : f32 to vector<2x32xf32>
    %184 = arith.addf %182, %183 : vector<2x32xf32>
    %cst_39 = arith.constant 5.000000e-01 : f32
    %185 = vector.broadcast %cst_39 : f32 to vector<2x32xf32>
    %186 = arith.mulf %185, %184 : vector<2x32xf32>
    %187 = vector.extract_strided_slice %186 {offsets = [0, 0], sizes = [2, 16], strides = [1, 1]} : vector<2x32xf32> to vector<2x16xf32>
    %188 = vector.extract_strided_slice %186 {offsets = [0, 16], sizes = [2, 16], strides = [1, 1]} : vector<2x32xf32> to vector<2x16xf32>
    %189 = vector.extract_strided_slice %175 {offsets = [0, 32], sizes = [2, 16], strides = [1, 1]} : vector<2x48xf32> to vector<2x16xf32>
    %190 = vector.extract_strided_slice %176 {offsets = [0, 32], sizes = [2, 16], strides = [1, 1]} : vector<2x48xf32> to vector<2x16xf32>
    %191 = vector.broadcast %22 : vector<1x16xf32> to vector<2x16xf32>
    %192 = arith.addf %190, %191 : vector<2x16xf32>
    %193 = arith.mulf %187, %192 : vector<2x16xf32>
    %194 = arith.addf %189, %193 : vector<2x16xf32>
    %195 = math.tanh %194 : vector<2x16xf32>
    %196 = arith.subf %173, %195 : vector<2x16xf32>
    %197 = arith.mulf %188, %196 : vector<2x16xf32>
    %198 = arith.addf %195, %197 : vector<2x16xf32>
    %199 = vector.extract_strided_slice %20 {offsets = [0, 7, 0], sizes = [2, 1, 48], strides = [1, 1, 1]} : vector<2x8x48xf32> to vector<2x1x48xf32>
    %200 = vector.shape_cast %199 : vector<2x1x48xf32> to vector<2x48xf32>
    %cst_40 = arith.constant dense<0.000000e+00> : vector<2x48xf32>
    %201 = tpu.matmul %198, %21, %cst_40 {dimension_numbers = #tpu.dot_dimension_numbers<[1], [0], [0], [1], [0, 0, 1, 1], [], []>} : vector<2x16xf32>, vector<16x48xf32>, vector<2x48xf32> -> vector<2x48xf32>
    %202 = vector.extract_strided_slice %200 {offsets = [0, 0], sizes = [2, 32], strides = [1, 1]} : vector<2x48xf32> to vector<2x32xf32>
    %203 = vector.extract_strided_slice %201 {offsets = [0, 0], sizes = [2, 32], strides = [1, 1]} : vector<2x48xf32> to vector<2x32xf32>
    %204 = arith.addf %202, %203 : vector<2x32xf32>
    %cst_41 = arith.constant 5.000000e-01 : f32
    %205 = vector.broadcast %cst_41 : f32 to vector<2x32xf32>
    %206 = arith.mulf %205, %204 : vector<2x32xf32>
    %207 = math.tanh %206 : vector<2x32xf32>
    %cst_42 = arith.constant 1.000000e+00 : f32
    %208 = vector.broadcast %cst_42 : f32 to vector<2x32xf32>
    %209 = arith.addf %207, %208 : vector<2x32xf32>
    %cst_43 = arith.constant 5.000000e-01 : f32
    %210 = vector.broadcast %cst_43 : f32 to vector<2x32xf32>
    %211 = arith.mulf %210, %209 : vector<2x32xf32>
    %212 = vector.extract_strided_slice %211 {offsets = [0, 0], sizes = [2, 16], strides = [1, 1]} : vector<2x32xf32> to vector<2x16xf32>
    %213 = vector.extract_strided_slice %211 {offsets = [0, 16], sizes = [2, 16], strides = [1, 1]} : vector<2x32xf32> to vector<2x16xf32>
    %214 = vector.extract_strided_slice %200 {offsets = [0, 32], sizes = [2, 16], strides = [1, 1]} : vector<2x48xf32> to vector<2x16xf32>
    %215 = vector.extract_strided_slice %201 {offsets = [0, 32], sizes = [2, 16], strides = [1, 1]} : vector<2x48xf32> to vector<2x16xf32>
    %216 = vector.broadcast %22 : vector<1x16xf32> to vector<2x16xf32>
    %217 = arith.addf %215, %216 : vector<2x16xf32>
    %218 = arith.mulf %212, %217 : vector<2x16xf32>
    %219 = arith.addf %214, %218 : vector<2x16xf32>
    %220 = math.tanh %219 : vector<2x16xf32>
    %221 = arith.subf %198, %220 : vector<2x16xf32>
    %222 = arith.mulf %213, %221 : vector<2x16xf32>
    %223 = arith.addf %220, %222 : vector<2x16xf32>
    %224 = vector.shape_cast %48 : vector<2x16xf32> to vector<2x1x16xf32>
    %225 = vector.shape_cast %73 : vector<2x16xf32> to vector<2x1x16xf32>
    %226 = vector.shape_cast %98 : vector<2x16xf32> to vector<2x1x16xf32>
    %227 = vector.shape_cast %123 : vector<2x16xf32> to vector<2x1x16xf32>
    %228 = vector.shape_cast %148 : vector<2x16xf32> to vector<2x1x16xf32>
    %229 = vector.shape_cast %173 : vector<2x16xf32> to vector<2x1x16xf32>
    %230 = vector.shape_cast %198 : vector<2x16xf32> to vector<2x1x16xf32>
    %231 = vector.shape_cast %223 : vector<2x16xf32> to vector<2x1x16xf32>
    %232 = tpu.concatenate %224, %225, %226, %227, %228, %229, %230, %231 in 1 : vector<2x1x16xf32>, vector<2x1x16xf32>, vector<2x1x16xf32>, vector<2x1x16xf32>, vector<2x1x16xf32>, vector<2x1x16xf32>, vector<2x1x16xf32>, vector<2x1x16xf32> -> vector<2x8x16xf32>
    "tpu.trace_start"() <{level = 10 : i32, message = "bts,bsc->btc"}> : () -> ()
    %cst_44 = arith.constant dense<0.000000e+00> : vector<2x8x16xf32>
    %233 = tpu.matmul %3, %232, %cst_44 {dimension_numbers = #tpu.dot_dimension_numbers<[2], [1], [1], [2], [0, 0, 0, 1, 1, 2], [0], [0]>} : vector<2x8x8xf32>, vector<2x8x16xf32>, vector<2x8x16xf32> -> vector<2x8x16xf32>
    "tpu.trace_stop"() : () -> ()
    %234 = vector.extract_strided_slice %232 {offsets = [0, 0, 0], sizes = [2, 8, 8], strides = [1, 1, 1]} : vector<2x8x16xf32> to vector<2x8x8xf32>
    %235 = vector.extract_strided_slice %233 {offsets = [0, 0, 8], sizes = [2, 8, 8], strides = [1, 1, 1]} : vector<2x8x16xf32> to vector<2x8x8xf32>
    %236 = tpu.concatenate %234, %235 in 2 : vector<2x8x8xf32>, vector<2x8x8xf32> -> vector<2x8x16xf32>
    %237 = vector.extract_strided_slice %233 {offsets = [0, 0, 0], sizes = [2, 8, 8], strides = [1, 1, 1]} : vector<2x8x16xf32> to vector<2x8x8xf32>
    %238 = vector.extract_strided_slice %232 {offsets = [0, 0, 8], sizes = [2, 8, 8], strides = [1, 1, 1]} : vector<2x8x16xf32> to vector<2x8x8xf32>
    %239 = tpu.concatenate %237, %238 in 2 : vector<2x8x8xf32>, vector<2x8x8xf32> -> vector<2x8x16xf32>
    %240 = vector.shape_cast %236 : vector<2x8x16xf32> to vector<16x16xf32>
    %c0_45 = arith.constant 0 : index
    %c0_46 = arith.constant 0 : index
    %241 = vector.load %arg1[%c0_45, %c0_46] : memref<17x2176xf32, #tpu.memory_space<vmem>>, vector<16x48xf32>
    %cst_47 = arith.constant dense<0.000000e+00> : vector<16x48xf32>
    %242 = tpu.matmul %240, %241, %cst_47 {dimension_numbers = #tpu.dot_dimension_numbers<[1], [0], [0], [1], [0, 0, 1, 1], [], []>} : vector<16x16xf32>, vector<16x48xf32>, vector<16x48xf32> -> vector<16x48xf32>
    %243 = vector.shape_cast %239 : vector<2x8x16xf32> to vector<16x16xf32>
    %c0_48 = arith.constant 0 : index
    %c128 = arith.constant 128 : index
    %244 = vector.load %arg1[%c0_48, %c128] : memref<17x2176xf32, #tpu.memory_space<vmem>>, vector<16x48xf32>
    %cst_49 = arith.constant dense<0.000000e+00> : vector<16x48xf32>
    %245 = tpu.matmul %243, %244, %cst_49 {dimension_numbers = #tpu.dot_dimension_numbers<[1], [0], [0], [1], [0, 0, 1, 1], [], []>} : vector<16x16xf32>, vector<16x48xf32>, vector<16x48xf32> -> vector<16x48xf32>
    %246 = arith.addf %242, %245 : vector<16x48xf32>
    %247 = vector.shape_cast %246 : vector<16x48xf32> to vector<2x8x48xf32>
    %c4 = arith.constant 4 : index
    %c0_50 = arith.constant 0 : index
    %248 = vector.load %arg2[%c4, %c0_50] : memref<25x128xf32, #tpu.memory_space<vmem>>, vector<1x48xf32>
    %249 = vector.shape_cast %248 : vector<1x48xf32> to vector<1x1x48xf32>
    %250 = vector.broadcast %249 : vector<1x1x48xf32> to vector<2x8x48xf32>
    %251 = arith.addf %247, %250 : vector<2x8x48xf32>
    %c0_51 = arith.constant 0 : index
    %c384 = arith.constant 384 : index
    %252 = vector.load %arg1[%c0_51, %c384] : memref<17x2176xf32, #tpu.memory_space<vmem>>, vector<16x48xf32>
    %c5 = arith.constant 5 : index
    %c0_52 = arith.constant 0 : index
    %253 = vector.load %arg2[%c5, %c0_52] : memref<25x128xf32, #tpu.memory_space<vmem>>, vector<1x16xf32>
    %cst_53 = arith.constant 0.000000e+00 : f32
    %254 = vector.broadcast %cst_53 : f32 to vector<2x16xf32>
    %255 = vector.extract_strided_slice %251 {offsets = [0, 0, 0], sizes = [2, 1, 48], strides = [1, 1, 1]} : vector<2x8x48xf32> to vector<2x1x48xf32>
    %256 = vector.shape_cast %255 : vector<2x1x48xf32> to vector<2x48xf32>
    %cst_54 = arith.constant dense<0.000000e+00> : vector<2x48xf32>
    %257 = tpu.matmul %254, %252, %cst_54 {dimension_numbers = #tpu.dot_dimension_numbers<[1], [0], [0], [1], [0, 0, 1, 1], [], []>} : vector<2x16xf32>, vector<16x48xf32>, vector<2x48xf32> -> vector<2x48xf32>
    %258 = vector.extract_strided_slice %256 {offsets = [0, 0], sizes = [2, 32], strides = [1, 1]} : vector<2x48xf32> to vector<2x32xf32>
    %259 = vector.extract_strided_slice %257 {offsets = [0, 0], sizes = [2, 32], strides = [1, 1]} : vector<2x48xf32> to vector<2x32xf32>
    %260 = arith.addf %258, %259 : vector<2x32xf32>
    %cst_55 = arith.constant 5.000000e-01 : f32
    %261 = vector.broadcast %cst_55 : f32 to vector<2x32xf32>
    %262 = arith.mulf %261, %260 : vector<2x32xf32>
    %263 = math.tanh %262 : vector<2x32xf32>
    %cst_56 = arith.constant 1.000000e+00 : f32
    %264 = vector.broadcast %cst_56 : f32 to vector<2x32xf32>
    %265 = arith.addf %263, %264 : vector<2x32xf32>
    %cst_57 = arith.constant 5.000000e-01 : f32
    %266 = vector.broadcast %cst_57 : f32 to vector<2x32xf32>
    %267 = arith.mulf %266, %265 : vector<2x32xf32>
    %268 = vector.extract_strided_slice %267 {offsets = [0, 0], sizes = [2, 16], strides = [1, 1]} : vector<2x32xf32> to vector<2x16xf32>
    %269 = vector.extract_strided_slice %267 {offsets = [0, 16], sizes = [2, 16], strides = [1, 1]} : vector<2x32xf32> to vector<2x16xf32>
    %270 = vector.extract_strided_slice %256 {offsets = [0, 32], sizes = [2, 16], strides = [1, 1]} : vector<2x48xf32> to vector<2x16xf32>
    %271 = vector.extract_strided_slice %257 {offsets = [0, 32], sizes = [2, 16], strides = [1, 1]} : vector<2x48xf32> to vector<2x16xf32>
    %272 = vector.broadcast %253 : vector<1x16xf32> to vector<2x16xf32>
    %273 = arith.addf %271, %272 : vector<2x16xf32>
    %274 = arith.mulf %268, %273 : vector<2x16xf32>
    %275 = arith.addf %270, %274 : vector<2x16xf32>
    %276 = math.tanh %275 : vector<2x16xf32>
    %277 = arith.subf %254, %276 : vector<2x16xf32>
    %278 = arith.mulf %269, %277 : vector<2x16xf32>
    %279 = arith.addf %276, %278 : vector<2x16xf32>
    %280 = vector.extract_strided_slice %251 {offsets = [0, 1, 0], sizes = [2, 1, 48], strides = [1, 1, 1]} : vector<2x8x48xf32> to vector<2x1x48xf32>
    %281 = vector.shape_cast %280 : vector<2x1x48xf32> to vector<2x48xf32>
    %cst_58 = arith.constant dense<0.000000e+00> : vector<2x48xf32>
    %282 = tpu.matmul %279, %252, %cst_58 {dimension_numbers = #tpu.dot_dimension_numbers<[1], [0], [0], [1], [0, 0, 1, 1], [], []>} : vector<2x16xf32>, vector<16x48xf32>, vector<2x48xf32> -> vector<2x48xf32>
    %283 = vector.extract_strided_slice %281 {offsets = [0, 0], sizes = [2, 32], strides = [1, 1]} : vector<2x48xf32> to vector<2x32xf32>
    %284 = vector.extract_strided_slice %282 {offsets = [0, 0], sizes = [2, 32], strides = [1, 1]} : vector<2x48xf32> to vector<2x32xf32>
    %285 = arith.addf %283, %284 : vector<2x32xf32>
    %cst_59 = arith.constant 5.000000e-01 : f32
    %286 = vector.broadcast %cst_59 : f32 to vector<2x32xf32>
    %287 = arith.mulf %286, %285 : vector<2x32xf32>
    %288 = math.tanh %287 : vector<2x32xf32>
    %cst_60 = arith.constant 1.000000e+00 : f32
    %289 = vector.broadcast %cst_60 : f32 to vector<2x32xf32>
    %290 = arith.addf %288, %289 : vector<2x32xf32>
    %cst_61 = arith.constant 5.000000e-01 : f32
    %291 = vector.broadcast %cst_61 : f32 to vector<2x32xf32>
    %292 = arith.mulf %291, %290 : vector<2x32xf32>
    %293 = vector.extract_strided_slice %292 {offsets = [0, 0], sizes = [2, 16], strides = [1, 1]} : vector<2x32xf32> to vector<2x16xf32>
    %294 = vector.extract_strided_slice %292 {offsets = [0, 16], sizes = [2, 16], strides = [1, 1]} : vector<2x32xf32> to vector<2x16xf32>
    %295 = vector.extract_strided_slice %281 {offsets = [0, 32], sizes = [2, 16], strides = [1, 1]} : vector<2x48xf32> to vector<2x16xf32>
    %296 = vector.extract_strided_slice %282 {offsets = [0, 32], sizes = [2, 16], strides = [1, 1]} : vector<2x48xf32> to vector<2x16xf32>
    %297 = vector.broadcast %253 : vector<1x16xf32> to vector<2x16xf32>
    %298 = arith.addf %296, %297 : vector<2x16xf32>
    %299 = arith.mulf %293, %298 : vector<2x16xf32>
    %300 = arith.addf %295, %299 : vector<2x16xf32>
    %301 = math.tanh %300 : vector<2x16xf32>
    %302 = arith.subf %279, %301 : vector<2x16xf32>
    %303 = arith.mulf %294, %302 : vector<2x16xf32>
    %304 = arith.addf %301, %303 : vector<2x16xf32>
    %305 = vector.extract_strided_slice %251 {offsets = [0, 2, 0], sizes = [2, 1, 48], strides = [1, 1, 1]} : vector<2x8x48xf32> to vector<2x1x48xf32>
    %306 = vector.shape_cast %305 : vector<2x1x48xf32> to vector<2x48xf32>
    %cst_62 = arith.constant dense<0.000000e+00> : vector<2x48xf32>
    %307 = tpu.matmul %304, %252, %cst_62 {dimension_numbers = #tpu.dot_dimension_numbers<[1], [0], [0], [1], [0, 0, 1, 1], [], []>} : vector<2x16xf32>, vector<16x48xf32>, vector<2x48xf32> -> vector<2x48xf32>
    %308 = vector.extract_strided_slice %306 {offsets = [0, 0], sizes = [2, 32], strides = [1, 1]} : vector<2x48xf32> to vector<2x32xf32>
    %309 = vector.extract_strided_slice %307 {offsets = [0, 0], sizes = [2, 32], strides = [1, 1]} : vector<2x48xf32> to vector<2x32xf32>
    %310 = arith.addf %308, %309 : vector<2x32xf32>
    %cst_63 = arith.constant 5.000000e-01 : f32
    %311 = vector.broadcast %cst_63 : f32 to vector<2x32xf32>
    %312 = arith.mulf %311, %310 : vector<2x32xf32>
    %313 = math.tanh %312 : vector<2x32xf32>
    %cst_64 = arith.constant 1.000000e+00 : f32
    %314 = vector.broadcast %cst_64 : f32 to vector<2x32xf32>
    %315 = arith.addf %313, %314 : vector<2x32xf32>
    %cst_65 = arith.constant 5.000000e-01 : f32
    %316 = vector.broadcast %cst_65 : f32 to vector<2x32xf32>
    %317 = arith.mulf %316, %315 : vector<2x32xf32>
    %318 = vector.extract_strided_slice %317 {offsets = [0, 0], sizes = [2, 16], strides = [1, 1]} : vector<2x32xf32> to vector<2x16xf32>
    %319 = vector.extract_strided_slice %317 {offsets = [0, 16], sizes = [2, 16], strides = [1, 1]} : vector<2x32xf32> to vector<2x16xf32>
    %320 = vector.extract_strided_slice %306 {offsets = [0, 32], sizes = [2, 16], strides = [1, 1]} : vector<2x48xf32> to vector<2x16xf32>
    %321 = vector.extract_strided_slice %307 {offsets = [0, 32], sizes = [2, 16], strides = [1, 1]} : vector<2x48xf32> to vector<2x16xf32>
    %322 = vector.broadcast %253 : vector<1x16xf32> to vector<2x16xf32>
    %323 = arith.addf %321, %322 : vector<2x16xf32>
    %324 = arith.mulf %318, %323 : vector<2x16xf32>
    %325 = arith.addf %320, %324 : vector<2x16xf32>
    %326 = math.tanh %325 : vector<2x16xf32>
    %327 = arith.subf %304, %326 : vector<2x16xf32>
    %328 = arith.mulf %319, %327 : vector<2x16xf32>
    %329 = arith.addf %326, %328 : vector<2x16xf32>
    %330 = vector.extract_strided_slice %251 {offsets = [0, 3, 0], sizes = [2, 1, 48], strides = [1, 1, 1]} : vector<2x8x48xf32> to vector<2x1x48xf32>
    %331 = vector.shape_cast %330 : vector<2x1x48xf32> to vector<2x48xf32>
    %cst_66 = arith.constant dense<0.000000e+00> : vector<2x48xf32>
    %332 = tpu.matmul %329, %252, %cst_66 {dimension_numbers = #tpu.dot_dimension_numbers<[1], [0], [0], [1], [0, 0, 1, 1], [], []>} : vector<2x16xf32>, vector<16x48xf32>, vector<2x48xf32> -> vector<2x48xf32>
    %333 = vector.extract_strided_slice %331 {offsets = [0, 0], sizes = [2, 32], strides = [1, 1]} : vector<2x48xf32> to vector<2x32xf32>
    %334 = vector.extract_strided_slice %332 {offsets = [0, 0], sizes = [2, 32], strides = [1, 1]} : vector<2x48xf32> to vector<2x32xf32>
    %335 = arith.addf %333, %334 : vector<2x32xf32>
    %cst_67 = arith.constant 5.000000e-01 : f32
    %336 = vector.broadcast %cst_67 : f32 to vector<2x32xf32>
    %337 = arith.mulf %336, %335 : vector<2x32xf32>
    %338 = math.tanh %337 : vector<2x32xf32>
    %cst_68 = arith.constant 1.000000e+00 : f32
    %339 = vector.broadcast %cst_68 : f32 to vector<2x32xf32>
    %340 = arith.addf %338, %339 : vector<2x32xf32>
    %cst_69 = arith.constant 5.000000e-01 : f32
    %341 = vector.broadcast %cst_69 : f32 to vector<2x32xf32>
    %342 = arith.mulf %341, %340 : vector<2x32xf32>
    %343 = vector.extract_strided_slice %342 {offsets = [0, 0], sizes = [2, 16], strides = [1, 1]} : vector<2x32xf32> to vector<2x16xf32>
    %344 = vector.extract_strided_slice %342 {offsets = [0, 16], sizes = [2, 16], strides = [1, 1]} : vector<2x32xf32> to vector<2x16xf32>
    %345 = vector.extract_strided_slice %331 {offsets = [0, 32], sizes = [2, 16], strides = [1, 1]} : vector<2x48xf32> to vector<2x16xf32>
    %346 = vector.extract_strided_slice %332 {offsets = [0, 32], sizes = [2, 16], strides = [1, 1]} : vector<2x48xf32> to vector<2x16xf32>
    %347 = vector.broadcast %253 : vector<1x16xf32> to vector<2x16xf32>
    %348 = arith.addf %346, %347 : vector<2x16xf32>
    %349 = arith.mulf %343, %348 : vector<2x16xf32>
    %350 = arith.addf %345, %349 : vector<2x16xf32>
    %351 = math.tanh %350 : vector<2x16xf32>
    %352 = arith.subf %329, %351 : vector<2x16xf32>
    %353 = arith.mulf %344, %352 : vector<2x16xf32>
    %354 = arith.addf %351, %353 : vector<2x16xf32>
    %355 = vector.extract_strided_slice %251 {offsets = [0, 4, 0], sizes = [2, 1, 48], strides = [1, 1, 1]} : vector<2x8x48xf32> to vector<2x1x48xf32>
    %356 = vector.shape_cast %355 : vector<2x1x48xf32> to vector<2x48xf32>
    %cst_70 = arith.constant dense<0.000000e+00> : vector<2x48xf32>
    %357 = tpu.matmul %354, %252, %cst_70 {dimension_numbers = #tpu.dot_dimension_numbers<[1], [0], [0], [1], [0, 0, 1, 1], [], []>} : vector<2x16xf32>, vector<16x48xf32>, vector<2x48xf32> -> vector<2x48xf32>
    %358 = vector.extract_strided_slice %356 {offsets = [0, 0], sizes = [2, 32], strides = [1, 1]} : vector<2x48xf32> to vector<2x32xf32>
    %359 = vector.extract_strided_slice %357 {offsets = [0, 0], sizes = [2, 32], strides = [1, 1]} : vector<2x48xf32> to vector<2x32xf32>
    %360 = arith.addf %358, %359 : vector<2x32xf32>
    %cst_71 = arith.constant 5.000000e-01 : f32
    %361 = vector.broadcast %cst_71 : f32 to vector<2x32xf32>
    %362 = arith.mulf %361, %360 : vector<2x32xf32>
    %363 = math.tanh %362 : vector<2x32xf32>
    %cst_72 = arith.constant 1.000000e+00 : f32
    %364 = vector.broadcast %cst_72 : f32 to vector<2x32xf32>
    %365 = arith.addf %363, %364 : vector<2x32xf32>
    %cst_73 = arith.constant 5.000000e-01 : f32
    %366 = vector.broadcast %cst_73 : f32 to vector<2x32xf32>
    %367 = arith.mulf %366, %365 : vector<2x32xf32>
    %368 = vector.extract_strided_slice %367 {offsets = [0, 0], sizes = [2, 16], strides = [1, 1]} : vector<2x32xf32> to vector<2x16xf32>
    %369 = vector.extract_strided_slice %367 {offsets = [0, 16], sizes = [2, 16], strides = [1, 1]} : vector<2x32xf32> to vector<2x16xf32>
    %370 = vector.extract_strided_slice %356 {offsets = [0, 32], sizes = [2, 16], strides = [1, 1]} : vector<2x48xf32> to vector<2x16xf32>
    %371 = vector.extract_strided_slice %357 {offsets = [0, 32], sizes = [2, 16], strides = [1, 1]} : vector<2x48xf32> to vector<2x16xf32>
    %372 = vector.broadcast %253 : vector<1x16xf32> to vector<2x16xf32>
    %373 = arith.addf %371, %372 : vector<2x16xf32>
    %374 = arith.mulf %368, %373 : vector<2x16xf32>
    %375 = arith.addf %370, %374 : vector<2x16xf32>
    %376 = math.tanh %375 : vector<2x16xf32>
    %377 = arith.subf %354, %376 : vector<2x16xf32>
    %378 = arith.mulf %369, %377 : vector<2x16xf32>
    %379 = arith.addf %376, %378 : vector<2x16xf32>
    %380 = vector.extract_strided_slice %251 {offsets = [0, 5, 0], sizes = [2, 1, 48], strides = [1, 1, 1]} : vector<2x8x48xf32> to vector<2x1x48xf32>
    %381 = vector.shape_cast %380 : vector<2x1x48xf32> to vector<2x48xf32>
    %cst_74 = arith.constant dense<0.000000e+00> : vector<2x48xf32>
    %382 = tpu.matmul %379, %252, %cst_74 {dimension_numbers = #tpu.dot_dimension_numbers<[1], [0], [0], [1], [0, 0, 1, 1], [], []>} : vector<2x16xf32>, vector<16x48xf32>, vector<2x48xf32> -> vector<2x48xf32>
    %383 = vector.extract_strided_slice %381 {offsets = [0, 0], sizes = [2, 32], strides = [1, 1]} : vector<2x48xf32> to vector<2x32xf32>
    %384 = vector.extract_strided_slice %382 {offsets = [0, 0], sizes = [2, 32], strides = [1, 1]} : vector<2x48xf32> to vector<2x32xf32>
    %385 = arith.addf %383, %384 : vector<2x32xf32>
    %cst_75 = arith.constant 5.000000e-01 : f32
    %386 = vector.broadcast %cst_75 : f32 to vector<2x32xf32>
    %387 = arith.mulf %386, %385 : vector<2x32xf32>
    %388 = math.tanh %387 : vector<2x32xf32>
    %cst_76 = arith.constant 1.000000e+00 : f32
    %389 = vector.broadcast %cst_76 : f32 to vector<2x32xf32>
    %390 = arith.addf %388, %389 : vector<2x32xf32>
    %cst_77 = arith.constant 5.000000e-01 : f32
    %391 = vector.broadcast %cst_77 : f32 to vector<2x32xf32>
    %392 = arith.mulf %391, %390 : vector<2x32xf32>
    %393 = vector.extract_strided_slice %392 {offsets = [0, 0], sizes = [2, 16], strides = [1, 1]} : vector<2x32xf32> to vector<2x16xf32>
    %394 = vector.extract_strided_slice %392 {offsets = [0, 16], sizes = [2, 16], strides = [1, 1]} : vector<2x32xf32> to vector<2x16xf32>
    %395 = vector.extract_strided_slice %381 {offsets = [0, 32], sizes = [2, 16], strides = [1, 1]} : vector<2x48xf32> to vector<2x16xf32>
    %396 = vector.extract_strided_slice %382 {offsets = [0, 32], sizes = [2, 16], strides = [1, 1]} : vector<2x48xf32> to vector<2x16xf32>
    %397 = vector.broadcast %253 : vector<1x16xf32> to vector<2x16xf32>
    %398 = arith.addf %396, %397 : vector<2x16xf32>
    %399 = arith.mulf %393, %398 : vector<2x16xf32>
    %400 = arith.addf %395, %399 : vector<2x16xf32>
    %401 = math.tanh %400 : vector<2x16xf32>
    %402 = arith.subf %379, %401 : vector<2x16xf32>
    %403 = arith.mulf %394, %402 : vector<2x16xf32>
    %404 = arith.addf %401, %403 : vector<2x16xf32>
    %405 = vector.extract_strided_slice %251 {offsets = [0, 6, 0], sizes = [2, 1, 48], strides = [1, 1, 1]} : vector<2x8x48xf32> to vector<2x1x48xf32>
    %406 = vector.shape_cast %405 : vector<2x1x48xf32> to vector<2x48xf32>
    %cst_78 = arith.constant dense<0.000000e+00> : vector<2x48xf32>
    %407 = tpu.matmul %404, %252, %cst_78 {dimension_numbers = #tpu.dot_dimension_numbers<[1], [0], [0], [1], [0, 0, 1, 1], [], []>} : vector<2x16xf32>, vector<16x48xf32>, vector<2x48xf32> -> vector<2x48xf32>
    %408 = vector.extract_strided_slice %406 {offsets = [0, 0], sizes = [2, 32], strides = [1, 1]} : vector<2x48xf32> to vector<2x32xf32>
    %409 = vector.extract_strided_slice %407 {offsets = [0, 0], sizes = [2, 32], strides = [1, 1]} : vector<2x48xf32> to vector<2x32xf32>
    %410 = arith.addf %408, %409 : vector<2x32xf32>
    %cst_79 = arith.constant 5.000000e-01 : f32
    %411 = vector.broadcast %cst_79 : f32 to vector<2x32xf32>
    %412 = arith.mulf %411, %410 : vector<2x32xf32>
    %413 = math.tanh %412 : vector<2x32xf32>
    %cst_80 = arith.constant 1.000000e+00 : f32
    %414 = vector.broadcast %cst_80 : f32 to vector<2x32xf32>
    %415 = arith.addf %413, %414 : vector<2x32xf32>
    %cst_81 = arith.constant 5.000000e-01 : f32
    %416 = vector.broadcast %cst_81 : f32 to vector<2x32xf32>
    %417 = arith.mulf %416, %415 : vector<2x32xf32>
    %418 = vector.extract_strided_slice %417 {offsets = [0, 0], sizes = [2, 16], strides = [1, 1]} : vector<2x32xf32> to vector<2x16xf32>
    %419 = vector.extract_strided_slice %417 {offsets = [0, 16], sizes = [2, 16], strides = [1, 1]} : vector<2x32xf32> to vector<2x16xf32>
    %420 = vector.extract_strided_slice %406 {offsets = [0, 32], sizes = [2, 16], strides = [1, 1]} : vector<2x48xf32> to vector<2x16xf32>
    %421 = vector.extract_strided_slice %407 {offsets = [0, 32], sizes = [2, 16], strides = [1, 1]} : vector<2x48xf32> to vector<2x16xf32>
    %422 = vector.broadcast %253 : vector<1x16xf32> to vector<2x16xf32>
    %423 = arith.addf %421, %422 : vector<2x16xf32>
    %424 = arith.mulf %418, %423 : vector<2x16xf32>
    %425 = arith.addf %420, %424 : vector<2x16xf32>
    %426 = math.tanh %425 : vector<2x16xf32>
    %427 = arith.subf %404, %426 : vector<2x16xf32>
    %428 = arith.mulf %419, %427 : vector<2x16xf32>
    %429 = arith.addf %426, %428 : vector<2x16xf32>
    %430 = vector.extract_strided_slice %251 {offsets = [0, 7, 0], sizes = [2, 1, 48], strides = [1, 1, 1]} : vector<2x8x48xf32> to vector<2x1x48xf32>
    %431 = vector.shape_cast %430 : vector<2x1x48xf32> to vector<2x48xf32>
    %cst_82 = arith.constant dense<0.000000e+00> : vector<2x48xf32>
    %432 = tpu.matmul %429, %252, %cst_82 {dimension_numbers = #tpu.dot_dimension_numbers<[1], [0], [0], [1], [0, 0, 1, 1], [], []>} : vector<2x16xf32>, vector<16x48xf32>, vector<2x48xf32> -> vector<2x48xf32>
    %433 = vector.extract_strided_slice %431 {offsets = [0, 0], sizes = [2, 32], strides = [1, 1]} : vector<2x48xf32> to vector<2x32xf32>
    %434 = vector.extract_strided_slice %432 {offsets = [0, 0], sizes = [2, 32], strides = [1, 1]} : vector<2x48xf32> to vector<2x32xf32>
    %435 = arith.addf %433, %434 : vector<2x32xf32>
    %cst_83 = arith.constant 5.000000e-01 : f32
    %436 = vector.broadcast %cst_83 : f32 to vector<2x32xf32>
    %437 = arith.mulf %436, %435 : vector<2x32xf32>
    %438 = math.tanh %437 : vector<2x32xf32>
    %cst_84 = arith.constant 1.000000e+00 : f32
    %439 = vector.broadcast %cst_84 : f32 to vector<2x32xf32>
    %440 = arith.addf %438, %439 : vector<2x32xf32>
    %cst_85 = arith.constant 5.000000e-01 : f32
    %441 = vector.broadcast %cst_85 : f32 to vector<2x32xf32>
    %442 = arith.mulf %441, %440 : vector<2x32xf32>
    %443 = vector.extract_strided_slice %442 {offsets = [0, 0], sizes = [2, 16], strides = [1, 1]} : vector<2x32xf32> to vector<2x16xf32>
    %444 = vector.extract_strided_slice %442 {offsets = [0, 16], sizes = [2, 16], strides = [1, 1]} : vector<2x32xf32> to vector<2x16xf32>
    %445 = vector.extract_strided_slice %431 {offsets = [0, 32], sizes = [2, 16], strides = [1, 1]} : vector<2x48xf32> to vector<2x16xf32>
    %446 = vector.extract_strided_slice %432 {offsets = [0, 32], sizes = [2, 16], strides = [1, 1]} : vector<2x48xf32> to vector<2x16xf32>
    %447 = vector.broadcast %253 : vector<1x16xf32> to vector<2x16xf32>
    %448 = arith.addf %446, %447 : vector<2x16xf32>
    %449 = arith.mulf %443, %448 : vector<2x16xf32>
    %450 = arith.addf %445, %449 : vector<2x16xf32>
    %451 = math.tanh %450 : vector<2x16xf32>
    %452 = arith.subf %429, %451 : vector<2x16xf32>
    %453 = arith.mulf %444, %452 : vector<2x16xf32>
    %454 = arith.addf %451, %453 : vector<2x16xf32>
    %455 = vector.shape_cast %279 : vector<2x16xf32> to vector<2x1x16xf32>
    %456 = vector.shape_cast %304 : vector<2x16xf32> to vector<2x1x16xf32>
    %457 = vector.shape_cast %329 : vector<2x16xf32> to vector<2x1x16xf32>
    %458 = vector.shape_cast %354 : vector<2x16xf32> to vector<2x1x16xf32>
    %459 = vector.shape_cast %379 : vector<2x16xf32> to vector<2x1x16xf32>
    %460 = vector.shape_cast %404 : vector<2x16xf32> to vector<2x1x16xf32>
    %461 = vector.shape_cast %429 : vector<2x16xf32> to vector<2x1x16xf32>
    %462 = vector.shape_cast %454 : vector<2x16xf32> to vector<2x1x16xf32>
    %463 = tpu.concatenate %455, %456, %457, %458, %459, %460, %461, %462 in 1 : vector<2x1x16xf32>, vector<2x1x16xf32>, vector<2x1x16xf32>, vector<2x1x16xf32>, vector<2x1x16xf32>, vector<2x1x16xf32>, vector<2x1x16xf32>, vector<2x1x16xf32> -> vector<2x8x16xf32>
    "tpu.trace_start"() <{level = 10 : i32, message = "bts,bsc->btc"}> : () -> ()
    %cst_86 = arith.constant dense<0.000000e+00> : vector<2x8x16xf32>
    %464 = tpu.matmul %3, %463, %cst_86 {dimension_numbers = #tpu.dot_dimension_numbers<[2], [1], [1], [2], [0, 0, 0, 1, 1, 2], [0], [0]>} : vector<2x8x8xf32>, vector<2x8x16xf32>, vector<2x8x16xf32> -> vector<2x8x16xf32>
    "tpu.trace_stop"() : () -> ()
    %465 = vector.extract_strided_slice %463 {offsets = [0, 0, 0], sizes = [2, 8, 8], strides = [1, 1, 1]} : vector<2x8x16xf32> to vector<2x8x8xf32>
    %466 = vector.extract_strided_slice %464 {offsets = [0, 0, 8], sizes = [2, 8, 8], strides = [1, 1, 1]} : vector<2x8x16xf32> to vector<2x8x8xf32>
    %467 = tpu.concatenate %465, %466 in 2 : vector<2x8x8xf32>, vector<2x8x8xf32> -> vector<2x8x16xf32>
    %468 = vector.shape_cast %467 : vector<2x8x16xf32> to vector<16x16xf32>
    %c0_87 = arith.constant 0 : index
    %c640 = arith.constant 640 : index
    %469 = vector.load %arg1[%c0_87, %c640] : memref<17x2176xf32, #tpu.memory_space<vmem>>, vector<16x48xf32>
    %cst_88 = arith.constant dense<0.000000e+00> : vector<16x48xf32>
    %470 = tpu.matmul %468, %469, %cst_88 {dimension_numbers = #tpu.dot_dimension_numbers<[1], [0], [0], [1], [0, 0, 1, 1], [], []>} : vector<16x16xf32>, vector<16x48xf32>, vector<16x48xf32> -> vector<16x48xf32>
    %c6 = arith.constant 6 : index
    %c0_89 = arith.constant 0 : index
    %471 = vector.load %arg2[%c6, %c0_89] : memref<25x128xf32, #tpu.memory_space<vmem>>, vector<1x48xf32>
    %472 = vector.broadcast %471 : vector<1x48xf32> to vector<16x48xf32>
    %473 = arith.addf %470, %472 : vector<16x48xf32>
    %474 = vector.shape_cast %473 : vector<16x48xf32> to vector<2x8x48xf32>
    %475 = vector.extract_strided_slice %474 {offsets = [0, 0, 0], sizes = [2, 8, 24], strides = [1, 1, 1]} : vector<2x8x48xf32> to vector<2x8x24xf32>
    %476 = vector.extract_strided_slice %474 {offsets = [0, 0, 24], sizes = [2, 8, 24], strides = [1, 1, 1]} : vector<2x8x48xf32> to vector<2x8x24xf32>
    %477 = tpu.concatenate %475, %476 in 0 : vector<2x8x24xf32>, vector<2x8x24xf32> -> vector<4x8x24xf32>
    %478 = vector.extract_strided_slice %477 {offsets = [0, 0, 0], sizes = [4, 8, 8], strides = [1, 1, 1]} : vector<4x8x24xf32> to vector<4x8x8xf32>
    %479 = vector.extract_strided_slice %477 {offsets = [0, 0, 8], sizes = [4, 8, 8], strides = [1, 1, 1]} : vector<4x8x24xf32> to vector<4x8x8xf32>
    %480 = vector.extract_strided_slice %477 {offsets = [0, 0, 16], sizes = [4, 8, 8], strides = [1, 1, 1]} : vector<4x8x24xf32> to vector<4x8x8xf32>
    "tpu.trace_start"() <{level = 10 : i32, message = "btd,bsd->bts"}> : () -> ()
    %cst_90 = arith.constant dense<0.000000e+00> : vector<4x8x8xf32>
    %481 = tpu.matmul %478, %479, %cst_90 {dimension_numbers = #tpu.dot_dimension_numbers<[2], [2], [1], [1], [0, 0, 0, 1, 1, 1], [0], [0]>} : vector<4x8x8xf32>, vector<4x8x8xf32>, vector<4x8x8xf32> -> vector<4x8x8xf32>
    "tpu.trace_stop"() : () -> ()
    %cst_91 = arith.constant dense<0xFF800000> : vector<4x8xf32>
    %482 = vector.multi_reduction <maximumf>, %481, %cst_91 [2] : vector<4x8x8xf32> to vector<4x8xf32>
    %483 = vector.shape_cast %482 : vector<4x8xf32> to vector<4x8x1xf32>
    %484 = vector.broadcast %483 : vector<4x8x1xf32> to vector<4x8x8xf32>
    %485 = arith.subf %481, %484 : vector<4x8x8xf32>
    %486 = math.exp %485 : vector<4x8x8xf32>
    %cst_92 = arith.constant dense<0.000000e+00> : vector<4x8xf32>
    %487 = vector.multi_reduction <add>, %486, %cst_92 [2] : vector<4x8x8xf32> to vector<4x8xf32>
    %488 = vector.shape_cast %487 : vector<4x8xf32> to vector<4x8x1xf32>
    %489 = tpu.reciprocal %488 {approx = true} : vector<4x8x1xf32> -> vector<4x8x1xf32>
    %490 = vector.broadcast %489 : vector<4x8x1xf32> to vector<4x8x8xf32>
    %491 = arith.mulf %486, %490 : vector<4x8x8xf32>
    "tpu.trace_start"() <{level = 10 : i32, message = "bts,bsd->btd"}> : () -> ()
    %cst_93 = arith.constant dense<0.000000e+00> : vector<4x8x8xf32>
    %492 = tpu.matmul %491, %480, %cst_93 {dimension_numbers = #tpu.dot_dimension_numbers<[2], [1], [1], [2], [0, 0, 0, 1, 1, 2], [0], [0]>} : vector<4x8x8xf32>, vector<4x8x8xf32>, vector<4x8x8xf32> -> vector<4x8x8xf32>
    "tpu.trace_stop"() : () -> ()
    %c0_94 = arith.constant 0 : index
    %c768 = arith.constant 768 : index
    %493 = vector.load %arg1[%c0_94, %c768] : memref<17x2176xf32, #tpu.memory_space<vmem>>, vector<16x16xf32>
    %494 = vector.extract_strided_slice %492 {offsets = [0, 0, 0], sizes = [2, 8, 8], strides = [1, 1, 1]} : vector<4x8x8xf32> to vector<2x8x8xf32>
    %495 = vector.shape_cast %494 : vector<2x8x8xf32> to vector<16x8xf32>
    %496 = vector.extract_strided_slice %493 {offsets = [0, 0], sizes = [8, 16], strides = [1, 1]} : vector<16x16xf32> to vector<8x16xf32>
    %cst_95 = arith.constant dense<0.000000e+00> : vector<16x16xf32>
    %497 = tpu.matmul %495, %496, %cst_95 {dimension_numbers = #tpu.dot_dimension_numbers<[1], [0], [0], [1], [0, 0, 1, 1], [], []>} : vector<16x8xf32>, vector<8x16xf32>, vector<16x16xf32> -> vector<16x16xf32>
    %498 = vector.extract_strided_slice %492 {offsets = [2, 0, 0], sizes = [2, 8, 8], strides = [1, 1, 1]} : vector<4x8x8xf32> to vector<2x8x8xf32>
    %499 = vector.shape_cast %498 : vector<2x8x8xf32> to vector<16x8xf32>
    %500 = vector.extract_strided_slice %493 {offsets = [8, 0], sizes = [8, 16], strides = [1, 1]} : vector<16x16xf32> to vector<8x16xf32>
    %cst_96 = arith.constant dense<0.000000e+00> : vector<16x16xf32>
    %501 = tpu.matmul %499, %500, %cst_96 {dimension_numbers = #tpu.dot_dimension_numbers<[1], [0], [0], [1], [0, 0, 1, 1], [], []>} : vector<16x8xf32>, vector<8x16xf32>, vector<16x16xf32> -> vector<16x16xf32>
    %502 = arith.addf %497, %501 : vector<16x16xf32>
    %c7 = arith.constant 7 : index
    %c0_97 = arith.constant 0 : index
    %503 = vector.load %arg2[%c7, %c0_97] : memref<25x128xf32, #tpu.memory_space<vmem>>, vector<1x16xf32>
    %504 = vector.broadcast %503 : vector<1x16xf32> to vector<16x16xf32>
    %505 = arith.addf %502, %504 : vector<16x16xf32>
    %506 = vector.shape_cast %505 : vector<16x16xf32> to vector<2x8x16xf32>
    %c8 = arith.constant 8 : index
    %c0_98 = arith.constant 0 : index
    %507 = vector.load %arg2[%c8, %c0_98] : memref<25x128xf32, #tpu.memory_space<vmem>>, vector<1x16xf32>
    %c9 = arith.constant 9 : index
    %c0_99 = arith.constant 0 : index
    %508 = vector.load %arg2[%c9, %c0_99] : memref<25x128xf32, #tpu.memory_space<vmem>>, vector<1x16xf32>
    %cst_100 = arith.constant dense<0.000000e+00> : vector<2x8xf32>
    %509 = vector.multi_reduction <add>, %506, %cst_100 [2] : vector<2x8x16xf32> to vector<2x8xf32>
    %510 = vector.shape_cast %509 : vector<2x8xf32> to vector<2x8x1xf32>
    %cst_101 = arith.constant 1.600000e+01 : f32
    %511 = vector.broadcast %cst_101 : f32 to vector<2x8x1xf32>
    %512 = arith.divf %510, %511 : vector<2x8x1xf32>
    %513 = vector.broadcast %512 : vector<2x8x1xf32> to vector<2x8x16xf32>
    %514 = arith.subf %506, %513 : vector<2x8x16xf32>
    %515 = arith.mulf %514, %514 : vector<2x8x16xf32>
    %cst_102 = arith.constant dense<0.000000e+00> : vector<2x8xf32>
    %516 = vector.multi_reduction <add>, %515, %cst_102 [2] : vector<2x8x16xf32> to vector<2x8xf32>
    %517 = vector.shape_cast %516 : vector<2x8xf32> to vector<2x8x1xf32>
    %cst_103 = arith.constant 1.600000e+01 : f32
    %518 = vector.broadcast %cst_103 : f32 to vector<2x8x1xf32>
    %519 = arith.divf %517, %518 : vector<2x8x1xf32>
    %520 = vector.broadcast %512 : vector<2x8x1xf32> to vector<2x8x16xf32>
    %521 = arith.subf %506, %520 : vector<2x8x16xf32>
    %cst_104 = arith.constant 9.99999974E-6 : f32
    %522 = vector.broadcast %cst_104 : f32 to vector<2x8x1xf32>
    %523 = arith.addf %519, %522 : vector<2x8x1xf32>
    %524 = math.rsqrt %523 : vector<2x8x1xf32>
    %525 = vector.broadcast %524 : vector<2x8x1xf32> to vector<2x8x16xf32>
    %526 = arith.mulf %521, %525 : vector<2x8x16xf32>
    %527 = vector.shape_cast %507 : vector<1x16xf32> to vector<1x1x16xf32>
    %528 = vector.broadcast %527 : vector<1x1x16xf32> to vector<2x8x16xf32>
    %529 = arith.mulf %526, %528 : vector<2x8x16xf32>
    %530 = vector.shape_cast %508 : vector<1x16xf32> to vector<1x1x16xf32>
    %531 = vector.broadcast %530 : vector<1x1x16xf32> to vector<2x8x16xf32>
    %532 = arith.addf %529, %531 : vector<2x8x16xf32>
    %c8_105 = arith.constant 8 : index
    %c512_106 = arith.constant 512 : index
    %533 = vector.load %arg1[%c8_105, %c512_106] : memref<17x2176xf32, #tpu.memory_space<vmem>>, vector<4x8xf32>
    %534 = vector.shape_cast %533 : vector<4x8xf32> to vector<1x4x8xf32>
    %535 = vector.shape_cast %534 : vector<1x4x8xf32> to vector<1x4x8xf32>
    %536 = vector.broadcast %535 : vector<1x4x8xf32> to vector<2x4x8xf32>
    %c0_107 = arith.constant 0 : index
    %c896 = arith.constant 896 : index
    %537 = vector.load %arg1[%c0_107, %c896] : memref<17x2176xf32, #tpu.memory_space<vmem>>, vector<8x4xf32>
    %538 = vector.shape_cast %537 : vector<8x4xf32> to vector<1x8x4xf32>
    %539 = vector.shape_cast %538 : vector<1x8x4xf32> to vector<1x8x4xf32>
    %540 = vector.broadcast %539 : vector<1x8x4xf32> to vector<2x8x4xf32>
    "tpu.trace_start"() <{level = 10 : i32, message = "bht,btd->bhd"}> : () -> ()
    %cst_108 = arith.constant dense<0.000000e+00> : vector<2x4x16xf32>
    %541 = tpu.matmul %536, %532, %cst_108 {dimension_numbers = #tpu.dot_dimension_numbers<[2], [1], [1], [2], [0, 0, 0, 1, 1, 2], [0], [0]>} : vector<2x4x8xf32>, vector<2x8x16xf32>, vector<2x4x16xf32> -> vector<2x4x16xf32>
    "tpu.trace_stop"() : () -> ()
    %c12 = arith.constant 12 : index
    %c512_109 = arith.constant 512 : index
    %542 = vector.load %arg1[%c12, %c512_109] : memref<17x2176xf32, #tpu.memory_space<vmem>>, vector<4x1xf32>
    %543 = vector.shape_cast %542 : vector<4x1xf32> to vector<1x4x1xf32>
    %544 = vector.broadcast %543 : vector<1x4x1xf32> to vector<2x4x16xf32>
    %545 = arith.addf %541, %544 : vector<2x4x16xf32>
    %cst_110 = arith.constant 5.000000e-01 : f32
    %546 = vector.broadcast %cst_110 : f32 to vector<2x4x16xf32>
    %547 = arith.mulf %546, %545 : vector<2x4x16xf32>
    %cst_111 = arith.constant 4.471500e-02 : f32
    %548 = vector.broadcast %cst_111 : f32 to vector<2x4x16xf32>
    %549 = arith.mulf %548, %545 : vector<2x4x16xf32>
    %550 = arith.mulf %549, %545 : vector<2x4x16xf32>
    %551 = arith.mulf %550, %545 : vector<2x4x16xf32>
    %552 = arith.addf %545, %551 : vector<2x4x16xf32>
    %cst_112 = arith.constant 0.797884583 : f32
    %553 = vector.broadcast %cst_112 : f32 to vector<2x4x16xf32>
    %554 = arith.mulf %553, %552 : vector<2x4x16xf32>
    %555 = math.tanh %554 : vector<2x4x16xf32>
    %cst_113 = arith.constant 1.000000e+00 : f32
    %556 = vector.broadcast %cst_113 : f32 to vector<2x4x16xf32>
    %557 = arith.addf %556, %555 : vector<2x4x16xf32>
    %558 = arith.mulf %547, %557 : vector<2x4x16xf32>
    "tpu.trace_start"() <{level = 10 : i32, message = "bth,bhd->btd"}> : () -> ()
    %cst_114 = arith.constant dense<0.000000e+00> : vector<2x8x16xf32>
    %559 = tpu.matmul %540, %558, %cst_114 {dimension_numbers = #tpu.dot_dimension_numbers<[2], [1], [1], [2], [0, 0, 0, 1, 1, 2], [0], [0]>} : vector<2x8x4xf32>, vector<2x4x16xf32>, vector<2x8x16xf32> -> vector<2x8x16xf32>
    "tpu.trace_stop"() : () -> ()
    %c8_115 = arith.constant 8 : index
    %c896_116 = arith.constant 896 : index
    %560 = vector.load %arg1[%c8_115, %c896_116] : memref<17x2176xf32, #tpu.memory_space<vmem>>, vector<8x1xf32>
    %561 = vector.shape_cast %560 : vector<8x1xf32> to vector<1x8x1xf32>
    %562 = vector.broadcast %561 : vector<1x8x1xf32> to vector<2x8x16xf32>
    %563 = arith.addf %559, %562 : vector<2x8x16xf32>
    %c10 = arith.constant 10 : index
    %c0_117 = arith.constant 0 : index
    %564 = vector.load %arg2[%c10, %c0_117] : memref<25x128xf32, #tpu.memory_space<vmem>>, vector<1x16xf32>
    %565 = vector.shape_cast %564 : vector<1x16xf32> to vector<1x1x16xf32>
    %566 = vector.broadcast %565 : vector<1x1x16xf32> to vector<2x8x16xf32>
    %567 = arith.mulf %566, %563 : vector<2x8x16xf32>
    %568 = arith.addf %506, %567 : vector<2x8x16xf32>
    %c11 = arith.constant 11 : index
    %c0_118 = arith.constant 0 : index
    %569 = vector.load %arg2[%c11, %c0_118] : memref<25x128xf32, #tpu.memory_space<vmem>>, vector<1x16xf32>
    %c12_119 = arith.constant 12 : index
    %c0_120 = arith.constant 0 : index
    %570 = vector.load %arg2[%c12_119, %c0_120] : memref<25x128xf32, #tpu.memory_space<vmem>>, vector<1x16xf32>
    %cst_121 = arith.constant dense<0.000000e+00> : vector<2x8xf32>
    %571 = vector.multi_reduction <add>, %568, %cst_121 [2] : vector<2x8x16xf32> to vector<2x8xf32>
    %572 = vector.shape_cast %571 : vector<2x8xf32> to vector<2x8x1xf32>
    %cst_122 = arith.constant 1.600000e+01 : f32
    %573 = vector.broadcast %cst_122 : f32 to vector<2x8x1xf32>
    %574 = arith.divf %572, %573 : vector<2x8x1xf32>
    %575 = vector.broadcast %574 : vector<2x8x1xf32> to vector<2x8x16xf32>
    %576 = arith.subf %568, %575 : vector<2x8x16xf32>
    %577 = arith.mulf %576, %576 : vector<2x8x16xf32>
    %cst_123 = arith.constant dense<0.000000e+00> : vector<2x8xf32>
    %578 = vector.multi_reduction <add>, %577, %cst_123 [2] : vector<2x8x16xf32> to vector<2x8xf32>
    %579 = vector.shape_cast %578 : vector<2x8xf32> to vector<2x8x1xf32>
    %cst_124 = arith.constant 1.600000e+01 : f32
    %580 = vector.broadcast %cst_124 : f32 to vector<2x8x1xf32>
    %581 = arith.divf %579, %580 : vector<2x8x1xf32>
    %582 = vector.broadcast %574 : vector<2x8x1xf32> to vector<2x8x16xf32>
    %583 = arith.subf %568, %582 : vector<2x8x16xf32>
    %cst_125 = arith.constant 9.99999974E-6 : f32
    %584 = vector.broadcast %cst_125 : f32 to vector<2x8x1xf32>
    %585 = arith.addf %581, %584 : vector<2x8x1xf32>
    %586 = math.rsqrt %585 : vector<2x8x1xf32>
    %587 = vector.broadcast %586 : vector<2x8x1xf32> to vector<2x8x16xf32>
    %588 = arith.mulf %583, %587 : vector<2x8x16xf32>
    %589 = vector.shape_cast %569 : vector<1x16xf32> to vector<1x1x16xf32>
    %590 = vector.broadcast %589 : vector<1x1x16xf32> to vector<2x8x16xf32>
    %591 = arith.mulf %588, %590 : vector<2x8x16xf32>
    %592 = vector.shape_cast %570 : vector<1x16xf32> to vector<1x1x16xf32>
    %593 = vector.broadcast %592 : vector<1x1x16xf32> to vector<2x8x16xf32>
    %594 = arith.addf %591, %593 : vector<2x8x16xf32>
    %595 = vector.shape_cast %594 : vector<2x8x16xf32> to vector<16x16xf32>
    %c0_126 = arith.constant 0 : index
    %c1024 = arith.constant 1024 : index
    %596 = vector.load %arg1[%c0_126, %c1024] : memref<17x2176xf32, #tpu.memory_space<vmem>>, vector<16x4xf32>
    %cst_127 = arith.constant dense<0.000000e+00> : vector<16x4xf32>
    %597 = tpu.matmul %595, %596, %cst_127 {dimension_numbers = #tpu.dot_dimension_numbers<[1], [0], [0], [1], [0, 0, 1, 1], [], []>} : vector<16x16xf32>, vector<16x4xf32>, vector<16x4xf32> -> vector<16x4xf32>
    %c14 = arith.constant 14 : index
    %c0_128 = arith.constant 0 : index
    %598 = vector.load %arg2[%c14, %c0_128] : memref<25x128xf32, #tpu.memory_space<vmem>>, vector<1x4xf32>
    %599 = vector.broadcast %598 : vector<1x4xf32> to vector<16x4xf32>
    %600 = arith.addf %597, %599 : vector<16x4xf32>
    %cst_129 = arith.constant 5.000000e-01 : f32
    %601 = vector.broadcast %cst_129 : f32 to vector<16x4xf32>
    %602 = arith.mulf %601, %600 : vector<16x4xf32>
    %cst_130 = arith.constant 4.471500e-02 : f32
    %603 = vector.broadcast %cst_130 : f32 to vector<16x4xf32>
    %604 = arith.mulf %603, %600 : vector<16x4xf32>
    %605 = arith.mulf %604, %600 : vector<16x4xf32>
    %606 = arith.mulf %605, %600 : vector<16x4xf32>
    %607 = arith.addf %600, %606 : vector<16x4xf32>
    %cst_131 = arith.constant 0.797884583 : f32
    %608 = vector.broadcast %cst_131 : f32 to vector<16x4xf32>
    %609 = arith.mulf %608, %607 : vector<16x4xf32>
    %610 = math.tanh %609 : vector<16x4xf32>
    %cst_132 = arith.constant 1.000000e+00 : f32
    %611 = vector.broadcast %cst_132 : f32 to vector<16x4xf32>
    %612 = arith.addf %611, %610 : vector<16x4xf32>
    %613 = arith.mulf %602, %612 : vector<16x4xf32>
    %c0_133 = arith.constant 0 : index
    %c1152 = arith.constant 1152 : index
    %614 = vector.load %arg1[%c0_133, %c1152] : memref<17x2176xf32, #tpu.memory_space<vmem>>, vector<4x16xf32>
    %cst_134 = arith.constant dense<0.000000e+00> : vector<16x16xf32>
    %615 = tpu.matmul %613, %614, %cst_134 {dimension_numbers = #tpu.dot_dimension_numbers<[1], [0], [0], [1], [0, 0, 1, 1], [], []>} : vector<16x4xf32>, vector<4x16xf32>, vector<16x16xf32> -> vector<16x16xf32>
    %c15 = arith.constant 15 : index
    %c0_135 = arith.constant 0 : index
    %616 = vector.load %arg2[%c15, %c0_135] : memref<25x128xf32, #tpu.memory_space<vmem>>, vector<1x16xf32>
    %617 = vector.broadcast %616 : vector<1x16xf32> to vector<16x16xf32>
    %618 = arith.addf %615, %617 : vector<16x16xf32>
    %c13 = arith.constant 13 : index
    %c0_136 = arith.constant 0 : index
    %619 = vector.load %arg2[%c13, %c0_136] : memref<25x128xf32, #tpu.memory_space<vmem>>, vector<1x16xf32>
    %620 = vector.shape_cast %618 : vector<16x16xf32> to vector<2x8x16xf32>
    %621 = vector.shape_cast %619 : vector<1x16xf32> to vector<1x1x16xf32>
    %622 = vector.broadcast %621 : vector<1x1x16xf32> to vector<2x8x16xf32>
    %623 = arith.mulf %622, %620 : vector<2x8x16xf32>
    %624 = arith.addf %568, %623 : vector<2x8x16xf32>
    %c16 = arith.constant 16 : index
    %c0_137 = arith.constant 0 : index
    %625 = vector.load %arg2[%c16, %c0_137] : memref<25x128xf32, #tpu.memory_space<vmem>>, vector<1x16xf32>
    %c17 = arith.constant 17 : index
    %c0_138 = arith.constant 0 : index
    %626 = vector.load %arg2[%c17, %c0_138] : memref<25x128xf32, #tpu.memory_space<vmem>>, vector<1x16xf32>
    %cst_139 = arith.constant dense<0.000000e+00> : vector<2x8xf32>
    %627 = vector.multi_reduction <add>, %624, %cst_139 [2] : vector<2x8x16xf32> to vector<2x8xf32>
    %628 = vector.shape_cast %627 : vector<2x8xf32> to vector<2x8x1xf32>
    %cst_140 = arith.constant 1.600000e+01 : f32
    %629 = vector.broadcast %cst_140 : f32 to vector<2x8x1xf32>
    %630 = arith.divf %628, %629 : vector<2x8x1xf32>
    %631 = vector.broadcast %630 : vector<2x8x1xf32> to vector<2x8x16xf32>
    %632 = arith.subf %624, %631 : vector<2x8x16xf32>
    %633 = arith.mulf %632, %632 : vector<2x8x16xf32>
    %cst_141 = arith.constant dense<0.000000e+00> : vector<2x8xf32>
    %634 = vector.multi_reduction <add>, %633, %cst_141 [2] : vector<2x8x16xf32> to vector<2x8xf32>
    %635 = vector.shape_cast %634 : vector<2x8xf32> to vector<2x8x1xf32>
    %cst_142 = arith.constant 1.600000e+01 : f32
    %636 = vector.broadcast %cst_142 : f32 to vector<2x8x1xf32>
    %637 = arith.divf %635, %636 : vector<2x8x1xf32>
    %638 = vector.broadcast %630 : vector<2x8x1xf32> to vector<2x8x16xf32>
    %639 = arith.subf %624, %638 : vector<2x8x16xf32>
    %cst_143 = arith.constant 9.99999974E-6 : f32
    %640 = vector.broadcast %cst_143 : f32 to vector<2x8x1xf32>
    %641 = arith.addf %637, %640 : vector<2x8x1xf32>
    %642 = math.rsqrt %641 : vector<2x8x1xf32>
    %643 = vector.broadcast %642 : vector<2x8x1xf32> to vector<2x8x16xf32>
    %644 = arith.mulf %639, %643 : vector<2x8x16xf32>
    %645 = vector.shape_cast %625 : vector<1x16xf32> to vector<1x1x16xf32>
    %646 = vector.broadcast %645 : vector<1x1x16xf32> to vector<2x8x16xf32>
    %647 = arith.mulf %644, %646 : vector<2x8x16xf32>
    %648 = vector.shape_cast %626 : vector<1x16xf32> to vector<1x1x16xf32>
    %649 = vector.broadcast %648 : vector<1x1x16xf32> to vector<2x8x16xf32>
    %650 = arith.addf %647, %649 : vector<2x8x16xf32>
    %c4_144 = arith.constant 4 : index
    %c1152_145 = arith.constant 1152 : index
    %651 = vector.load %arg1[%c4_144, %c1152_145] : memref<17x2176xf32, #tpu.memory_space<vmem>>, vector<4x8xf32>
    %652 = vector.shape_cast %651 : vector<4x8xf32> to vector<1x4x8xf32>
    %653 = vector.shape_cast %652 : vector<1x4x8xf32> to vector<1x4x8xf32>
    %654 = vector.broadcast %653 : vector<1x4x8xf32> to vector<2x4x8xf32>
    %c8_146 = arith.constant 8 : index
    %c1152_147 = arith.constant 1152 : index
    %655 = vector.load %arg1[%c8_146, %c1152_147] : memref<17x2176xf32, #tpu.memory_space<vmem>>, vector<8x4xf32>
    %656 = vector.shape_cast %655 : vector<8x4xf32> to vector<1x8x4xf32>
    %657 = vector.shape_cast %656 : vector<1x8x4xf32> to vector<1x8x4xf32>
    %658 = vector.broadcast %657 : vector<1x8x4xf32> to vector<2x8x4xf32>
    "tpu.trace_start"() <{level = 10 : i32, message = "bht,btd->bhd"}> : () -> ()
    %cst_148 = arith.constant dense<0.000000e+00> : vector<2x4x16xf32>
    %659 = tpu.matmul %654, %650, %cst_148 {dimension_numbers = #tpu.dot_dimension_numbers<[2], [1], [1], [2], [0, 0, 0, 1, 1, 2], [0], [0]>} : vector<2x4x8xf32>, vector<2x8x16xf32>, vector<2x4x16xf32> -> vector<2x4x16xf32>
    "tpu.trace_stop"() : () -> ()
    %c0_149 = arith.constant 0 : index
    %c1280 = arith.constant 1280 : index
    %660 = vector.load %arg1[%c0_149, %c1280] : memref<17x2176xf32, #tpu.memory_space<vmem>>, vector<4x1xf32>
    %661 = vector.shape_cast %660 : vector<4x1xf32> to vector<1x4x1xf32>
    %662 = vector.broadcast %661 : vector<1x4x1xf32> to vector<2x4x16xf32>
    %663 = arith.addf %659, %662 : vector<2x4x16xf32>
    %cst_150 = arith.constant 5.000000e-01 : f32
    %664 = vector.broadcast %cst_150 : f32 to vector<2x4x16xf32>
    %665 = arith.mulf %664, %663 : vector<2x4x16xf32>
    %cst_151 = arith.constant 4.471500e-02 : f32
    %666 = vector.broadcast %cst_151 : f32 to vector<2x4x16xf32>
    %667 = arith.mulf %666, %663 : vector<2x4x16xf32>
    %668 = arith.mulf %667, %663 : vector<2x4x16xf32>
    %669 = arith.mulf %668, %663 : vector<2x4x16xf32>
    %670 = arith.addf %663, %669 : vector<2x4x16xf32>
    %cst_152 = arith.constant 0.797884583 : f32
    %671 = vector.broadcast %cst_152 : f32 to vector<2x4x16xf32>
    %672 = arith.mulf %671, %670 : vector<2x4x16xf32>
    %673 = math.tanh %672 : vector<2x4x16xf32>
    %cst_153 = arith.constant 1.000000e+00 : f32
    %674 = vector.broadcast %cst_153 : f32 to vector<2x4x16xf32>
    %675 = arith.addf %674, %673 : vector<2x4x16xf32>
    %676 = arith.mulf %665, %675 : vector<2x4x16xf32>
    "tpu.trace_start"() <{level = 10 : i32, message = "bth,bhd->btd"}> : () -> ()
    %cst_154 = arith.constant dense<0.000000e+00> : vector<2x8x16xf32>
    %677 = tpu.matmul %658, %676, %cst_154 {dimension_numbers = #tpu.dot_dimension_numbers<[2], [1], [1], [2], [0, 0, 0, 1, 1, 2], [0], [0]>} : vector<2x8x4xf32>, vector<2x4x16xf32>, vector<2x8x16xf32> -> vector<2x8x16xf32>
    "tpu.trace_stop"() : () -> ()
    %c4_155 = arith.constant 4 : index
    %c1280_156 = arith.constant 1280 : index
    %678 = vector.load %arg1[%c4_155, %c1280_156] : memref<17x2176xf32, #tpu.memory_space<vmem>>, vector<8x1xf32>
    %679 = vector.shape_cast %678 : vector<8x1xf32> to vector<1x8x1xf32>
    %680 = vector.broadcast %679 : vector<1x8x1xf32> to vector<2x8x16xf32>
    %681 = arith.addf %677, %680 : vector<2x8x16xf32>
    %c18 = arith.constant 18 : index
    %c0_157 = arith.constant 0 : index
    %682 = vector.load %arg2[%c18, %c0_157] : memref<25x128xf32, #tpu.memory_space<vmem>>, vector<1x16xf32>
    %683 = vector.shape_cast %682 : vector<1x16xf32> to vector<1x1x16xf32>
    %684 = vector.broadcast %683 : vector<1x1x16xf32> to vector<2x8x16xf32>
    %685 = arith.mulf %684, %681 : vector<2x8x16xf32>
    %686 = arith.addf %624, %685 : vector<2x8x16xf32>
    %c19 = arith.constant 19 : index
    %c0_158 = arith.constant 0 : index
    %687 = vector.load %arg2[%c19, %c0_158] : memref<25x128xf32, #tpu.memory_space<vmem>>, vector<1x16xf32>
    %c20 = arith.constant 20 : index
    %c0_159 = arith.constant 0 : index
    %688 = vector.load %arg2[%c20, %c0_159] : memref<25x128xf32, #tpu.memory_space<vmem>>, vector<1x16xf32>
    %cst_160 = arith.constant dense<0.000000e+00> : vector<2x8xf32>
    %689 = vector.multi_reduction <add>, %686, %cst_160 [2] : vector<2x8x16xf32> to vector<2x8xf32>
    %690 = vector.shape_cast %689 : vector<2x8xf32> to vector<2x8x1xf32>
    %cst_161 = arith.constant 1.600000e+01 : f32
    %691 = vector.broadcast %cst_161 : f32 to vector<2x8x1xf32>
    %692 = arith.divf %690, %691 : vector<2x8x1xf32>
    %693 = vector.broadcast %692 : vector<2x8x1xf32> to vector<2x8x16xf32>
    %694 = arith.subf %686, %693 : vector<2x8x16xf32>
    %695 = arith.mulf %694, %694 : vector<2x8x16xf32>
    %cst_162 = arith.constant dense<0.000000e+00> : vector<2x8xf32>
    %696 = vector.multi_reduction <add>, %695, %cst_162 [2] : vector<2x8x16xf32> to vector<2x8xf32>
    %697 = vector.shape_cast %696 : vector<2x8xf32> to vector<2x8x1xf32>
    %cst_163 = arith.constant 1.600000e+01 : f32
    %698 = vector.broadcast %cst_163 : f32 to vector<2x8x1xf32>
    %699 = arith.divf %697, %698 : vector<2x8x1xf32>
    %700 = vector.broadcast %692 : vector<2x8x1xf32> to vector<2x8x16xf32>
    %701 = arith.subf %686, %700 : vector<2x8x16xf32>
    %cst_164 = arith.constant 9.99999974E-6 : f32
    %702 = vector.broadcast %cst_164 : f32 to vector<2x8x1xf32>
    %703 = arith.addf %699, %702 : vector<2x8x1xf32>
    %704 = math.rsqrt %703 : vector<2x8x1xf32>
    %705 = vector.broadcast %704 : vector<2x8x1xf32> to vector<2x8x16xf32>
    %706 = arith.mulf %701, %705 : vector<2x8x16xf32>
    %707 = vector.shape_cast %687 : vector<1x16xf32> to vector<1x1x16xf32>
    %708 = vector.broadcast %707 : vector<1x1x16xf32> to vector<2x8x16xf32>
    %709 = arith.mulf %706, %708 : vector<2x8x16xf32>
    %710 = vector.shape_cast %688 : vector<1x16xf32> to vector<1x1x16xf32>
    %711 = vector.broadcast %710 : vector<1x1x16xf32> to vector<2x8x16xf32>
    %712 = arith.addf %709, %711 : vector<2x8x16xf32>
    %713 = vector.shape_cast %712 : vector<2x8x16xf32> to vector<16x16xf32>
    %c0_165 = arith.constant 0 : index
    %c1408 = arith.constant 1408 : index
    %714 = vector.load %arg1[%c0_165, %c1408] : memref<17x2176xf32, #tpu.memory_space<vmem>>, vector<16x4xf32>
    %cst_166 = arith.constant dense<0.000000e+00> : vector<16x4xf32>
    %715 = tpu.matmul %713, %714, %cst_166 {dimension_numbers = #tpu.dot_dimension_numbers<[1], [0], [0], [1], [0, 0, 1, 1], [], []>} : vector<16x16xf32>, vector<16x4xf32>, vector<16x4xf32> -> vector<16x4xf32>
    %c22 = arith.constant 22 : index
    %c0_167 = arith.constant 0 : index
    %716 = vector.load %arg2[%c22, %c0_167] : memref<25x128xf32, #tpu.memory_space<vmem>>, vector<1x4xf32>
    %717 = vector.broadcast %716 : vector<1x4xf32> to vector<16x4xf32>
    %718 = arith.addf %715, %717 : vector<16x4xf32>
    %cst_168 = arith.constant 5.000000e-01 : f32
    %719 = vector.broadcast %cst_168 : f32 to vector<16x4xf32>
    %720 = arith.mulf %719, %718 : vector<16x4xf32>
    %cst_169 = arith.constant 4.471500e-02 : f32
    %721 = vector.broadcast %cst_169 : f32 to vector<16x4xf32>
    %722 = arith.mulf %721, %718 : vector<16x4xf32>
    %723 = arith.mulf %722, %718 : vector<16x4xf32>
    %724 = arith.mulf %723, %718 : vector<16x4xf32>
    %725 = arith.addf %718, %724 : vector<16x4xf32>
    %cst_170 = arith.constant 0.797884583 : f32
    %726 = vector.broadcast %cst_170 : f32 to vector<16x4xf32>
    %727 = arith.mulf %726, %725 : vector<16x4xf32>
    %728 = math.tanh %727 : vector<16x4xf32>
    %cst_171 = arith.constant 1.000000e+00 : f32
    %729 = vector.broadcast %cst_171 : f32 to vector<16x4xf32>
    %730 = arith.addf %729, %728 : vector<16x4xf32>
    %731 = arith.mulf %720, %730 : vector<16x4xf32>
    %c12_172 = arith.constant 12 : index
    %c1280_173 = arith.constant 1280 : index
    %732 = vector.load %arg1[%c12_172, %c1280_173] : memref<17x2176xf32, #tpu.memory_space<vmem>>, vector<4x16xf32>
    %cst_174 = arith.constant dense<0.000000e+00> : vector<16x16xf32>
    %733 = tpu.matmul %731, %732, %cst_174 {dimension_numbers = #tpu.dot_dimension_numbers<[1], [0], [0], [1], [0, 0, 1, 1], [], []>} : vector<16x4xf32>, vector<4x16xf32>, vector<16x16xf32> -> vector<16x16xf32>
    %c23 = arith.constant 23 : index
    %c0_175 = arith.constant 0 : index
    %734 = vector.load %arg2[%c23, %c0_175] : memref<25x128xf32, #tpu.memory_space<vmem>>, vector<1x16xf32>
    %735 = vector.broadcast %734 : vector<1x16xf32> to vector<16x16xf32>
    %736 = arith.addf %733, %735 : vector<16x16xf32>
    %c21 = arith.constant 21 : index
    %c0_176 = arith.constant 0 : index
    %737 = vector.load %arg2[%c21, %c0_176] : memref<25x128xf32, #tpu.memory_space<vmem>>, vector<1x16xf32>
    %738 = vector.shape_cast %736 : vector<16x16xf32> to vector<2x8x16xf32>
    %739 = vector.shape_cast %737 : vector<1x16xf32> to vector<1x1x16xf32>
    %740 = vector.broadcast %739 : vector<1x1x16xf32> to vector<2x8x16xf32>
    %741 = arith.mulf %740, %738 : vector<2x8x16xf32>
    %742 = arith.addf %686, %741 : vector<2x8x16xf32>
    %cst_177 = arith.constant dense<0.000000e+00> : vector<2x16xf32>
    %743 = vector.multi_reduction <add>, %742, %cst_177 [1] : vector<2x8x16xf32> to vector<2x16xf32>
    %cst_178 = arith.constant 8.000000e+00 : f32
    %744 = vector.broadcast %cst_178 : f32 to vector<2x16xf32>
    %745 = arith.divf %743, %744 : vector<2x16xf32>
    %c0_179 = arith.constant 0 : index
    %c1536 = arith.constant 1536 : index
    %746 = vector.load %arg1[%c0_179, %c1536] : memref<17x2176xf32, #tpu.memory_space<vmem>>, vector<17x544xf32>
    %747 = vector.extract_strided_slice %746 {offsets = [0, 0], sizes = [16, 544], strides = [1, 1]} : vector<17x544xf32> to vector<16x544xf32>
    %cst_180 = arith.constant dense<0.000000e+00> : vector<2x544xf32>
    %748 = tpu.matmul %745, %747, %cst_180 {dimension_numbers = #tpu.dot_dimension_numbers<[1], [0], [0], [1], [0, 0, 1, 1], [], []>} : vector<2x16xf32>, vector<16x544xf32>, vector<2x544xf32> -> vector<2x544xf32>
    %749 = vector.extract_strided_slice %746 {offsets = [16, 0], sizes = [1, 544], strides = [1, 1]} : vector<17x544xf32> to vector<1x544xf32>
    %750 = vector.broadcast %749 : vector<1x544xf32> to vector<2x544xf32>
    %751 = arith.addf %748, %750 : vector<2x544xf32>
    %752 = vector.extract_strided_slice %751 {offsets = [0, 0], sizes = [2, 512], strides = [1, 1]} : vector<2x544xf32> to vector<2x512xf32>
    %cst_181 = arith.constant 5.000000e-01 : f32
    %753 = vector.broadcast %cst_181 : f32 to vector<2x512xf32>
    %754 = arith.mulf %753, %752 : vector<2x512xf32>
    %cst_182 = arith.constant 4.471500e-02 : f32
    %755 = vector.broadcast %cst_182 : f32 to vector<2x512xf32>
    %756 = arith.mulf %755, %752 : vector<2x512xf32>
    %757 = arith.mulf %756, %752 : vector<2x512xf32>
    %758 = arith.mulf %757, %752 : vector<2x512xf32>
    %759 = arith.addf %752, %758 : vector<2x512xf32>
    %cst_183 = arith.constant 0.797884583 : f32
    %760 = vector.broadcast %cst_183 : f32 to vector<2x512xf32>
    %761 = arith.mulf %760, %759 : vector<2x512xf32>
    %762 = math.tanh %761 : vector<2x512xf32>
    %cst_184 = arith.constant 1.000000e+00 : f32
    %763 = vector.broadcast %cst_184 : f32 to vector<2x512xf32>
    %764 = arith.addf %763, %762 : vector<2x512xf32>
    %765 = arith.mulf %754, %764 : vector<2x512xf32>
    %766 = vector.extract_strided_slice %751 {offsets = [0, 512], sizes = [2, 32], strides = [1, 1]} : vector<2x544xf32> to vector<2x32xf32>
    %cst_185 = arith.constant dense<0xFF800000> : vector<2xf32>
    %767 = vector.multi_reduction <maximumf>, %766, %cst_185 [1] : vector<2x32xf32> to vector<2xf32>
    %768 = vector.shape_cast %767 : vector<2xf32> to vector<2x1xf32>
    %769 = vector.broadcast %768 : vector<2x1xf32> to vector<2x32xf32>
    %770 = arith.subf %766, %769 : vector<2x32xf32>
    %771 = math.exp %770 : vector<2x32xf32>
    %cst_186 = arith.constant dense<0.000000e+00> : vector<2xf32>
    %772 = vector.multi_reduction <add>, %771, %cst_186 [1] : vector<2x32xf32> to vector<2xf32>
    %773 = vector.shape_cast %772 : vector<2xf32> to vector<2x1xf32>
    %774 = tpu.reciprocal %773 {approx = true} : vector<2x1xf32> -> vector<2x1xf32>
    %775 = vector.broadcast %774 : vector<2x1xf32> to vector<2x32xf32>
    %776 = arith.mulf %771, %775 : vector<2x32xf32>
    %c0_187 = arith.constant 0 : index
    %c0_188 = arith.constant 0 : index
    %777 = vector.load %arg3[%c0_187, %c0_188] : memref<512x32xf32, #tpu.memory_space<vmem>>, vector<512x32xf32>
    %cst_189 = arith.constant dense<0.000000e+00> : vector<2x32xf32>
    %778 = tpu.matmul %765, %777, %cst_189 {dimension_numbers = #tpu.dot_dimension_numbers<[1], [0], [0], [1], [0, 0, 1, 1], [], []>} : vector<2x512xf32>, vector<512x32xf32>, vector<2x32xf32> -> vector<2x32xf32>
    %c24 = arith.constant 24 : index
    %c0_190 = arith.constant 0 : index
    %779 = vector.load %arg2[%c24, %c0_190] : memref<25x128xf32, #tpu.memory_space<vmem>>, vector<1x32xf32>
    %780 = vector.broadcast %779 : vector<1x32xf32> to vector<2x32xf32>
    %781 = arith.addf %778, %780 : vector<2x32xf32>
    %782 = arith.mulf %776, %781 : vector<2x32xf32>
    %cst_191 = arith.constant dense<0.000000e+00> : vector<2xf32>
    %783 = vector.multi_reduction <add>, %782, %cst_191 [1] : vector<2x32xf32> to vector<2xf32>
    %784 = vector.shape_cast %783 : vector<2xf32> to vector<2x1xf32>
    %c0_192 = arith.constant 0 : index
    %c0_193 = arith.constant 0 : index
    %785 = vector.load %arg4[%c0_192, %c0_193] : memref<2x1xf32, #tpu.memory_space<vmem>>, vector<2x1xf32>
    tpu.vector_store %arg4[%c0_192, %c0_193], %784 {strides = array<i32>} : memref<2x1xf32, #tpu.memory_space<vmem>>, vector<2x1xf32>,
    return
  }
}

</mosaic_0001>

<bundles_post_ra>
// kernel: forward.1
= control target key start
LH: loop header
LB: loop body
LE: loop exit
PB: predicated region body
PF: predicated region fallthrough
CT: control target
= control target key end

     0   :  { %v6540_v0 = vmov 0.0|0.0   ;;  %vm6541_vm0 = vmmov 0   ;;  %v6542_v3 = vmov 0.0   ;;  %v6543_v6 = vmov 1   ;;  %s6545_s23 = smov 32   ;;  %s6547_s6 = smov 112   ;;  %s7699_s1 = inlined_call_operand.vmem [shape: f32[17,2176], index: 1, kind: input, shape index: {}]   ;;  %s7700_s0 = inlined_call_operand.vmem [shape: f32[2,8,2], index: 0, kind: input, shape index: {}]   ;;  %s7701_s2 = inlined_call_operand.vmem [shape: f32[25,128], index: 2, kind: input, shape index: {}]   ;;  %s7702_s3 = inlined_call_operand.vmem [shape: f32[512,32], index: 3, kind: input, shape index: {}]   ;;  %s7703_s4 = inlined_call_operand.vmem [shape: f32[2,1], index: 4, kind: output, shape index: {}]  }
   0x1   :  { %6188 = vmatprep.subr.bf16.mxu0 %v6540_v0  ;;  %v61_v1 = vld [vmem:[%s7699_s1 + $0x10] sm:$0xff]  ;;  %v62_v2 = vld [vmem:[%s7699_s1 + $0x98] sm:$0xff]  ;;  %5918 = vmatprep.mubr.msk.f32.mxu0 %vm6541_vm0, %v6542_v3  ;;  %v19_v4 = vld [vmem:[%s7700_s0 + $0x8] sm:$0xff]  ;;  %v6544_v8 = vmov 0   ;;  %s6548_s7 = smov 16   ;;  %vm208_vm1 = vcmask 1041409  }
   0x2   :  { %v6588_v5 = vpack.c.bf16 %v62_v2, %v61_v1  ;;  %6347 = vset.pattern.permute.xlu1 %v6543_v6  ;;  %v5629_v7 = vld [vmem:[%s7701_s2 + $0x3] ss:$0 sm:$0xff]  ;;  %6346 = vset.pattern.permute.xlu0 %v6544_v8  ;;  %v5627_v17 = vld [vmem:[%s7701_s2 + $0x1] ss:$0 sm:$0xff]  ;;  %v5626_v18 = vld [vmem:[%s7701_s2] ss:$0 sm:$0xff] }
   0x3   :  { %43 = vperm.xlu1 %6347, %v19_v4   ;;  %157 = vrot.lane.b32.xlu0 %v5629_v7, %s6545_s23  ;;  %v18_v9 = vld [vmem:[%s7700_s0] sm:$0xff]  ;;  %s6546_s0 = smov 96   ;;  %vm64_vm2 = vcmask 130048   ;;  %vm1238_vm3 = vcmask 1040384   ;;  %vm1241_vm4 = vcmask 1041408   ;;  %vm1244_vm5 = vcmask 1042432  }
   0x4   :  { %6190 = vmatpush3.bf16.msra.mxu0 %v6588_v5  ;;  %6191 = vmatprep.subr.bf16.mxu1 %v6540_v0  ;;  %v5628_v26 = vld [vmem:[%s7701_s2 + $0x2] ss:$0 sm:$0xff]  ;;  %vm1247_vm6 = vcmask 1043456   ;;  %vm1250_vm7 = vcmask 1044480   ;;  %vm1253_vm8 = vcmask 1045504   ;;  %vm1256_vm9 = vcmask 1046528  }
   0x5   :  { %6193 = vmatpush3.bf16.msra.mxu1 %v6588_v5  ;;  %5925 = vmatprep.mubr.msk.f32.mxu1 %vm6541_vm0, %v6542_v3  ;;  %vm1263_vm10 = vcmask 64512   ;;  %s6549_s8 = smov 104   ;;  %s6550_s9 = smov 120   ;;  %vm4058_vm11 = vcmask 31744   ;;  %vm5395_vm12 = vcmask 254976   ;;  %vm5620_vm13 = vcmask 1024  }
   0x6   :  { %6194 = vmatprep.subr.bf16.mxu0 %v6540_v0  ;;  %6197 = vmatprep.subr.bf16.mxu1 %v6540_v0 }
   0x7   :  { %5919 = vmatmul.mubr.f32.vlgmr.msra.gmra.mrb[0].mxu0 %v6542_v3  ;;  %6348 = vset.pattern.permute.xlu1 %v6544_v8 }
   0x8   :  { %23 = vperm.xlu1 %6348, %v18_v9   ;;  %28 = vperm.xlu0 %6346, %v19_v4  }
   0x9   :  { %6196 = vmatpush3.bf16.msra.mxu0 %v6588_v5  ;;  %5932 = vmatprep.mubr.msk.f32.mxu0 %vm6541_vm0, %v6542_v3 }
   0xa   :  { %6200 = vmatprep.subr.bf16.mxu0 %v6540_v0 }
   0xc   :  { %6349 = vset.pattern.permute.xlu1 %v6543_v6 }
   0xd   :  { %39 = vperm.xlu1 %6349, %v18_v9  }
  0x11   :  { %6350 = vset.pattern.permute.xlu1 %v6544_v8 }
  0x75   :  { %v6609_v10 = vpop.permute.xlu0 %157 }
  0x82   :  { %v44_v15 = vpop.permute.xlu1 %43 }
  0x83   :  { %v51_v23 = vmul.f32 %v5627_v17, %v44_v15 }
  0x87   :  { %v24_v16 = vpop.permute.xlu1 %23  ;;  %v29_v20 = vpop.permute.xlu0 %28 }
  0x88   :  { %v35_v21 = vmul.f32 %v5626_v18, %v24_v16  ;;  %v36_v24 = vmul.f32 %v5626_v18, %v29_v20 }
  0x8a   :  { %v53_v27 = vadd.f32 %v51_v23, %v36_v24 }
  0x8c   :  { %v40_v19 = vpop.permute.xlu1 %39  ;;  %v6625_v29 = vadd.f32 %v5628_v26, %v53_v27 }
  0x8d   :  { %v50_v22 = vmul.f32 %v5627_v17, %v40_v19 }
  0x8f   :  { %v52_v25 = vadd.f32 %v50_v22, %v35_v21 }
  0x91   :  { %v6623_v28 = vadd.f32 %v5628_v26, %v52_v25 }
  0xda   :  { %v134_v11 = vpop.f32.mrb[0].mxu0 }
  0xdb   :  { %v160_v12 = vadd.f32 %v6609_v10, %v134_v11  ;;  %v5920_v13 = vpop.f32.mrb[1].mxu0  ;;  %v139_v30 = vrot.slane %v134_v11, 1  ;;  %v142_v31 = vadd.f32 %v134_v11, %v6623_v28 }
  0xdd   :  { %163 = vrot.lane.b32.xlu1 %v160_v12, %s6546_s0  ;;  %v162_v14 = vrot.slane %v160_v12, 1  ;;  %v143_v32 = vadd.f32 %v139_v30, %v6625_v29  ;;  %v144_v33 = vmul.f32 0.5, %v142_v31 }
  0xdf   :  { %165 = vrot.lane.b32.xlu0 %v162_v14, %s6546_s0  ;;  %v145_v34 = vmul.f32 0.5, %v143_v32  ;;  %6351 = vtanh.f32 %v144_v33 }
  0xe1   :  { %6353 = vtanh.f32 %v145_v34 }
  0xe9   :  { %v6352_v35 = vpop.eup %6351 }
  0xea   :  { %v148_v37 = vadd.f32 1.0, %v6352_v35 }
  0xeb   :  { %v6354_v36 = vpop.eup %6353 }
  0xec   :  { %v149_v38 = vadd.f32 1.0, %v6354_v36  ;;  %v150_v39 = vmul.f32 0.5, %v148_v37 }
  0xee   :  { %v151_v42 = vmul.f32 0.5, %v149_v38 }
 0x14f   :  { %v164_v40 = vpop.permute.xlu1 %163 }
 0x150   :  { %v169_v41 = vmul.f32 %v164_v40, %v150_v39 }
 0x151   :  { %v166_v43 = vpop.permute.xlu0 %165 }
 0x152   :  { %v170_v44 = vmul.f32 %v166_v43, %v151_v42  ;;  %173 = vrot.lane.b32.xlu1 %v169_v41, %s6545_s23 }
 0x154   :  { %175 = vrot.lane.b32.xlu0 %v170_v44, %s6545_s23 }
 0x1c4   :  { %v174_v45 = vpop.permute.xlu1 %173 }
 0x1c5   :  { %v179_v46 = vadd.f32 %v174_v45, %v6623_v28 }
 0x1c6   :  { %v176_v47 = vpop.permute.xlu0 %175 }
 0x1c7   :  { %6355 = vtanh.f32 %v179_v46  ;;  %v180_v48 = vadd.f32 %v176_v47, %v6625_v29 }
 0x1c9   :  { %6357 = vtanh.f32 %v180_v48 }
 0x1d1   :  { %v6356_v49 = vpop.eup %6355 }
 0x1d2   :  { %v183_v50 = vsub.f32 0.0, %v6356_v49 }
 0x1d3   :  { %v6358_v51 = vpop.eup %6357 }
 0x1d4   :  { %187 = vrot.lane.b32.xlu1 %v183_v50, %s6547_s6  ;;  %v184_v52 = vsub.f32 0.0, %v6358_v51 }
 0x1d6   :  { %189 = vrot.lane.b32.xlu0 %v184_v52, %s6547_s6 }
 0x246   :  { %v188_v53 = vpop.permute.xlu1 %187 }
 0x247   :  { %v193_v54 = vmul.f32 %v188_v53, %v150_v39 }
 0x248   :  { %v190_v55 = vpop.permute.xlu0 %189 }
 0x249   :  { %v194_v56 = vmul.f32 %v190_v55, %v151_v42  ;;  %197 = vrot.lane.b32.xlu1 %v193_v54, %s6548_s7 }
 0x24b   :  { %199 = vrot.lane.b32.xlu0 %v194_v56, %s6548_s7 }
 0x2bb   :  { %v198_v57 = vpop.permute.xlu1 %197 }
 0x2bc   :  { %v6639_v60 = vadd.f32 %v6356_v49, %v198_v57 }
 0x2bd   :  { %v200_v58 = vpop.permute.xlu0 %199 }
 0x2be   :  { %v6637_v59 = vadd.f32 %v6358_v51, %v200_v58 }
 0x2c0   :  { %v207_v61 = vrot.slane %v6637_v59, 7 }
 0x2c2   :  { %v209_v62 = vsel %vm208_vm1, %v207_v61, %v6639_v60 }
 0x2c3   :  { %210 = vrot.lane.b32.xlu0 %v209_v62, %s6546_s0 }
 0x335   :  { %v211_v63 = vpop.permute.xlu0 %210 }
 0x336   :  { %5926 = vmatmul.mubr.msk.f32.vlgmr.msra.gmra.mrb[0].mxu1 %vm64_vm2, %v211_v63 }
 0x337   :  { %6199 = vmatpush3.bf16.msra.mxu1 %v6588_v5  ;;  %5939 = vmatprep.mubr.msk.f32.mxu1 %vm6541_vm0, %v6542_v3 }
 0x338   :  { %6203 = vmatprep.subr.bf16.mxu1 %v6540_v0 }
 0x409   :  { %v280_v1 = vpop.f32.mrb[0].mxu1 }
 0x40a   :  { %v298_v2 = vadd.f32 %v280_v1, %v6609_v10  ;;  %v5927_v4 = vpop.f32.mrb[1].mxu1  ;;  %v285_v7 = vrot.slane %v280_v1, 7  ;;  %v289_v8 = vadd.f32 %v280_v1, %v6625_v29 }
 0x40c   :  { %303 = vrot.lane.b32.xlu0 %v298_v2, %s6546_s0  ;;  %v300_v6 = vrot.slane %v298_v2, 7  ;;  %v288_v9 = vadd.f32 %v285_v7, %v6623_v28  ;;  %v291_v11 = vmul.f32 0.5, %v289_v8 }
 0x40e   :  { %301 = vrot.lane.b32.xlu1 %v300_v6, %s6546_s0  ;;  %v290_v12 = vmul.f32 0.5, %v288_v9  ;;  %6359 = vtanh.f32 %v291_v11 }
 0x410   :  { %6361 = vtanh.f32 %v290_v12 }
 0x418   :  { %v6360_v13 = vpop.eup %6359 }
 0x419   :  { %v295_v15 = vadd.f32 1.0, %v6360_v13 }
 0x41a   :  { %v6362_v14 = vpop.eup %6361 }
 0x41b   :  { %v294_v16 = vadd.f32 1.0, %v6362_v14  ;;  %v297_v17 = vmul.f32 0.5, %v295_v15 }
 0x41d   :  { %v296_v20 = vmul.f32 0.5, %v294_v16 }
 0x47e   :  { %v304_v18 = vpop.permute.xlu0 %303 }
 0x47f   :  { %v308_v19 = vmul.f32 %v304_v18, %v297_v17 }
 0x480   :  { %v302_v21 = vpop.permute.xlu1 %301 }
 0x481   :  { %v307_v22 = vmul.f32 %v302_v21, %v296_v20  ;;  %313 = vrot.lane.b32.xlu0 %v308_v19, %s6545_s23 }
 0x483   :  { %311 = vrot.lane.b32.xlu1 %v307_v22, %s6545_s23 }
 0x4f3   :  { %v314_v23 = vpop.permute.xlu0 %313 }
 0x4f4   :  { %v318_v24 = vadd.f32 %v314_v23, %v6625_v29 }
 0x4f5   :  { %v312_v25 = vpop.permute.xlu1 %311 }
 0x4f6   :  { %6363 = vtanh.f32 %v318_v24  ;;  %v317_v26 = vadd.f32 %v312_v25, %v6623_v28 }
 0x4f8   :  { %6365 = vtanh.f32 %v317_v26 }
 0x500   :  { %v6364_v27 = vpop.eup %6363 }
 0x501   :  { %v324_v30 = vrot.slane %v6364_v27, 1 }
 0x502   :  { %v6366_v31 = vpop.eup %6365 }
 0x503   :  { %v328_v32 = vsub.f32 %v6637_v59, %v324_v30  ;;  %v323_v33 = vrot.slane %v6366_v31, 1 }
 0x505   :  { %v332_v34 = vrot.slane %v328_v32, 7  ;;  %v327_v35 = vsub.f32 %v6639_v60, %v323_v33 }
 0x507   :  { %335 = vrot.lane.b32.xlu0 %v332_v34, %s6547_s6  ;;  %v331_v36 = vrot.slane %v327_v35, 7 }
 0x509   :  { %333 = vrot.lane.b32.xlu1 %v331_v36, %s6547_s6 }
 0x579   :  { %v336_v37 = vpop.permute.xlu0 %335 }
 0x57a   :  { %v340_v38 = vmul.f32 %v336_v37, %v297_v17 }
 0x57b   :  { %v334_v39 = vpop.permute.xlu1 %333 }
 0x57c   :  { %v339_v40 = vmul.f32 %v334_v39, %v296_v20  ;;  %345 = vrot.lane.b32.xlu0 %v340_v38, %s6548_s7 }
 0x57e   :  { %343 = vrot.lane.b32.xlu1 %v339_v40, %s6548_s7 }
 0x5ee   :  { %v346_v41 = vpop.permute.xlu0 %345 }
 0x5ef   :  { %v6667_v44 = vadd.f32 %v6364_v27, %v346_v41 }
 0x5f0   :  { %v344_v42 = vpop.permute.xlu1 %343 }
 0x5f1   :  { %v6665_v43 = vadd.f32 %v6366_v31, %v344_v42 }
 0x5f3   :  { %v353_v45 = vrot.slane %v6665_v43, 1 }
 0x5f5   :  { %v354_v46 = vsel %vm208_vm1, %v6667_v44, %v353_v45 }
 0x5f6   :  { %355 = vrot.lane.b32.xlu1 %v354_v46, %s6546_s0 }
 0x668   :  { %v356_v47 = vpop.permute.xlu1 %355 }
 0x669   :  { %5933 = vmatmul.mubr.msk.f32.vlgmr.msra.gmra.mrb[2].mxu0 %vm64_vm2, %v356_v47 }
 0x66a   :  { %6202 = vmatpush3.bf16.msra.mxu0 %v6588_v5  ;;  %5946 = vmatprep.mubr.msk.f32.mxu0 %vm6541_vm0, %v6542_v3 }
 0x66b   :  { %6206 = vmatprep.subr.bf16.mxu0 %v6540_v0 }
 0x73c   :  { %v425_v48 = vpop.f32.mrb[2].mxu0 }
 0x73d   :  { %v444_v49 = vadd.f32 %v425_v48, %v6609_v10  ;;  %v5934_v50 = vpop.f32.mrb[3].mxu0  ;;  %v430_v53 = vrot.slane %v425_v48, 6  ;;  %v431_v54 = vrot.slane %v425_v48, 7 }
 0x73f   :  { %v447_v51 = vrot.slane %v444_v49, 7  ;;  %v446_v52 = vrot.slane %v444_v49, 6  ;;  %v434_v55 = vadd.f32 %v430_v53, %v6623_v28  ;;  %v435_v56 = vadd.f32 %v431_v54, %v6625_v29 }
 0x741   :  { %450 = vrot.lane.b32.xlu1 %v447_v51, %s6546_s0  ;;  %448 = vrot.lane.b32.xlu0 %v446_v52, %s6546_s0  ;;  %v436_v57 = vmul.f32 0.5, %v434_v55  ;;  %v437_v58 = vmul.f32 0.5, %v435_v56 }
 0x743   :  { %6367 = vtanh.f32 %v436_v57 }
 0x744   :  { %6369 = vtanh.f32 %v437_v58 }
 0x74d   :  { %v6368_v61 = vpop.eup %6367 }
 0x74e   :  { %v6370_v62 = vpop.eup %6369  ;;  %v440_v1 = vadd.f32 1.0, %v6368_v61 }
 0x74f   :  { %v441_v63 = vadd.f32 1.0, %v6370_v62 }
 0x750   :  { %v442_v4 = vmul.f32 0.5, %v440_v1 }
 0x751   :  { %v443_v2 = vmul.f32 0.5, %v441_v63 }
 0x7b3   :  { %v451_v6 = vpop.permute.xlu1 %450  ;;  %v449_v7 = vpop.permute.xlu0 %448 }
 0x7b4   :  { %v455_v8 = vmul.f32 %v451_v6, %v443_v2  ;;  %v454_v9 = vmul.f32 %v449_v7, %v442_v4 }
 0x7b6   :  { %460 = vrot.lane.b32.xlu1 %v455_v8, %s6545_s23  ;;  %458 = vrot.lane.b32.xlu0 %v454_v9, %s6545_s23 }
 0x828   :  { %v461_v11 = vpop.permute.xlu1 %460  ;;  %v459_v12 = vpop.permute.xlu0 %458 }
 0x829   :  { %v465_v13 = vadd.f32 %v461_v11, %v6625_v29  ;;  %v464_v14 = vadd.f32 %v459_v12, %v6623_v28 }
 0x82b   :  { %6371 = vtanh.f32 %v465_v13 }
 0x82c   :  { %6373 = vtanh.f32 %v464_v14 }
 0x835   :  { %v6372_v15 = vpop.eup %6371 }
 0x836   :  { %v6374_v16 = vpop.eup %6373  ;;  %v471_v17 = vrot.slane %v6372_v15, 1 }
 0x837   :  { %v470_v18 = vrot.slane %v6374_v16, 1 }
 0x838   :  { %v475_v19 = vsub.f32 %v6667_v44, %v471_v17 }
 0x839   :  { %v474_v20 = vsub.f32 %v6665_v43, %v470_v18 }
 0x83a   :  { %v479_v21 = vrot.slane %v475_v19, 7 }
 0x83b   :  { %v478_v22 = vrot.slane %v474_v20, 7 }
 0x83c   :  { %482 = vrot.lane.b32.xlu1 %v479_v21, %s6547_s6 }
 0x83d   :  { %480 = vrot.lane.b32.xlu0 %v478_v22, %s6547_s6 }
 0x8ae   :  { %v483_v23 = vpop.permute.xlu1 %482 }
 0x8af   :  { %v487_v24 = vmul.f32 %v483_v23, %v443_v2  ;;  %v481_v25 = vpop.permute.xlu0 %480 }
 0x8b0   :  { %v486_v26 = vmul.f32 %v481_v25, %v442_v4 }
 0x8b1   :  { %492 = vrot.lane.b32.xlu1 %v487_v24, %s6548_s7 }
 0x8b2   :  { %490 = vrot.lane.b32.xlu0 %v486_v26, %s6548_s7 }
 0x923   :  { %v493_v27 = vpop.permute.xlu1 %492 }
 0x924   :  { %v6693_v30 = vadd.f32 %v6372_v15, %v493_v27  ;;  %v491_v31 = vpop.permute.xlu0 %490 }
 0x925   :  { %v6695_v32 = vadd.f32 %v6374_v16, %v491_v31 }
 0x926   :  { %v501_v33 = vrot.slane %v6693_v30, 1 }
 0x927   :  { %v500_v34 = vrot.slane %v6695_v32, 2 }
 0x929   :  { %v502_v35 = vsel %vm208_vm1, %v501_v33, %v500_v34 }
 0x92a   :  { %503 = vrot.lane.b32.xlu0 %v502_v35, %s6546_s0 }
 0x99c   :  { %v504_v36 = vpop.permute.xlu0 %503 }
 0x99d   :  { %5940 = vmatmul.mubr.msk.f32.vlgmr.msra.gmra.mrb[2].mxu1 %vm64_vm2, %v504_v36 }
 0x99e   :  { %6205 = vmatpush3.bf16.msra.mxu1 %v6588_v5  ;;  %5953 = vmatprep.mubr.msk.f32.mxu1 %vm6541_vm0, %v6542_v3 }
 0x99f   :  { %6209 = vmatprep.subr.bf16.mxu1 %v6540_v0 }
 0xa70   :  { %v573_v37 = vpop.f32.mrb[2].mxu1 }
 0xa71   :  { %v592_v38 = vadd.f32 %v573_v37, %v6609_v10  ;;  %v5941_v39 = vpop.f32.mrb[3].mxu1  ;;  %v578_v42 = vrot.slane %v573_v37, 5  ;;  %v579_v45 = vrot.slane %v573_v37, 6 }
 0xa73   :  { %v595_v40 = vrot.slane %v592_v38, 6  ;;  %v594_v41 = vrot.slane %v592_v38, 5  ;;  %v582_v46 = vadd.f32 %v578_v42, %v6623_v28  ;;  %v583_v47 = vadd.f32 %v579_v45, %v6625_v29 }
 0xa75   :  { %598 = vrot.lane.b32.xlu0 %v595_v40, %s6546_s0  ;;  %596 = vrot.lane.b32.xlu1 %v594_v41, %s6546_s0  ;;  %v584_v48 = vmul.f32 0.5, %v582_v46  ;;  %v585_v49 = vmul.f32 0.5, %v583_v47 }
 0xa77   :  { %6375 = vtanh.f32 %v584_v48 }
 0xa78   :  { %6377 = vtanh.f32 %v585_v49 }
 0xa81   :  { %v6376_v50 = vpop.eup %6375 }
 0xa82   :  { %v6378_v51 = vpop.eup %6377  ;;  %v588_v53 = vadd.f32 1.0, %v6376_v50 }
 0xa83   :  { %v589_v52 = vadd.f32 1.0, %v6378_v51 }
 0xa84   :  { %v590_v55 = vmul.f32 0.5, %v588_v53 }
 0xa85   :  { %v591_v54 = vmul.f32 0.5, %v589_v52 }
 0xae7   :  { %v599_v56 = vpop.permute.xlu0 %598  ;;  %v597_v57 = vpop.permute.xlu1 %596 }
 0xae8   :  { %v603_v58 = vmul.f32 %v599_v56, %v591_v54  ;;  %v602_v61 = vmul.f32 %v597_v57, %v590_v55 }
 0xaea   :  { %608 = vrot.lane.b32.xlu0 %v603_v58, %s6545_s23  ;;  %606 = vrot.lane.b32.xlu1 %v602_v61, %s6545_s23 }
 0xb5c   :  { %v609_v62 = vpop.permute.xlu0 %608  ;;  %v607_v63 = vpop.permute.xlu1 %606 }
 0xb5d   :  { %v613_v1 = vadd.f32 %v609_v62, %v6625_v29  ;;  %v612_v2 = vadd.f32 %v607_v63, %v6623_v28 }
 0xb5f   :  { %6379 = vtanh.f32 %v613_v1 }
 0xb60   :  { %6381 = vtanh.f32 %v612_v2 }
 0xb69   :  { %v6380_v4 = vpop.eup %6379 }
 0xb6a   :  { %v6382_v6 = vpop.eup %6381  ;;  %v619_v7 = vrot.slane %v6380_v4, 1 }
 0xb6b   :  { %v618_v8 = vrot.slane %v6382_v6, 1 }
 0xb6c   :  { %v623_v9 = vsub.f32 %v6693_v30, %v619_v7 }
 0xb6d   :  { %v622_v11 = vsub.f32 %v6695_v32, %v618_v8 }
 0xb6e   :  { %v627_v12 = vrot.slane %v623_v9, 7 }
 0xb6f   :  { %v626_v13 = vrot.slane %v622_v11, 7 }
 0xb70   :  { %630 = vrot.lane.b32.xlu0 %v627_v12, %s6547_s6 }
 0xb71   :  { %628 = vrot.lane.b32.xlu1 %v626_v13, %s6547_s6 }
 0xbe2   :  { %v631_v14 = vpop.permute.xlu0 %630 }
 0xbe3   :  { %v635_v15 = vmul.f32 %v631_v14, %v591_v54  ;;  %v629_v16 = vpop.permute.xlu1 %628 }
 0xbe4   :  { %v634_v17 = vmul.f32 %v629_v16, %v590_v55 }
 0xbe5   :  { %640 = vrot.lane.b32.xlu0 %v635_v15, %s6548_s7 }
 0xbe6   :  { %638 = vrot.lane.b32.xlu1 %v634_v17, %s6548_s7 }
 0xc57   :  { %v641_v18 = vpop.permute.xlu0 %640 }
 0xc58   :  { %v6721_v19 = vadd.f32 %v6380_v4, %v641_v18  ;;  %v639_v20 = vpop.permute.xlu1 %638 }
 0xc59   :  { %v6723_v21 = vadd.f32 %v6382_v6, %v639_v20 }
 0xc5a   :  { %v649_v22 = vrot.slane %v6721_v19, 2 }
 0xc5b   :  { %v648_v23 = vrot.slane %v6723_v21, 3 }
 0xc5d   :  { %v650_v24 = vsel %vm208_vm1, %v649_v22, %v648_v23 }
 0xc5e   :  { %651 = vrot.lane.b32.xlu1 %v650_v24, %s6546_s0 }
 0xcd0   :  { %v652_v25 = vpop.permute.xlu1 %651 }
 0xcd1   :  { %5947 = vmatmul.mubr.msk.f32.vlgmr.msra.gmra.mrb[4].mxu0 %vm64_vm2, %v652_v25 }
 0xcd2   :  { %6208 = vmatpush3.bf16.msra.mxu0 %v6588_v5  ;;  %5960 = vmatprep.mubr.msk.f32.mxu0 %vm6541_vm0, %v6542_v3 }
 0xcd3   :  { %5970 = vmatprep.subr.mxu0 %v6542_v3 }
 0xda4   :  { %v721_v26 = vpop.f32.mrb[4].mxu0 }
 0xda5   :  { %v740_v27 = vadd.f32 %v721_v26, %v6609_v10  ;;  %v5948_v31 = vpop.f32.mrb[5].mxu0  ;;  %v726_v35 = vrot.slane %v721_v26, 4  ;;  %v727_v36 = vrot.slane %v721_v26, 5 }
 0xda7   :  { %v743_v33 = vrot.slane %v740_v27, 5  ;;  %v742_v34 = vrot.slane %v740_v27, 4  ;;  %v730_v37 = vadd.f32 %v726_v35, %v6623_v28  ;;  %v731_v38 = vadd.f32 %v727_v36, %v6625_v29 }
 0xda9   :  { %746 = vrot.lane.b32.xlu1 %v743_v33, %s6546_s0  ;;  %744 = vrot.lane.b32.xlu0 %v742_v34, %s6546_s0  ;;  %v732_v39 = vmul.f32 0.5, %v730_v37  ;;  %v733_v40 = vmul.f32 0.5, %v731_v38 }
 0xdab   :  { %6383 = vtanh.f32 %v732_v39 }
 0xdac   :  { %6385 = vtanh.f32 %v733_v40 }
 0xdb5   :  { %v6384_v41 = vpop.eup %6383 }
 0xdb6   :  { %v6386_v42 = vpop.eup %6385  ;;  %v736_v46 = vadd.f32 1.0, %v6384_v41 }
 0xdb7   :  { %v737_v45 = vadd.f32 1.0, %v6386_v42 }
 0xdb8   :  { %v738_v48 = vmul.f32 0.5, %v736_v46 }
 0xdb9   :  { %v739_v47 = vmul.f32 0.5, %v737_v45 }
 0xe1b   :  { %v747_v49 = vpop.permute.xlu1 %746  ;;  %v745_v50 = vpop.permute.xlu0 %744 }
 0xe1c   :  { %v751_v51 = vmul.f32 %v747_v49, %v739_v47  ;;  %v750_v52 = vmul.f32 %v745_v50, %v738_v48 }
 0xe1e   :  { %756 = vrot.lane.b32.xlu1 %v751_v51, %s6545_s23  ;;  %754 = vrot.lane.b32.xlu0 %v750_v52, %s6545_s23 }
 0xe90   :  { %v757_v53 = vpop.permute.xlu1 %756  ;;  %v755_v54 = vpop.permute.xlu0 %754 }
 0xe91   :  { %v761_v55 = vadd.f32 %v757_v53, %v6625_v29  ;;  %v760_v56 = vadd.f32 %v755_v54, %v6623_v28 }
 0xe93   :  { %6387 = vtanh.f32 %v761_v55 }
 0xe94   :  { %6389 = vtanh.f32 %v760_v56 }
 0xe9d   :  { %v6388_v57 = vpop.eup %6387 }
 0xe9e   :  { %v6390_v58 = vpop.eup %6389  ;;  %v767_v61 = vrot.slane %v6388_v57, 1 }
 0xe9f   :  { %v766_v62 = vrot.slane %v6390_v58, 1 }
 0xea0   :  { %v771_v63 = vsub.f32 %v6721_v19, %v767_v61 }
 0xea1   :  { %v770_v1 = vsub.f32 %v6723_v21, %v766_v62 }
 0xea2   :  { %v775_v2 = vrot.slane %v771_v63, 7 }
 0xea3   :  { %v774_v4 = vrot.slane %v770_v1, 7 }
 0xea4   :  { %778 = vrot.lane.b32.xlu1 %v775_v2, %s6547_s6 }
 0xea5   :  { %776 = vrot.lane.b32.xlu0 %v774_v4, %s6547_s6 }
 0xf16   :  { %v779_v6 = vpop.permute.xlu1 %778 }
 0xf17   :  { %v783_v7 = vmul.f32 %v779_v6, %v739_v47  ;;  %v777_v8 = vpop.permute.xlu0 %776 }
 0xf18   :  { %v782_v9 = vmul.f32 %v777_v8, %v738_v48 }
 0xf19   :  { %788 = vrot.lane.b32.xlu1 %v783_v7, %s6548_s7 }
 0xf1a   :  { %786 = vrot.lane.b32.xlu0 %v782_v9, %s6548_s7 }
 0xf8b   :  { %v789_v11 = vpop.permute.xlu1 %788 }
 0xf8c   :  { %v6749_v12 = vadd.f32 %v6388_v57, %v789_v11  ;;  %v787_v13 = vpop.permute.xlu0 %786 }
 0xf8d   :  { %v6751_v14 = vadd.f32 %v6390_v58, %v787_v13 }
 0xf8e   :  { %v797_v15 = vrot.slane %v6749_v12, 3 }
 0xf8f   :  { %v796_v16 = vrot.slane %v6751_v14, 4 }
 0xf91   :  { %v798_v17 = vsel %vm208_vm1, %v797_v15, %v796_v16 }
 0xf92   :  { %799 = vrot.lane.b32.xlu0 %v798_v17, %s6546_s0 }
0x1004   :  { %v800_v18 = vpop.permute.xlu0 %799 }
0x1005   :  { %5954 = vmatmul.mubr.msk.f32.vlgmr.msra.gmra.mrb[4].mxu1 %vm64_vm2, %v800_v18 }
0x1006   :  { %6211 = vmatpush3.bf16.msra.mxu1 %v6588_v5  ;;  %5967 = vmatprep.mubr.msk.f32.mxu1 %vm6541_vm0, %v6542_v3 }
0x1007   :  { %5975 = vmatprep.subr.mxu1 %v6542_v3 }
0x10d8   :  { %v869_v20 = vpop.f32.mrb[4].mxu1 }
0x10d9   :  { %v888_v22 = vadd.f32 %v869_v20, %v6609_v10  ;;  %v5955_v23 = vpop.f32.mrb[5].mxu1  ;;  %v874_v26 = vrot.slane %v869_v20, 3  ;;  %v875_v27 = vrot.slane %v869_v20, 4 }
0x10db   :  { %v891_v24 = vrot.slane %v888_v22, 4  ;;  %v890_v25 = vrot.slane %v888_v22, 3  ;;  %v878_v31 = vadd.f32 %v874_v26, %v6623_v28  ;;  %v879_v5 = vadd.f32 %v875_v27, %v6625_v29 }
0x10dd   :  { %894 = vrot.lane.b32.xlu0 %v891_v24, %s6546_s0  ;;  %892 = vrot.lane.b32.xlu1 %v890_v25, %s6546_s0  ;;  %v880_v33 = vmul.f32 0.5, %v878_v31  ;;  %v881_v34 = vmul.f32 0.5, %v879_v5 }
0x10df   :  { %6391 = vtanh.f32 %v880_v33 }
0x10e0   :  { %6393 = vtanh.f32 %v881_v34 }
0x10e9   :  { %v6392_v35 = vpop.eup %6391 }
0x10ea   :  { %v6394_v36 = vpop.eup %6393  ;;  %v884_v38 = vadd.f32 1.0, %v6392_v35 }
0x10eb   :  { %v885_v37 = vadd.f32 1.0, %v6394_v36 }
0x10ec   :  { %v886_v40 = vmul.f32 0.5, %v884_v38 }
0x10ed   :  { %v887_v39 = vmul.f32 0.5, %v885_v37 }
0x114f   :  { %v895_v41 = vpop.permute.xlu0 %894  ;;  %v893_v42 = vpop.permute.xlu1 %892 }
0x1150   :  { %v899_v45 = vmul.f32 %v895_v41, %v887_v39  ;;  %v898_v46 = vmul.f32 %v893_v42, %v886_v40 }
0x1152   :  { %904 = vrot.lane.b32.xlu0 %v899_v45, %s6545_s23  ;;  %902 = vrot.lane.b32.xlu1 %v898_v46, %s6545_s23 }
0x11c4   :  { %v905_v47 = vpop.permute.xlu0 %904  ;;  %v903_v48 = vpop.permute.xlu1 %902 }
0x11c5   :  { %v909_v49 = vadd.f32 %v905_v47, %v6625_v29  ;;  %v908_v50 = vadd.f32 %v903_v48, %v6623_v28 }
0x11c7   :  { %6395 = vtanh.f32 %v909_v49 }
0x11c8   :  { %6397 = vtanh.f32 %v908_v50 }
0x11d1   :  { %v6396_v51 = vpop.eup %6395 }
0x11d2   :  { %v6398_v52 = vpop.eup %6397  ;;  %v915_v53 = vrot.slane %v6396_v51, 1 }
0x11d3   :  { %v914_v54 = vrot.slane %v6398_v52, 1 }
0x11d4   :  { %v919_v55 = vsub.f32 %v6749_v12, %v915_v53 }
0x11d5   :  { %v918_v56 = vsub.f32 %v6751_v14, %v914_v54 }
0x11d6   :  { %v923_v57 = vrot.slane %v919_v55, 7 }
0x11d7   :  { %v922_v58 = vrot.slane %v918_v56, 7 }
0x11d8   :  { %926 = vrot.lane.b32.xlu0 %v923_v57, %s6547_s6 }
0x11d9   :  { %924 = vrot.lane.b32.xlu1 %v922_v58, %s6547_s6 }
0x124a   :  { %v927_v61 = vpop.permute.xlu0 %926 }
0x124b   :  { %v931_v62 = vmul.f32 %v927_v61, %v887_v39  ;;  %v925_v63 = vpop.permute.xlu1 %924 }
0x124c   :  { %v930_v1 = vmul.f32 %v925_v63, %v886_v40 }
0x124d   :  { %936 = vrot.lane.b32.xlu0 %v931_v62, %s6548_s7 }
0x124e   :  { %934 = vrot.lane.b32.xlu1 %v930_v1, %s6548_s7 }
0x12bf   :  { %v937_v2 = vpop.permute.xlu0 %936 }
0x12c0   :  { %v6777_v4 = vadd.f32 %v6396_v51, %v937_v2  ;;  %v935_v6 = vpop.permute.xlu1 %934 }
0x12c1   :  { %v6779_v7 = vadd.f32 %v6398_v52, %v935_v6 }
0x12c2   :  { %v945_v8 = vrot.slane %v6777_v4, 4 }
0x12c3   :  { %v944_v9 = vrot.slane %v6779_v7, 5 }
0x12c5   :  { %v946_v11 = vsel %vm208_vm1, %v945_v8, %v944_v9 }
0x12c6   :  { %947 = vrot.lane.b32.xlu1 %v946_v11, %s6546_s0 }
0x1338   :  { %v948_v13 = vpop.permute.xlu1 %947 }
0x1339   :  { %5961 = vmatmul.mubr.msk.f32.vlgmr.msra.gmra.mrb[6].mxu0 %vm64_vm2, %v948_v13 }
0x133a   :  { %5972 = vmatprep.mubr.msk.f32.mxu0 %vm6541_vm0, %v6542_v3 }
0x140c   :  { %v1017_v15 = vpop.f32.mrb[6].mxu0 }
0x140d   :  { %v1036_v16 = vadd.f32 %v1017_v15, %v6609_v10  ;;  %v5962_v17 = vpop.f32.mrb[7].mxu0  ;;  %v1022_v22 = vrot.slane %v1017_v15, 2  ;;  %v1023_v23 = vrot.slane %v1017_v15, 3 }
0x140f   :  { %v1039_v18 = vrot.slane %v1036_v16, 3  ;;  %v1038_v20 = vrot.slane %v1036_v16, 2  ;;  %v1026_v24 = vadd.f32 %v1022_v22, %v6623_v28  ;;  %v1027_v25 = vadd.f32 %v1023_v23, %v6625_v29 }
0x1411   :  { %1042 = vrot.lane.b32.xlu1 %v1039_v18, %s6546_s0  ;;  %1040 = vrot.lane.b32.xlu0 %v1038_v20, %s6546_s0  ;;  %v1028_v26 = vmul.f32 0.5, %v1026_v24  ;;  %v1029_v27 = vmul.f32 0.5, %v1027_v25 }
0x1413   :  { %6399 = vtanh.f32 %v1028_v26 }
0x1414   :  { %6401 = vtanh.f32 %v1029_v27 }
0x141d   :  { %v6400_v31 = vpop.eup %6399 }
0x141e   :  { %v6402_v5 = vpop.eup %6401  ;;  %v1032_v34 = vadd.f32 1.0, %v6400_v31 }
0x141f   :  { %v1033_v33 = vadd.f32 1.0, %v6402_v5 }
0x1420   :  { %v1034_v36 = vmul.f32 0.5, %v1032_v34 }
0x1421   :  { %v1035_v35 = vmul.f32 0.5, %v1033_v33 }
0x1483   :  { %v1043_v37 = vpop.permute.xlu1 %1042  ;;  %v1041_v38 = vpop.permute.xlu0 %1040 }
0x1484   :  { %v1047_v39 = vmul.f32 %v1043_v37, %v1035_v35  ;;  %v1046_v40 = vmul.f32 %v1041_v38, %v1034_v36 }
0x1486   :  { %1052 = vrot.lane.b32.xlu1 %v1047_v39, %s6545_s23  ;;  %1050 = vrot.lane.b32.xlu0 %v1046_v40, %s6545_s23 }
0x14f8   :  { %v1053_v41 = vpop.permute.xlu1 %1052  ;;  %v1051_v42 = vpop.permute.xlu0 %1050 }
0x14f9   :  { %v1057_v45 = vadd.f32 %v1053_v41, %v6625_v29  ;;  %v1056_v46 = vadd.f32 %v1051_v42, %v6623_v28 }
0x14fb   :  { %6403 = vtanh.f32 %v1057_v45 }
0x14fc   :  { %6405 = vtanh.f32 %v1056_v46 }
0x1505   :  { %v6404_v47 = vpop.eup %6403 }
0x1506   :  { %v6406_v48 = vpop.eup %6405  ;;  %v1063_v49 = vrot.slane %v6404_v47, 1 }
0x1507   :  { %v1062_v50 = vrot.slane %v6406_v48, 1 }
0x1508   :  { %v1067_v51 = vsub.f32 %v6777_v4, %v1063_v49 }
0x1509   :  { %v1066_v52 = vsub.f32 %v6779_v7, %v1062_v50 }
0x150a   :  { %v1071_v53 = vrot.slane %v1067_v51, 7 }
0x150b   :  { %v1070_v54 = vrot.slane %v1066_v52, 7 }
0x150c   :  { %1074 = vrot.lane.b32.xlu1 %v1071_v53, %s6547_s6 }
0x150d   :  { %1072 = vrot.lane.b32.xlu0 %v1070_v54, %s6547_s6  ;;  %v1240_v54 = vsel %vm1238_vm3, %v6637_v59, %v6667_v44 }
0x157e   :  { %v1075_v55 = vpop.permute.xlu1 %1074 }
0x157f   :  { %v1079_v56 = vmul.f32 %v1075_v55, %v1035_v35  ;;  %v1073_v57 = vpop.permute.xlu0 %1072  ;;  %v1239_v55 = vsel %vm1238_vm3, %v6639_v60, %v6665_v43 }
0x1580   :  { %v1078_v58 = vmul.f32 %v1073_v57, %v1034_v36  ;;  %v1242_v57 = vsel %vm1241_vm4, %v1239_v55, %v6695_v32 }
0x1581   :  { %1084 = vrot.lane.b32.xlu1 %v1079_v56, %s6548_s7  ;;  %v1243_v56 = vsel %vm1241_vm4, %v1240_v54, %v6693_v30 }
0x1582   :  { %1082 = vrot.lane.b32.xlu0 %v1078_v58, %s6548_s7  ;;  %v1246_v58 = vsel %vm1244_vm5, %v1243_v56, %v6721_v19 }
0x1583   :  { %v1249_v59 = vsel %vm1247_vm6, %v1246_v58, %v6749_v12 }
0x1584   :  { %v1252_v32 = vsel %vm1250_vm7, %v1249_v59, %v6777_v4  ;;  %v1588_v4 = vld [vmem:[%s7699_s1 + $0x18] sm:$0xff] }
0x15f3   :  { %v1085_v61 = vpop.permute.xlu1 %1084 }
0x15f4   :  { %v6803_v62 = vadd.f32 %v6404_v47, %v1085_v61  ;;  %v1083_v63 = vpop.permute.xlu0 %1082  ;;  %v1245_v61 = vsel %vm1244_vm5, %v1242_v57, %v6723_v21 }
0x15f5   :  { %v6805_v1 = vadd.f32 %v6406_v48, %v1083_v63  ;;  %v1248_v60 = vsel %vm1247_vm6, %v1245_v61, %v6751_v14 }
0x15f6   :  { %v1093_v2 = vrot.slane %v6803_v62, 5  ;;  %v1255_v19 = vsel %vm1253_vm8, %v1252_v32, %v6803_v62  ;;  %v1251_v21 = vsel %vm1250_vm7, %v1248_v60, %v6779_v7  ;;  %v1417_v7 = vld [vmem:[%s7699_s1 + $0x8] sm:$0xff] }
0x15f7   :  { %v1092_v6 = vrot.slane %v6805_v1, 6  ;;  %v1254_v12 = vsel %vm1253_vm8, %v1251_v21, %v6805_v1 }
0x15f9   :  { %v1094_v8 = vsel %vm208_vm1, %v1093_v2, %v1092_v6  ;;  %v17_v6 = vld [vmem:[%s7699_s1 + $0x20] sm:$0xff] }
0x15fa   :  { %1095 = vrot.lane.b32.xlu0 %v1094_v8, %s6546_s0 }
0x166c   :  { %v1096_v9 = vpop.permute.xlu0 %1095 }
0x166d   :  { %5968 = vmatmul.mubr.msk.f32.vlgmr.msra.gmra.mrb[6].mxu1 %vm64_vm2, %v1096_v9 }
0x166e   :  { %5977 = vmatprep.mubr.msk.f32.mxu1 %vm6541_vm0, %v6542_v3 }
0x1740   :  { %v1165_v11 = vpop.f32.mrb[6].mxu1 }
0x1741   :  { %v1184_v13 = vadd.f32 %v1165_v11, %v6609_v10  ;;  %v5969_v15 = vpop.f32.mrb[7].mxu1  ;;  %v1170_v18 = vrot.slane %v1165_v11, 1  ;;  %v1171_v20 = vrot.slane %v1165_v11, 2 }
0x1742   :  { %v1415_v15 = vld [vmem:[%s7699_s1] sm:$0xff] }
0x1743   :  { %v1187_v16 = vrot.slane %v1184_v13, 2  ;;  %v1186_v17 = vrot.slane %v1184_v13, 1  ;;  %v1174_v22 = vadd.f32 %v1170_v18, %v6623_v28  ;;  %v1175_v23 = vadd.f32 %v1171_v20, %v6625_v29 }
0x1745   :  { %1190 = vrot.lane.b32.xlu0 %v1187_v16, %s6546_s0  ;;  %1188 = vrot.lane.b32.xlu1 %v1186_v17, %s6546_s0  ;;  %v1176_v24 = vmul.f32 0.5, %v1174_v22  ;;  %v1177_v25 = vmul.f32 0.5, %v1175_v23  ;;  %v1416_v16 = vld [vmem:[%s7699_s1 + $0x88] sm:$0xff]  ;;  %v5644_v17 = vld [vmem:[%s7701_s2 + $0x5] ss:$0 sm:$0xff] }
0x1746   :  { %v6216_v18 = vpack.c.bf16 %v1416_v16, %v1415_v15 }
0x1747   :  { %6407 = vtanh.f32 %v1176_v24 }
0x1748   :  { %6409 = vtanh.f32 %v1177_v25 }
0x1751   :  { %v6408_v26 = vpop.eup %6407 }
0x1752   :  { %v6410_v27 = vpop.eup %6409  ;;  %v1180_v31 = vadd.f32 1.0, %v6408_v26 }
0x1753   :  { %v1181_v10 = vadd.f32 1.0, %v6410_v27 }
0x1754   :  { %v1182_v33 = vmul.f32 0.5, %v1180_v31 }
0x1755   :  { %v1183_v5 = vmul.f32 0.5, %v1181_v10 }
0x17b7   :  { %v1191_v34 = vpop.permute.xlu0 %1190  ;;  %v1189_v35 = vpop.permute.xlu1 %1188 }
0x17b8   :  { %v1195_v36 = vmul.f32 %v1191_v34, %v1183_v5  ;;  %v1194_v37 = vmul.f32 %v1189_v35, %v1182_v33 }
0x17ba   :  { %1200 = vrot.lane.b32.xlu0 %v1195_v36, %s6545_s23  ;;  %1198 = vrot.lane.b32.xlu1 %v1194_v37, %s6545_s23  ;;  %v5643_v36 = vld [vmem:[%s7701_s2 + $0x4] ss:$0 sm:$0xff] }
0x182c   :  { %v1201_v38 = vpop.permute.xlu0 %1200  ;;  %v1199_v39 = vpop.permute.xlu1 %1198 }
0x182d   :  { %v1205_v40 = vadd.f32 %v1201_v38, %v6625_v29  ;;  %v1204_v41 = vadd.f32 %v1199_v39, %v6623_v28 }
0x182f   :  { %6411 = vtanh.f32 %v1205_v40 }
0x1830   :  { %6413 = vtanh.f32 %v1204_v41 }
0x1839   :  { %v6412_v42 = vpop.eup %6411 }
0x183a   :  { %v6414_v45 = vpop.eup %6413  ;;  %v1211_v46 = vrot.slane %v6412_v42, 1 }
0x183b   :  { %v1210_v47 = vrot.slane %v6414_v45, 1 }
0x183c   :  { %v1215_v48 = vsub.f32 %v6803_v62, %v1211_v46  ;;  %v1589_v62 = vld [vmem:[%s7699_s1 + $0xa0] sm:$0xff] }
0x183d   :  { %v1214_v49 = vsub.f32 %v6805_v1, %v1210_v47  ;;  %v1418_v1 = vld [vmem:[%s7699_s1 + $0x90] sm:$0xff]  ;;  %v6874_v9 = vpack.c.bf16 %v1589_v62, %v1588_v4 }
0x183e   :  { %v1219_v50 = vrot.slane %v1215_v48, 7  ;;  %v6212_v13 = vpack.c.bf16 %v1418_v1, %v1417_v7 }
0x183f   :  { %v1218_v51 = vrot.slane %v1214_v49, 7 }
0x1840   :  { %1222 = vrot.lane.b32.xlu0 %v1219_v50, %s6547_s6 }
0x1841   :  { %1220 = vrot.lane.b32.xlu1 %v1218_v51, %s6547_s6 }
0x18b2   :  { %v1223_v52 = vpop.permute.xlu0 %1222 }
0x18b3   :  { %v1227_v29 = vmul.f32 %v1223_v52, %v1183_v5  ;;  %v1221_v53 = vpop.permute.xlu1 %1220 }
0x18b4   :  { %v1226_v28 = vmul.f32 %v1221_v53, %v1182_v33 }
0x18b5   :  { %1232 = vrot.lane.b32.xlu0 %v1227_v29, %s6548_s7 }
0x18b6   :  { %1230 = vrot.lane.b32.xlu1 %v1226_v28, %s6548_s7 }
0x1927   :  { %v1233_v44 = vpop.permute.xlu0 %1232 }
0x1928   :  { %v1237_v43 = vadd.f32 %v6412_v42, %v1233_v44  ;;  %v1231_v30 = vpop.permute.xlu1 %1230 }
0x1929   :  { %v1236_v63 = vadd.f32 %v6414_v45, %v1231_v30 }
0x192a   :  { %v1258_v2 = vsel %vm1256_vm9, %v1255_v19, %v1237_v43 }
0x192b   :  { %1338 = vrot.lane.b32.xlu0 %v1258_v2, %s6546_s0  ;;  %v1257_v14 = vsel %vm1256_vm9, %v1254_v12, %v1236_v63 }
0x192c   :  { %1260 = vrot.lane.b32.xlu1 %v1257_v14, %s6546_s0 }
0x1930   :  { %1680 = vrot.lane.b32.xlu1 %v5644_v17, %s6545_s23 }
0x199d   :  { %v1339_v8 = vpop.permute.xlu0 %1338 }
0x199e   :  { %v1261_v11 = vpop.permute.xlu1 %1260  ;;  %5976 = vmatpush3.msra.mxu1 %v1339_v8 }
0x199f   :  { %5971 = vmatpush3.msra.mxu0 %v1261_v11  ;;  %5978 = vmatmul.mubr.msk.f32.vlgmr.msra.gmra.mrb[8].mxu1 %vm1263_vm10, %v17_v6 }
0x19a0   :  { %5973 = vmatmul.mubr.msk.f32.vlgmr.msra.gmra.mrb[8].mxu0 %vm1263_vm10, %v17_v6  ;;  %6220 = vmatprep.subr.bf16.mxu1 %v6540_v0 }
0x19a1   :  { %6222 = vmatpush3.bf16.msra.mxu1 %v6874_v9  ;;  %5998 = vmatprep.mubr.msk.f32.mxu1 %vm6541_vm0, %v6542_v3 }
0x19a2   :  { %6213 = vmatprep.subr.bf16.mxu0 %v6212_v13  ;;  %6223 = vmatprep.subr.bf16.mxu1 %v6540_v0  ;;  %v6901_v27 = vpop.permute.xlu1 %1680 }
0x19a3   :  { %6215 = vmatpush3.bf16.msra.mxu0 %v6212_v13 }
0x19a4   :  { %5999 = vmatmul.mubr.f32.vlgmr.msra.gmra.mrb[10].mxu1 %v6542_v3  ;;  %6217 = vmatprep.subr.bf16.mxu0 %v6216_v18 }
0x19a5   :  { %6225 = vmatpush3.bf16.msra.mxu1 %v6874_v9  ;;  %6005 = vmatprep.mubr.msk.f32.mxu1 %vm6541_vm0, %v6542_v3 }
0x19a6   :  { %6229 = vmatprep.subr.bf16.mxu1 %v6540_v0 }
0x1a72   :  { %v1407_v20 = vpop.f32.mrb[8].mxu1 }
0x1a73   :  { %v1333_v22 = vpop.f32.mrb[8].mxu0  ;;  %v1414_v23 = vsel %vm1263_vm10, %v1407_v20, %v1339_v8  ;;  %v5979_v24 = vpop.f32.mrb[9].mxu1  ;;  %v1412_v35 = vsel %vm1263_vm10, %v1339_v8, %v1407_v20 }
0x1a74   :  { %v1413_v25 = vsel %vm1263_vm10, %v1333_v22, %v1261_v11  ;;  %v5974_v26 = vpop.f32.mrb[9].mxu0  ;;  %v1411_v10 = vsel %vm1263_vm10, %v1261_v11, %v1333_v22 }
0x1a75   :  { %5984 = vmatprep.mubr.msk.f32.mxu0 %vm64_vm2, %v1413_v25 }
0x1a76   :  { %5985 = vmatmul.mubr.msk.f32.vlgmr.msra.gmra.mrb[10].mxu0 %vm64_vm2, %v1414_v23 }
0x1a77   :  { %5991 = vmatprep.mubr.msk.f32.mxu0 %vm64_vm2, %v1411_v10  ;;  %6219 = vmatpush3.bf16.msra.mxu0 %v6216_v18  ;;  %v1657_v31 = vpop.f32.mrb[10].mxu1 }
0x1a78   :  { %v6000_v5 = vpop.f32.mrb[11].mxu1  ;;  %v1683_v33 = vadd.f32 %v6901_v27, %v1657_v31  ;;  %6226 = vmatprep.subr.bf16.mxu0 %v6540_v0  ;;  %v1662_v38 = vrot.slane %v1657_v31, 1 }
0x1a7a   :  { %1686 = vrot.lane.b32.xlu1 %v1683_v33, %s6546_s0  ;;  %v1685_v34 = vrot.slane %v1683_v33, 1 }
0x1a7c   :  { %1688 = vrot.lane.b32.xlu0 %v1685_v34, %s6546_s0 }
0x1a7e   :  { %5992 = vmatmul.mubr.msk.f32.vlgmr.msra.gmra.mrb[10].mxu0 %vm64_vm2, %v1412_v35 }
0x1a7f   :  { %6228 = vmatpush3.bf16.msra.mxu0 %v6874_v9  ;;  %6012 = vmatprep.mubr.msk.f32.mxu0 %vm6541_vm0, %v6542_v3 }
0x1a80   :  { %6232 = vmatprep.subr.bf16.mxu0 %v6540_v0 }
0x1aec   :  { %v1687_v28 = vpop.permute.xlu1 %1686 }
0x1aee   :  { %v1689_v52 = vpop.permute.xlu0 %1688 }
0x1b51   :  { %v5993_v37 = vpop.f32.mrb[10].mxu0 }
0x1b52   :  { %v6919_v39 = vadd.f32 %v5993_v37, %v5643_v36  ;;  %v1572_v40 = vpop.f32.mrb[11].mxu0 }
0x1b53   :  { %v6921_v41 = vadd.f32 %v5643_v36, %v1572_v40 }
0x1b54   :  { %v1666_v42 = vadd.f32 %v1662_v38, %v6919_v39 }
0x1b55   :  { %v1665_v45 = vadd.f32 %v1657_v31, %v6921_v41 }
0x1b56   :  { %v1668_v46 = vmul.f32 0.5, %v1666_v42 }
0x1b57   :  { %v1667_v47 = vmul.f32 0.5, %v1665_v45 }
0x1b58   :  { %6415 = vtanh.f32 %v1668_v46 }
0x1b59   :  { %6417 = vtanh.f32 %v1667_v47 }
0x1b62   :  { %v6416_v48 = vpop.eup %6415 }
0x1b63   :  { %v6418_v49 = vpop.eup %6417  ;;  %v1672_v50 = vadd.f32 1.0, %v6416_v48 }
0x1b64   :  { %v1671_v51 = vadd.f32 1.0, %v6418_v49 }
0x1b65   :  { %v1674_v29 = vmul.f32 0.5, %v1672_v50 }
0x1b66   :  { %v1673_v53 = vmul.f32 0.5, %v1671_v51 }
0x1b67   :  { %v1693_v54 = vmul.f32 %v1689_v52, %v1674_v29 }
0x1b68   :  { %v1692_v55 = vmul.f32 %v1687_v28, %v1673_v53 }
0x1b69   :  { %1698 = vrot.lane.b32.xlu0 %v1693_v54, %s6545_s23 }
0x1b6a   :  { %1696 = vrot.lane.b32.xlu1 %v1692_v55, %s6545_s23 }
0x1bdb   :  { %v1699_v56 = vpop.permute.xlu0 %1698 }
0x1bdc   :  { %v1703_v57 = vadd.f32 %v1699_v56, %v6919_v39  ;;  %v1697_v58 = vpop.permute.xlu1 %1696 }
0x1bdd   :  { %v1702_v61 = vadd.f32 %v1697_v58, %v6921_v41 }
0x1bde   :  { %6419 = vtanh.f32 %v1703_v57 }
0x1bdf   :  { %6421 = vtanh.f32 %v1702_v61 }
0x1be8   :  { %v6420_v59 = vpop.eup %6419 }
0x1be9   :  { %v6422_v44 = vpop.eup %6421  ;;  %v1707_v60 = vsub.f32 0.0, %v6420_v59 }
0x1bea   :  { %v1706_v43 = vsub.f32 0.0, %v6422_v44 }
0x1beb   :  { %1712 = vrot.lane.b32.xlu0 %v1707_v60, %s6547_s6 }
0x1bec   :  { %1710 = vrot.lane.b32.xlu1 %v1706_v43, %s6547_s6 }
0x1c5d   :  { %v1713_v30 = vpop.permute.xlu0 %1712 }
0x1c5e   :  { %v1717_v32 = vmul.f32 %v1713_v30, %v1674_v29  ;;  %v1711_v63 = vpop.permute.xlu1 %1710 }
0x1c5f   :  { %v1716_v19 = vmul.f32 %v1711_v63, %v1673_v53 }
0x1c60   :  { %1722 = vrot.lane.b32.xlu0 %v1717_v32, %s6548_s7 }
0x1c61   :  { %1720 = vrot.lane.b32.xlu1 %v1716_v19, %s6548_s7 }
0x1cd2   :  { %v1723_v21 = vpop.permute.xlu0 %1722 }
0x1cd3   :  { %v6933_v2 = vadd.f32 %v6420_v59, %v1723_v21  ;;  %v1721_v12 = vpop.permute.xlu1 %1720 }
0x1cd4   :  { %v6935_v14 = vadd.f32 %v6422_v44, %v1721_v12 }
0x1cd5   :  { %v1730_v4 = vrot.slane %v6933_v2, 7 }
0x1cd7   :  { %v1731_v62 = vsel %vm208_vm1, %v1730_v4, %v6935_v14 }
0x1cd8   :  { %1732 = vrot.lane.b32.xlu0 %v1731_v62, %s6546_s0 }
0x1d4a   :  { %v1733_v7 = vpop.permute.xlu0 %1732 }
0x1d4b   :  { %6006 = vmatmul.mubr.msk.f32.vlgmr.msra.gmra.mrb[12].mxu1 %vm64_vm2, %v1733_v7 }
0x1d4c   :  { %6231 = vmatpush3.bf16.msra.mxu1 %v6874_v9  ;;  %6019 = vmatprep.mubr.msk.f32.mxu1 %vm6541_vm0, %v6542_v3 }
0x1d4d   :  { %6235 = vmatprep.subr.bf16.mxu1 %v6540_v0 }
0x1e1e   :  { %v1802_v1 = vpop.f32.mrb[12].mxu1 }
0x1e1f   :  { %v1820_v6 = vadd.f32 %v1802_v1, %v6901_v27  ;;  %v6007_v8 = vpop.f32.mrb[13].mxu1  ;;  %v1807_v13 = vrot.slane %v1802_v1, 7  ;;  %v1811_v15 = vadd.f32 %v1802_v1, %v6919_v39 }
0x1e21   :  { %1825 = vrot.lane.b32.xlu0 %v1820_v6, %s6546_s0  ;;  %v1822_v11 = vrot.slane %v1820_v6, 7  ;;  %v1810_v16 = vadd.f32 %v1807_v13, %v6921_v41  ;;  %v1813_v17 = vmul.f32 0.5, %v1811_v15 }
0x1e23   :  { %1823 = vrot.lane.b32.xlu1 %v1822_v11, %s6546_s0  ;;  %v1812_v18 = vmul.f32 0.5, %v1810_v16  ;;  %6423 = vtanh.f32 %v1813_v17 }
0x1e25   :  { %6425 = vtanh.f32 %v1812_v18 }
0x1e2d   :  { %v6424_v20 = vpop.eup %6423 }
0x1e2e   :  { %v1817_v23 = vadd.f32 1.0, %v6424_v20 }
0x1e2f   :  { %v6426_v22 = vpop.eup %6425 }
0x1e30   :  { %v1816_v24 = vadd.f32 1.0, %v6426_v22  ;;  %v1819_v25 = vmul.f32 0.5, %v1817_v23 }
0x1e32   :  { %v1818_v31 = vmul.f32 0.5, %v1816_v24 }
0x1e93   :  { %v1826_v26 = vpop.permute.xlu0 %1825 }
0x1e94   :  { %v1830_v10 = vmul.f32 %v1826_v26, %v1819_v25 }
0x1e95   :  { %v1824_v5 = vpop.permute.xlu1 %1823 }
0x1e96   :  { %v1829_v33 = vmul.f32 %v1824_v5, %v1818_v31  ;;  %1835 = vrot.lane.b32.xlu0 %v1830_v10, %s6545_s23 }
0x1e98   :  { %1833 = vrot.lane.b32.xlu1 %v1829_v33, %s6545_s23 }
0x1f08   :  { %v1836_v34 = vpop.permute.xlu0 %1835 }
0x1f09   :  { %v1840_v35 = vadd.f32 %v1836_v34, %v6919_v39 }
0x1f0a   :  { %v1834_v36 = vpop.permute.xlu1 %1833 }
0x1f0b   :  { %6427 = vtanh.f32 %v1840_v35  ;;  %v1839_v37 = vadd.f32 %v1834_v36, %v6921_v41 }
0x1f0d   :  { %6429 = vtanh.f32 %v1839_v37 }
0x1f15   :  { %v6428_v38 = vpop.eup %6427 }
0x1f16   :  { %v1846_v40 = vrot.slane %v6428_v38, 1 }
0x1f17   :  { %v6430_v42 = vpop.eup %6429 }
0x1f18   :  { %v1850_v45 = vsub.f32 %v6933_v2, %v1846_v40  ;;  %v1845_v46 = vrot.slane %v6430_v42, 1 }
0x1f1a   :  { %v1854_v47 = vrot.slane %v1850_v45, 7  ;;  %v1849_v48 = vsub.f32 %v6935_v14, %v1845_v46 }
0x1f1c   :  { %1857 = vrot.lane.b32.xlu0 %v1854_v47, %s6547_s6  ;;  %v1853_v49 = vrot.slane %v1849_v48, 7 }
0x1f1e   :  { %1855 = vrot.lane.b32.xlu1 %v1853_v49, %s6547_s6 }
0x1f8e   :  { %v1858_v50 = vpop.permute.xlu0 %1857 }
0x1f8f   :  { %v1862_v51 = vmul.f32 %v1858_v50, %v1819_v25 }
0x1f90   :  { %v1856_v52 = vpop.permute.xlu1 %1855 }
0x1f91   :  { %v1861_v29 = vmul.f32 %v1856_v52, %v1818_v31  ;;  %1867 = vrot.lane.b32.xlu0 %v1862_v51, %s6548_s7 }
0x1f93   :  { %1865 = vrot.lane.b32.xlu1 %v1861_v29, %s6548_s7 }
0x2003   :  { %v1868_v53 = vpop.permute.xlu0 %1867 }
0x2004   :  { %v6963_v55 = vadd.f32 %v6428_v38, %v1868_v53 }
0x2005   :  { %v1866_v28 = vpop.permute.xlu1 %1865 }
0x2006   :  { %v6961_v54 = vadd.f32 %v6430_v42, %v1866_v28 }
0x2008   :  { %v1875_v56 = vrot.slane %v6961_v54, 1 }
0x200a   :  { %v1876_v57 = vsel %vm208_vm1, %v6963_v55, %v1875_v56 }
0x200b   :  { %1877 = vrot.lane.b32.xlu1 %v1876_v57, %s6546_s0 }
0x207d   :  { %v1878_v58 = vpop.permute.xlu1 %1877 }
0x207e   :  { %6013 = vmatmul.mubr.msk.f32.vlgmr.msra.gmra.mrb[12].mxu0 %vm64_vm2, %v1878_v58 }
0x207f   :  { %6234 = vmatpush3.bf16.msra.mxu0 %v6874_v9  ;;  %6026 = vmatprep.mubr.msk.f32.mxu0 %vm6541_vm0, %v6542_v3 }
0x2080   :  { %6238 = vmatprep.subr.bf16.mxu0 %v6540_v0 }
0x2151   :  { %v1947_v61 = vpop.f32.mrb[12].mxu0 }
0x2152   :  { %v1966_v59 = vadd.f32 %v1947_v61, %v6901_v27  ;;  %v6014_v44 = vpop.f32.mrb[13].mxu0  ;;  %v1953_v30 = vrot.slane %v1947_v61, 7  ;;  %v1952_v32 = vrot.slane %v1947_v61, 6 }
0x2154   :  { %v1969_v60 = vrot.slane %v1966_v59, 7  ;;  %v1968_v43 = vrot.slane %v1966_v59, 6  ;;  %v1957_v63 = vadd.f32 %v1953_v30, %v6919_v39  ;;  %v1956_v19 = vadd.f32 %v1952_v32, %v6921_v41 }
0x2156   :  { %1972 = vrot.lane.b32.xlu1 %v1969_v60, %s6546_s0  ;;  %1970 = vrot.lane.b32.xlu0 %v1968_v43, %s6546_s0  ;;  %v1959_v21 = vmul.f32 0.5, %v1957_v63  ;;  %v1958_v12 = vmul.f32 0.5, %v1956_v19 }
0x2158   :  { %6431 = vtanh.f32 %v1959_v21 }
0x2159   :  { %6433 = vtanh.f32 %v1958_v12 }
0x2162   :  { %v6432_v4 = vpop.eup %6431 }
0x2163   :  { %v6434_v62 = vpop.eup %6433  ;;  %v1963_v7 = vadd.f32 1.0, %v6432_v4 }
0x2164   :  { %v1962_v1 = vadd.f32 1.0, %v6434_v62 }
0x2165   :  { %v1965_v6 = vmul.f32 0.5, %v1963_v7 }
0x2166   :  { %v1964_v8 = vmul.f32 0.5, %v1962_v1 }
0x21c8   :  { %v1973_v11 = vpop.permute.xlu1 %1972  ;;  %v1971_v13 = vpop.permute.xlu0 %1970 }
0x21c9   :  { %v1977_v15 = vmul.f32 %v1973_v11, %v1965_v6  ;;  %v1976_v16 = vmul.f32 %v1971_v13, %v1964_v8 }
0x21cb   :  { %1982 = vrot.lane.b32.xlu1 %v1977_v15, %s6545_s23  ;;  %1980 = vrot.lane.b32.xlu0 %v1976_v16, %s6545_s23 }
0x223d   :  { %v1983_v17 = vpop.permute.xlu1 %1982  ;;  %v1981_v18 = vpop.permute.xlu0 %1980 }
0x223e   :  { %v1987_v20 = vadd.f32 %v1983_v17, %v6919_v39  ;;  %v1986_v22 = vadd.f32 %v1981_v18, %v6921_v41 }
0x2240   :  { %6435 = vtanh.f32 %v1987_v20 }
0x2241   :  { %6437 = vtanh.f32 %v1986_v22 }
0x224a   :  { %v6436_v23 = vpop.eup %6435 }
0x224b   :  { %v6438_v24 = vpop.eup %6437  ;;  %v1993_v25 = vrot.slane %v6436_v23, 1 }
0x224c   :  { %v1992_v26 = vrot.slane %v6438_v24, 1 }
0x224d   :  { %v1997_v10 = vsub.f32 %v6963_v55, %v1993_v25 }
0x224e   :  { %v1996_v31 = vsub.f32 %v6961_v54, %v1992_v26 }
0x224f   :  { %v2001_v5 = vrot.slane %v1997_v10, 7 }
0x2250   :  { %v2000_v33 = vrot.slane %v1996_v31, 7 }
0x2251   :  { %2004 = vrot.lane.b32.xlu1 %v2001_v5, %s6547_s6 }
0x2252   :  { %2002 = vrot.lane.b32.xlu0 %v2000_v33, %s6547_s6 }
0x22c3   :  { %v2005_v34 = vpop.permute.xlu1 %2004 }
0x22c4   :  { %v2009_v35 = vmul.f32 %v2005_v34, %v1965_v6  ;;  %v2003_v36 = vpop.permute.xlu0 %2002 }
0x22c5   :  { %v2008_v37 = vmul.f32 %v2003_v36, %v1964_v8 }
0x22c6   :  { %2014 = vrot.lane.b32.xlu1 %v2009_v35, %s6548_s7 }
0x22c7   :  { %2012 = vrot.lane.b32.xlu0 %v2008_v37, %s6548_s7 }
0x2338   :  { %v2015_v38 = vpop.permute.xlu1 %2014 }
0x2339   :  { %v6989_v40 = vadd.f32 %v6436_v23, %v2015_v38  ;;  %v2013_v42 = vpop.permute.xlu0 %2012 }
0x233a   :  { %v6991_v45 = vadd.f32 %v6438_v24, %v2013_v42 }
0x233b   :  { %v2023_v46 = vrot.slane %v6989_v40, 1 }
0x233c   :  { %v2022_v47 = vrot.slane %v6991_v45, 2 }
0x233e   :  { %v2024_v48 = vsel %vm208_vm1, %v2023_v46, %v2022_v47 }
0x233f   :  { %2025 = vrot.lane.b32.xlu0 %v2024_v48, %s6546_s0 }
0x23b1   :  { %v2026_v49 = vpop.permute.xlu0 %2025 }
0x23b2   :  { %6020 = vmatmul.mubr.msk.f32.vlgmr.msra.gmra.mrb[14].mxu1 %vm64_vm2, %v2026_v49 }
0x23b3   :  { %6237 = vmatpush3.bf16.msra.mxu1 %v6874_v9  ;;  %6033 = vmatprep.mubr.msk.f32.mxu1 %vm6541_vm0, %v6542_v3 }
0x23b4   :  { %6241 = vmatprep.subr.bf16.mxu1 %v6540_v0 }
0x2485   :  { %v2095_v50 = vpop.f32.mrb[14].mxu1 }
0x2486   :  { %v2114_v51 = vadd.f32 %v2095_v50, %v6901_v27  ;;  %v6021_v52 = vpop.f32.mrb[15].mxu1  ;;  %v2101_v28 = vrot.slane %v2095_v50, 6  ;;  %v2100_v56 = vrot.slane %v2095_v50, 5 }
0x2488   :  { %v2116_v29 = vrot.slane %v2114_v51, 5  ;;  %v2117_v53 = vrot.slane %v2114_v51, 6  ;;  %v2105_v57 = vadd.f32 %v2101_v28, %v6919_v39  ;;  %v2104_v58 = vadd.f32 %v2100_v56, %v6921_v41 }
0x248a   :  { %2120 = vrot.lane.b32.xlu0 %v2117_v53, %s6546_s0  ;;  %2118 = vrot.lane.b32.xlu1 %v2116_v29, %s6546_s0  ;;  %v2107_v61 = vmul.f32 0.5, %v2105_v57  ;;  %v2106_v59 = vmul.f32 0.5, %v2104_v58 }
0x248c   :  { %6439 = vtanh.f32 %v2107_v61 }
0x248d   :  { %6441 = vtanh.f32 %v2106_v59 }
0x2496   :  { %v6440_v44 = vpop.eup %6439 }
0x2497   :  { %v6442_v60 = vpop.eup %6441  ;;  %v2111_v43 = vadd.f32 1.0, %v6440_v44 }
0x2498   :  { %v2110_v30 = vadd.f32 1.0, %v6442_v60 }
0x2499   :  { %v2113_v32 = vmul.f32 0.5, %v2111_v43 }
0x249a   :  { %v2112_v63 = vmul.f32 0.5, %v2110_v30 }
0x24fc   :  { %v2121_v19 = vpop.permute.xlu0 %2120  ;;  %v2119_v21 = vpop.permute.xlu1 %2118 }
0x24fd   :  { %v2125_v12 = vmul.f32 %v2121_v19, %v2113_v32  ;;  %v2124_v4 = vmul.f32 %v2119_v21, %v2112_v63 }
0x24ff   :  { %2130 = vrot.lane.b32.xlu0 %v2125_v12, %s6545_s23  ;;  %2128 = vrot.lane.b32.xlu1 %v2124_v4, %s6545_s23 }
0x2571   :  { %v2131_v62 = vpop.permute.xlu0 %2130  ;;  %v2129_v7 = vpop.permute.xlu1 %2128 }
0x2572   :  { %v2135_v1 = vadd.f32 %v2131_v62, %v6919_v39  ;;  %v2134_v6 = vadd.f32 %v2129_v7, %v6921_v41 }
0x2574   :  { %6443 = vtanh.f32 %v2135_v1 }
0x2575   :  { %6445 = vtanh.f32 %v2134_v6 }
0x257e   :  { %v6444_v8 = vpop.eup %6443 }
0x257f   :  { %v6446_v11 = vpop.eup %6445  ;;  %v2141_v13 = vrot.slane %v6444_v8, 1 }
0x2580   :  { %v2140_v15 = vrot.slane %v6446_v11, 1 }
0x2581   :  { %v2145_v16 = vsub.f32 %v6989_v40, %v2141_v13 }
0x2582   :  { %v2144_v17 = vsub.f32 %v6991_v45, %v2140_v15 }
0x2583   :  { %v2149_v18 = vrot.slane %v2145_v16, 7 }
0x2584   :  { %v2148_v20 = vrot.slane %v2144_v17, 7 }
0x2585   :  { %2152 = vrot.lane.b32.xlu0 %v2149_v18, %s6547_s6 }
0x2586   :  { %2150 = vrot.lane.b32.xlu1 %v2148_v20, %s6547_s6 }
0x25f7   :  { %v2153_v22 = vpop.permute.xlu0 %2152 }
0x25f8   :  { %v2157_v23 = vmul.f32 %v2153_v22, %v2113_v32  ;;  %v2151_v24 = vpop.permute.xlu1 %2150 }
0x25f9   :  { %v2156_v25 = vmul.f32 %v2151_v24, %v2112_v63 }
0x25fa   :  { %2162 = vrot.lane.b32.xlu0 %v2157_v23, %s6548_s7 }
0x25fb   :  { %2160 = vrot.lane.b32.xlu1 %v2156_v25, %s6548_s7 }
0x266c   :  { %v2163_v26 = vpop.permute.xlu0 %2162 }
0x266d   :  { %v7017_v10 = vadd.f32 %v6444_v8, %v2163_v26  ;;  %v2161_v31 = vpop.permute.xlu1 %2160 }
0x266e   :  { %v7019_v5 = vadd.f32 %v6446_v11, %v2161_v31 }
0x266f   :  { %v2171_v33 = vrot.slane %v7017_v10, 2 }
0x2670   :  { %v2170_v34 = vrot.slane %v7019_v5, 3 }
0x2672   :  { %v2172_v35 = vsel %vm208_vm1, %v2171_v33, %v2170_v34 }
0x2673   :  { %2173 = vrot.lane.b32.xlu1 %v2172_v35, %s6546_s0 }
0x26e5   :  { %v2174_v36 = vpop.permute.xlu1 %2173 }
0x26e6   :  { %6027 = vmatmul.mubr.msk.f32.vlgmr.msra.gmra.mrb[14].mxu0 %vm64_vm2, %v2174_v36 }
0x26e7   :  { %6240 = vmatpush3.bf16.msra.mxu0 %v6874_v9  ;;  %6040 = vmatprep.mubr.msk.f32.mxu0 %vm6541_vm0, %v6542_v3 }
0x26e8   :  { %6050 = vmatprep.subr.mxu0 %v6542_v3 }
0x27b9   :  { %v2243_v37 = vpop.f32.mrb[14].mxu0 }
0x27ba   :  { %v2262_v38 = vadd.f32 %v2243_v37, %v6901_v27  ;;  %v6028_v42 = vpop.f32.mrb[15].mxu0  ;;  %v2249_v48 = vrot.slane %v2243_v37, 5  ;;  %v2248_v49 = vrot.slane %v2243_v37, 4 }
0x27bc   :  { %v2264_v46 = vrot.slane %v2262_v38, 4  ;;  %v2265_v47 = vrot.slane %v2262_v38, 5  ;;  %v2253_v50 = vadd.f32 %v2249_v48, %v6919_v39  ;;  %v2252_v51 = vadd.f32 %v2248_v49, %v6921_v41 }
0x27be   :  { %2268 = vrot.lane.b32.xlu1 %v2265_v47, %s6546_s0  ;;  %2266 = vrot.lane.b32.xlu0 %v2264_v46, %s6546_s0  ;;  %v2255_v52 = vmul.f32 0.5, %v2253_v50  ;;  %v2254_v29 = vmul.f32 0.5, %v2252_v51 }
0x27c0   :  { %6447 = vtanh.f32 %v2255_v52 }
0x27c1   :  { %6449 = vtanh.f32 %v2254_v29 }
0x27ca   :  { %v6448_v53 = vpop.eup %6447 }
0x27cb   :  { %v6450_v28 = vpop.eup %6449  ;;  %v2259_v56 = vadd.f32 1.0, %v6448_v53 }
0x27cc   :  { %v2258_v57 = vadd.f32 1.0, %v6450_v28 }
0x27cd   :  { %v2261_v58 = vmul.f32 0.5, %v2259_v56 }
0x27ce   :  { %v2260_v61 = vmul.f32 0.5, %v2258_v57 }
0x2830   :  { %v2269_v59 = vpop.permute.xlu1 %2268  ;;  %v2267_v44 = vpop.permute.xlu0 %2266 }
0x2831   :  { %v2273_v60 = vmul.f32 %v2269_v59, %v2261_v58  ;;  %v2272_v43 = vmul.f32 %v2267_v44, %v2260_v61 }
0x2833   :  { %2278 = vrot.lane.b32.xlu1 %v2273_v60, %s6545_s23  ;;  %2276 = vrot.lane.b32.xlu0 %v2272_v43, %s6545_s23 }
0x28a5   :  { %v2279_v30 = vpop.permute.xlu1 %2278  ;;  %v2277_v32 = vpop.permute.xlu0 %2276 }
0x28a6   :  { %v2283_v63 = vadd.f32 %v2279_v30, %v6919_v39  ;;  %v2282_v19 = vadd.f32 %v2277_v32, %v6921_v41 }
0x28a8   :  { %6451 = vtanh.f32 %v2283_v63 }
0x28a9   :  { %6453 = vtanh.f32 %v2282_v19 }
0x28b2   :  { %v6452_v21 = vpop.eup %6451 }
0x28b3   :  { %v6454_v12 = vpop.eup %6453  ;;  %v2289_v4 = vrot.slane %v6452_v21, 1 }
0x28b4   :  { %v2288_v62 = vrot.slane %v6454_v12, 1 }
0x28b5   :  { %v2293_v7 = vsub.f32 %v7017_v10, %v2289_v4 }
0x28b6   :  { %v2292_v1 = vsub.f32 %v7019_v5, %v2288_v62 }
0x28b7   :  { %v2297_v6 = vrot.slane %v2293_v7, 7 }
0x28b8   :  { %v2296_v8 = vrot.slane %v2292_v1, 7 }
0x28b9   :  { %2300 = vrot.lane.b32.xlu1 %v2297_v6, %s6547_s6 }
0x28ba   :  { %2298 = vrot.lane.b32.xlu0 %v2296_v8, %s6547_s6 }
0x292b   :  { %v2301_v11 = vpop.permute.xlu1 %2300 }
0x292c   :  { %v2305_v13 = vmul.f32 %v2301_v11, %v2261_v58  ;;  %v2299_v15 = vpop.permute.xlu0 %2298 }
0x292d   :  { %v2304_v16 = vmul.f32 %v2299_v15, %v2260_v61 }
0x292e   :  { %2310 = vrot.lane.b32.xlu1 %v2305_v13, %s6548_s7 }
0x292f   :  { %2308 = vrot.lane.b32.xlu0 %v2304_v16, %s6548_s7 }
0x29a0   :  { %v2311_v17 = vpop.permute.xlu1 %2310 }
0x29a1   :  { %v7045_v18 = vadd.f32 %v6452_v21, %v2311_v17  ;;  %v2309_v20 = vpop.permute.xlu0 %2308 }
0x29a2   :  { %v7047_v22 = vadd.f32 %v6454_v12, %v2309_v20 }
0x29a3   :  { %v2319_v23 = vrot.slane %v7045_v18, 3 }
0x29a4   :  { %v2318_v24 = vrot.slane %v7047_v22, 4 }
0x29a6   :  { %v2320_v25 = vsel %vm208_vm1, %v2319_v23, %v2318_v24 }
0x29a7   :  { %2321 = vrot.lane.b32.xlu0 %v2320_v25, %s6546_s0 }
0x2a19   :  { %v2322_v26 = vpop.permute.xlu0 %2321 }
0x2a1a   :  { %6034 = vmatmul.mubr.msk.f32.vlgmr.msra.gmra.mrb[16].mxu1 %vm64_vm2, %v2322_v26 }
0x2a1b   :  { %6243 = vmatpush3.bf16.msra.mxu1 %v6874_v9  ;;  %6047 = vmatprep.mubr.msk.f32.mxu1 %vm6541_vm0, %v6542_v3 }
0x2a1c   :  { %6055 = vmatprep.subr.mxu1 %v6542_v3 }
0x2aed   :  { %v2391_v31 = vpop.f32.mrb[16].mxu1 }
0x2aee   :  { %v2410_v33 = vadd.f32 %v2391_v31, %v6901_v27  ;;  %v6035_v34 = vpop.f32.mrb[17].mxu1  ;;  %v2397_v37 = vrot.slane %v2391_v31, 4  ;;  %v2396_v38 = vrot.slane %v2391_v31, 3 }
0x2af0   :  { %v2412_v35 = vrot.slane %v2410_v33, 3  ;;  %v2413_v36 = vrot.slane %v2410_v33, 4  ;;  %v2401_v42 = vadd.f32 %v2397_v37, %v6919_v39  ;;  %v2400_v9 = vadd.f32 %v2396_v38, %v6921_v41 }
0x2af2   :  { %2416 = vrot.lane.b32.xlu0 %v2413_v36, %s6546_s0  ;;  %2414 = vrot.lane.b32.xlu1 %v2412_v35, %s6546_s0  ;;  %v2403_v46 = vmul.f32 0.5, %v2401_v42  ;;  %v2402_v47 = vmul.f32 0.5, %v2400_v9 }
0x2af4   :  { %6455 = vtanh.f32 %v2403_v46 }
0x2af5   :  { %6457 = vtanh.f32 %v2402_v47 }
0x2afe   :  { %v6456_v48 = vpop.eup %6455 }
0x2aff   :  { %v6458_v49 = vpop.eup %6457  ;;  %v2407_v50 = vadd.f32 1.0, %v6456_v48 }
0x2b00   :  { %v2406_v51 = vadd.f32 1.0, %v6458_v49 }
0x2b01   :  { %v2409_v52 = vmul.f32 0.5, %v2407_v50 }
0x2b02   :  { %v2408_v29 = vmul.f32 0.5, %v2406_v51 }
0x2b64   :  { %v2417_v53 = vpop.permute.xlu0 %2416  ;;  %v2415_v28 = vpop.permute.xlu1 %2414 }
0x2b65   :  { %v2421_v56 = vmul.f32 %v2417_v53, %v2409_v52  ;;  %v2420_v57 = vmul.f32 %v2415_v28, %v2408_v29 }
0x2b67   :  { %2426 = vrot.lane.b32.xlu0 %v2421_v56, %s6545_s23  ;;  %2424 = vrot.lane.b32.xlu1 %v2420_v57, %s6545_s23 }
0x2bd9   :  { %v2427_v58 = vpop.permute.xlu0 %2426  ;;  %v2425_v61 = vpop.permute.xlu1 %2424 }
0x2bda   :  { %v2431_v59 = vadd.f32 %v2427_v58, %v6919_v39  ;;  %v2430_v44 = vadd.f32 %v2425_v61, %v6921_v41 }
0x2bdc   :  { %6459 = vtanh.f32 %v2431_v59 }
0x2bdd   :  { %6461 = vtanh.f32 %v2430_v44 }
0x2be6   :  { %v6460_v60 = vpop.eup %6459 }
0x2be7   :  { %v6462_v43 = vpop.eup %6461  ;;  %v2437_v30 = vrot.slane %v6460_v60, 1 }
0x2be8   :  { %v2436_v32 = vrot.slane %v6462_v43, 1 }
0x2be9   :  { %v2441_v63 = vsub.f32 %v7045_v18, %v2437_v30 }
0x2bea   :  { %v2440_v19 = vsub.f32 %v7047_v22, %v2436_v32 }
0x2beb   :  { %v2445_v21 = vrot.slane %v2441_v63, 7 }
0x2bec   :  { %v2444_v12 = vrot.slane %v2440_v19, 7 }
0x2bed   :  { %2448 = vrot.lane.b32.xlu0 %v2445_v21, %s6547_s6 }
0x2bee   :  { %2446 = vrot.lane.b32.xlu1 %v2444_v12, %s6547_s6 }
0x2c5f   :  { %v2449_v4 = vpop.permute.xlu0 %2448 }
0x2c60   :  { %v2453_v62 = vmul.f32 %v2449_v4, %v2409_v52  ;;  %v2447_v7 = vpop.permute.xlu1 %2446 }
0x2c61   :  { %v2452_v1 = vmul.f32 %v2447_v7, %v2408_v29 }
0x2c62   :  { %2458 = vrot.lane.b32.xlu0 %v2453_v62, %s6548_s7 }
0x2c63   :  { %2456 = vrot.lane.b32.xlu1 %v2452_v1, %s6548_s7 }
0x2cd4   :  { %v2459_v6 = vpop.permute.xlu0 %2458 }
0x2cd5   :  { %v7073_v8 = vadd.f32 %v6460_v60, %v2459_v6  ;;  %v2457_v11 = vpop.permute.xlu1 %2456 }
0x2cd6   :  { %v7075_v13 = vadd.f32 %v6462_v43, %v2457_v11 }
0x2cd7   :  { %v2467_v15 = vrot.slane %v7073_v8, 4 }
0x2cd8   :  { %v2466_v16 = vrot.slane %v7075_v13, 5 }
0x2cda   :  { %v2468_v17 = vsel %vm208_vm1, %v2467_v15, %v2466_v16 }
0x2cdb   :  { %2469 = vrot.lane.b32.xlu1 %v2468_v17, %s6546_s0 }
0x2d4d   :  { %v2470_v20 = vpop.permute.xlu1 %2469 }
0x2d4e   :  { %6041 = vmatmul.mubr.msk.f32.vlgmr.msra.gmra.mrb[16].mxu0 %vm64_vm2, %v2470_v20 }
0x2d4f   :  { %6052 = vmatprep.mubr.msk.f32.mxu0 %vm6541_vm0, %v6542_v3 }
0x2e21   :  { %v2539_v23 = vpop.f32.mrb[16].mxu0 }
0x2e22   :  { %v2558_v24 = vadd.f32 %v2539_v23, %v6901_v27  ;;  %v6042_v25 = vpop.f32.mrb[17].mxu0  ;;  %v2545_v33 = vrot.slane %v2539_v23, 3  ;;  %v2544_v34 = vrot.slane %v2539_v23, 2 }
0x2e24   :  { %v2560_v26 = vrot.slane %v2558_v24, 2  ;;  %v2561_v31 = vrot.slane %v2558_v24, 3  ;;  %v2549_v35 = vadd.f32 %v2545_v33, %v6919_v39  ;;  %v2548_v36 = vadd.f32 %v2544_v34, %v6921_v41 }
0x2e26   :  { %2564 = vrot.lane.b32.xlu1 %v2561_v31, %s6546_s0  ;;  %2562 = vrot.lane.b32.xlu0 %v2560_v26, %s6546_s0  ;;  %v2551_v37 = vmul.f32 0.5, %v2549_v35  ;;  %v2550_v38 = vmul.f32 0.5, %v2548_v36 }
0x2e28   :  { %6463 = vtanh.f32 %v2551_v37 }
0x2e29   :  { %6465 = vtanh.f32 %v2550_v38 }
0x2e32   :  { %v6464_v42 = vpop.eup %6463 }
0x2e33   :  { %v6466_v9 = vpop.eup %6465  ;;  %v2555_v46 = vadd.f32 1.0, %v6464_v42 }
0x2e34   :  { %v2554_v47 = vadd.f32 1.0, %v6466_v9 }
0x2e35   :  { %v2557_v48 = vmul.f32 0.5, %v2555_v46 }
0x2e36   :  { %v2556_v49 = vmul.f32 0.5, %v2554_v47 }
0x2e98   :  { %v2565_v50 = vpop.permute.xlu1 %2564  ;;  %v2563_v51 = vpop.permute.xlu0 %2562 }
0x2e99   :  { %v2569_v52 = vmul.f32 %v2565_v50, %v2557_v48  ;;  %v2568_v29 = vmul.f32 %v2563_v51, %v2556_v49 }
0x2e9b   :  { %2574 = vrot.lane.b32.xlu1 %v2569_v52, %s6545_s23  ;;  %2572 = vrot.lane.b32.xlu0 %v2568_v29, %s6545_s23 }
0x2f0d   :  { %v2575_v53 = vpop.permute.xlu1 %2574  ;;  %v2573_v28 = vpop.permute.xlu0 %2572 }
0x2f0e   :  { %v2579_v56 = vadd.f32 %v2575_v53, %v6919_v39  ;;  %v2578_v57 = vadd.f32 %v2573_v28, %v6921_v41 }
0x2f10   :  { %6467 = vtanh.f32 %v2579_v56 }
0x2f11   :  { %6469 = vtanh.f32 %v2578_v57 }
0x2f1a   :  { %v6468_v58 = vpop.eup %6467 }
0x2f1b   :  { %v6470_v61 = vpop.eup %6469  ;;  %v2585_v59 = vrot.slane %v6468_v58, 1 }
0x2f1c   :  { %v2584_v44 = vrot.slane %v6470_v61, 1 }
0x2f1d   :  { %v2589_v60 = vsub.f32 %v7073_v8, %v2585_v59 }
0x2f1e   :  { %v2588_v43 = vsub.f32 %v7075_v13, %v2584_v44 }
0x2f1f   :  { %v2593_v30 = vrot.slane %v2589_v60, 7 }
0x2f20   :  { %v2592_v32 = vrot.slane %v2588_v43, 7 }
0x2f21   :  { %2596 = vrot.lane.b32.xlu1 %v2593_v30, %s6547_s6 }
0x2f22   :  { %2594 = vrot.lane.b32.xlu0 %v2592_v32, %s6547_s6  ;;  %v2761_v32 = vsel %vm1238_vm3, %v6933_v2, %v6963_v55 }
0x2f93   :  { %v2597_v63 = vpop.permute.xlu1 %2596 }
0x2f94   :  { %v2601_v19 = vmul.f32 %v2597_v63, %v2557_v48  ;;  %v2595_v21 = vpop.permute.xlu0 %2594  ;;  %v2760_v63 = vsel %vm1238_vm3, %v6935_v14, %v6961_v54 }
0x2f95   :  { %v2600_v12 = vmul.f32 %v2595_v21, %v2556_v49  ;;  %v2762_v21 = vsel %vm1241_vm4, %v2760_v63, %v6991_v45 }
0x2f96   :  { %2606 = vrot.lane.b32.xlu1 %v2601_v19, %s6548_s7  ;;  %v2763_v19 = vsel %vm1241_vm4, %v2761_v32, %v6989_v40 }
0x2f97   :  { %2604 = vrot.lane.b32.xlu0 %v2600_v12, %s6548_s7  ;;  %v2765_v12 = vsel %vm1244_vm5, %v2763_v19, %v7017_v10 }
0x3008   :  { %v2607_v4 = vpop.permute.xlu1 %2606 }
0x3009   :  { %v7099_v62 = vadd.f32 %v6468_v58, %v2607_v4  ;;  %v2605_v7 = vpop.permute.xlu0 %2604  ;;  %v2764_v4 = vsel %vm1244_vm5, %v2762_v21, %v7019_v5 }
0x300a   :  { %v7101_v1 = vadd.f32 %v6470_v61, %v2605_v7  ;;  %v2767_v7 = vsel %vm1247_vm6, %v2765_v12, %v7045_v18  ;;  %v2766_v55 = vsel %vm1247_vm6, %v2764_v4, %v7047_v22 }
0x300b   :  { %v2615_v6 = vrot.slane %v7099_v62, 5  ;;  %v2769_v14 = vsel %vm1250_vm7, %v2767_v7, %v7073_v8  ;;  %v2768_v45 = vsel %vm1250_vm7, %v2766_v55, %v7075_v13  ;;  %v2924_v8 = vld [vmem:[%s7699_s1 + $0x28] sm:$0xff]  ;;  %v2925_v13 = vld [vmem:[%s7699_s1 + $0xb0] sm:$0xff] }
0x300c   :  { %v2614_v11 = vrot.slane %v7101_v1, 6  ;;  %v2771_v10 = vsel %vm1253_vm8, %v2769_v14, %v7099_v62  ;;  %v2770_v5 = vsel %vm1253_vm8, %v2768_v45, %v7101_v1 }
0x300e   :  { %v2616_v15 = vsel %vm208_vm1, %v2615_v6, %v2614_v11 }
0x300f   :  { %2617 = vrot.lane.b32.xlu0 %v2616_v15, %s6546_s0 }
0x3081   :  { %v2618_v16 = vpop.permute.xlu0 %2617 }
0x3082   :  { %6048 = vmatmul.mubr.msk.f32.vlgmr.msra.gmra.mrb[18].mxu1 %vm64_vm2, %v2618_v16 }
0x3083   :  { %6057 = vmatprep.mubr.msk.f32.mxu1 %vm6541_vm0, %v6542_v3 }
0x3155   :  { %v2687_v17 = vpop.f32.mrb[18].mxu1 }
0x3156   :  { %v2706_v20 = vadd.f32 %v2687_v17, %v6901_v27  ;;  %v6049_v23 = vpop.f32.mrb[19].mxu1  ;;  %v2693_v26 = vrot.slane %v2687_v17, 2  ;;  %v2692_v31 = vrot.slane %v2687_v17, 1 }
0x3158   :  { %v2708_v24 = vrot.slane %v2706_v20, 1  ;;  %v2709_v25 = vrot.slane %v2706_v20, 2  ;;  %v2697_v33 = vadd.f32 %v2693_v26, %v6919_v39  ;;  %v2696_v34 = vadd.f32 %v2692_v31, %v6921_v41  ;;  %v5654_v26 = vld [vmem:[%s7701_s2 + $0x6] ss:$0 sm:$0xff] }
0x315a   :  { %2712 = vrot.lane.b32.xlu0 %v2709_v25, %s6546_s0  ;;  %2710 = vrot.lane.b32.xlu1 %v2708_v24, %s6546_s0  ;;  %v2699_v35 = vmul.f32 0.5, %v2697_v33  ;;  %v2698_v36 = vmul.f32 0.5, %v2696_v34 }
0x315c   :  { %6471 = vtanh.f32 %v2699_v35 }
0x315d   :  { %6473 = vtanh.f32 %v2698_v36 }
0x3166   :  { %v6472_v37 = vpop.eup %6471 }
0x3167   :  { %v6474_v38 = vpop.eup %6473  ;;  %v2703_v27 = vadd.f32 1.0, %v6472_v37 }
0x3168   :  { %v2702_v42 = vadd.f32 1.0, %v6474_v38 }
0x3169   :  { %v2705_v9 = vmul.f32 0.5, %v2703_v27 }
0x316a   :  { %v2704_v46 = vmul.f32 0.5, %v2702_v42 }
0x31cc   :  { %v2713_v47 = vpop.permute.xlu0 %2712  ;;  %v2711_v48 = vpop.permute.xlu1 %2710 }
0x31cd   :  { %v2717_v49 = vmul.f32 %v2713_v47, %v2705_v9  ;;  %v2716_v50 = vmul.f32 %v2711_v48, %v2704_v46 }
0x31cf   :  { %2722 = vrot.lane.b32.xlu0 %v2717_v49, %s6545_s23  ;;  %2720 = vrot.lane.b32.xlu1 %v2716_v50, %s6545_s23 }
0x3241   :  { %v2723_v51 = vpop.permute.xlu0 %2722  ;;  %v2721_v52 = vpop.permute.xlu1 %2720 }
0x3242   :  { %v2727_v29 = vadd.f32 %v2723_v51, %v6919_v39  ;;  %v2726_v53 = vadd.f32 %v2721_v52, %v6921_v41 }
0x3244   :  { %6475 = vtanh.f32 %v2727_v29 }
0x3245   :  { %6477 = vtanh.f32 %v2726_v53 }
0x324e   :  { %v6476_v28 = vpop.eup %6475 }
0x324f   :  { %v6478_v56 = vpop.eup %6477  ;;  %v2733_v57 = vrot.slane %v6476_v28, 1 }
0x3250   :  { %v2732_v58 = vrot.slane %v6478_v56, 1 }
0x3251   :  { %v2737_v61 = vsub.f32 %v7099_v62, %v2733_v57  ;;  %v6244_v62 = vpack.c.bf16 %v2925_v13, %v2924_v8 }
0x3252   :  { %v2736_v59 = vsub.f32 %v7101_v1, %v2732_v58  ;;  %v6539_v1 = vld [vmem:[%s7699_s1 + $0x20] sm:$0xff] }
0x3253   :  { %v2741_v44 = vrot.slane %v2737_v61, 7 }
0x3254   :  { %v2740_v60 = vrot.slane %v2736_v59, 7 }
0x3255   :  { %2744 = vrot.lane.b32.xlu0 %v2741_v44, %s6547_s6 }
0x3256   :  { %2742 = vrot.lane.b32.xlu1 %v2740_v60, %s6547_s6 }
0x32c7   :  { %v2745_v43 = vpop.permute.xlu0 %2744 }
0x32c8   :  { %v2749_v39 = vmul.f32 %v2745_v43, %v2705_v9  ;;  %v2743_v30 = vpop.permute.xlu1 %2742 }
0x32c9   :  { %v2748_v41 = vmul.f32 %v2743_v30, %v2704_v46 }
0x32ca   :  { %2754 = vrot.lane.b32.xlu0 %v2749_v39, %s6548_s7 }
0x32cb   :  { %2752 = vrot.lane.b32.xlu1 %v2748_v41, %s6548_s7 }
0x333c   :  { %v2755_v2 = vpop.permute.xlu0 %2754 }
0x333d   :  { %v2759_v54 = vadd.f32 %v6476_v28, %v2755_v2  ;;  %v2753_v40 = vpop.permute.xlu1 %2752 }
0x333e   :  { %v2758_v6 = vadd.f32 %v6478_v56, %v2753_v40 }
0x333f   :  { %v2773_v18 = vsel %vm1256_vm9, %v2771_v10, %v2759_v54 }
0x3340   :  { %2849 = vrot.lane.b32.xlu0 %v2773_v18, %s6546_s0  ;;  %v2772_v22 = vsel %vm1256_vm9, %v2770_v5, %v2758_v6 }
0x3341   :  { %2775 = vrot.lane.b32.xlu1 %v2772_v22, %s6546_s0 }
0x33b2   :  { %v2850_v11 = vpop.permute.xlu0 %2849 }
0x33b3   :  { %v2776_v15 = vpop.permute.xlu1 %2775  ;;  %6056 = vmatpush3.msra.mxu1 %v2850_v11 }
0x33b4   :  { %6051 = vmatpush3.msra.mxu0 %v2776_v15  ;;  %6058 = vmatmul.mubr.msk.f32.vlgmr.msra.gmra.mrb[20].mxu1 %vm1263_vm10, %v6539_v1 }
0x33b5   :  { %6053 = vmatmul.mubr.msk.f32.vlgmr.msra.gmra.mrb[18].mxu0 %vm1263_vm10, %v6539_v1  ;;  %6245 = vmatprep.subr.bf16.mxu0 %v6244_v62 }
0x33b6   :  { %6247 = vmatpush3.bf16.msra.mxu0 %v6244_v62  ;;  %6067 = vmatprep.subr.mxu1 %v6542_v3 }
0x33b7   :  { %6072 = vmatprep.subr.mxu0 %v6542_v3  ;;  %6069 = vmatprep.mubr.msk.f32.mxu1 %vm6541_vm0, %v6542_v3 }
0x3487   :  { %v2918_v16 = vpop.f32.mrb[20].mxu1 }
0x3488   :  { %v2844_v17 = vpop.f32.mrb[18].mxu0  ;;  %v2923_v20 = vsel %vm1263_vm10, %v2850_v11, %v2918_v16  ;;  %v6059_v23 = vpop.f32.mrb[21].mxu1 }
0x3489   :  { %v2922_v24 = vsel %vm1263_vm10, %v2776_v15, %v2844_v17  ;;  %v6054_v25 = vpop.f32.mrb[19].mxu0  ;;  %v3671_v23 = vld [vmem:[%s7699_s1 + $0xb8] sm:$0xff] }
0x348a   :  { %6064 = vmatprep.mubr.msk.f32.mxu0 %vm64_vm2, %v2922_v24  ;;  %v3670_v24 = vld [vmem:[%s7699_s1 + $0x30] sm:$0xff] }
0x348b   :  { %6065 = vmatmul.mubr.msk.f32.vlgmr.msra.gmra.mrb[20].mxu0 %vm64_vm2, %v2923_v20 }
0x348c   :  { %6074 = vmatprep.mubr.msk.f32.mxu0 %vm6541_vm0, %v6542_v3 }
0x355e   :  { %v6066_v31 = vpop.f32.mrb[20].mxu0 }
0x355f   :  { %v3009_v33 = vadd.f32 %v6066_v31, %v5654_v26  ;;  %v3003_v34 = vpop.f32.mrb[21].mxu0 }
0x3560   :  { %v3004_v35 = vadd.f32 %v5654_v26, %v3003_v34 }
0x3561   :  { %3016 = vrot.lane.b32.xlu0 %v3009_v33, %s6549_s8 }
0x3562   :  { %3014 = vrot.lane.b32.xlu1 %v3004_v35, %s6549_s8 }
0x3565   :  { %3094 = vrot.lane.b32.xlu0 %v3009_v33, %s6550_s9 }
0x3566   :  { %3018 = vrot.lane.b32.xlu1 %v3004_v35, %s6550_s9 }
0x35d3   :  { %v7179_v36 = vpop.permute.xlu0 %3016 }
0x35d4   :  { %3246 = vrot.lane.b32.xlu0 %v7179_v36, %s6550_s9  ;;  %v7182_v37 = vpop.permute.xlu1 %3014 }
0x35d5   :  { %3170 = vrot.lane.b32.xlu1 %v7182_v37, %s6550_s9 }
0x35d7   :  { %v3095_v38 = vpop.permute.xlu0 %3094 }
0x35d8   :  { %6073 = vmatpush3.xpose.msk.msra.mxu0 %vm1263_vm10, %v3095_v38  ;;  %v3019_v27 = vpop.permute.xlu1 %3018  ;;  %v5673_v38 = vld [vmem:[%s7701_s2 + $0x7] ss:$0 sm:$0xff] }
0x35d9   :  { %6068 = vmatpush3.xpose.msk.msra.mxu1 %vm1263_vm10, %v3019_v27  ;;  %6082 = vmatprep.subr.mxu0 %v6542_v3 }
0x35da   :  { %6077 = vmatprep.subr.mxu1 %v6542_v3 }
0x35db   :  { %6075 = vmatmul.mubr.msk.f32.vlgmr.msra.gmra.mrb[22].mxu0 %vm1263_vm10, %v3009_v33 }
0x35dc   :  { %6070 = vmatmul.mubr.msk.f32.vlgmr.msra.gmra.mrb[22].mxu1 %vm1263_vm10, %v3004_v35  ;;  %6084 = vmatprep.mubr.msk.f32.mxu0 %vm6541_vm0, %v6542_v3 }
0x35dd   :  { %6079 = vmatprep.mubr.msk.f32.mxu1 %vm6541_vm0, %v6542_v3 }
0x3646   :  { %v3247_v42 = vpop.permute.xlu0 %3246 }
0x3647   :  { %6083 = vmatpush3.xpose.msk.msra.mxu0 %vm1263_vm10, %v3247_v42  ;;  %v3171_v9 = vpop.permute.xlu1 %3170 }
0x3648   :  { %6078 = vmatpush3.xpose.msk.msra.mxu1 %vm1263_vm10, %v3171_v9  ;;  %6092 = vmatprep.subr.mxu0 %v6542_v3 }
0x3649   :  { %6087 = vmatprep.subr.mxu1 %v6542_v3 }
0x364a   :  { %6085 = vmatmul.mubr.msk.f32.vlgmr.msra.gmra.mrb[24].mxu0 %vm1263_vm10, %v7179_v36 }
0x364b   :  { %6080 = vmatmul.mubr.msk.f32.vlgmr.msra.gmra.mrb[24].mxu1 %vm1263_vm10, %v7182_v37  ;;  %6094 = vmatprep.mubr.msk.f32.mxu0 %vm6541_vm0, %v6542_v3 }
0x364c   :  { %6089 = vmatprep.mubr.msk.f32.mxu1 %vm6541_vm0, %v6542_v3 }
0x36ae   :  { %v3166_v46 = vpop.f32.mrb[22].mxu0 }
0x36af   :  { %v3090_v47 = vpop.f32.mrb[22].mxu1  ;;  %v6076_v48 = vpop.f32.mrb[23].mxu0  ;;  %v3325_v49 = vsel %vm1263_vm10, %v3166_v46, -inf }
0x36b0   :  { %3326 = vmax.xlane.f32.xlu0 %v3325_v49  ;;  %v6071_v50 = vpop.f32.mrb[23].mxu1  ;;  %v3322_v51 = vsel %vm1263_vm10, %v3090_v47, -inf }
0x36b1   :  { %3323 = vmax.xlane.f32.xlu1 %v3322_v51 }
0x371d   :  { %v3318_v52 = vpop.f32.mrb[24].mxu0 }
0x371e   :  { %v3242_v29 = vpop.f32.mrb[24].mxu1  ;;  %v6086_v53 = vpop.f32.mrb[25].mxu0  ;;  %v3331_v28 = vsel %vm1263_vm10, %v3318_v52, -inf }
0x371f   :  { %3332 = vmax.xlane.f32.xlu1 %v3331_v28  ;;  %v6081_v56 = vpop.f32.mrb[25].mxu1  ;;  %v3328_v57 = vsel %vm1263_vm10, %v3242_v29, -inf }
0x3720   :  { %3329 = vmax.xlane.f32.xlu0 %v3328_v57 }
0x3730   :  { %3442 = vrot.lane.b32.xlu1 %v3009_v33, %s6547_s6 }
0x3736   :  { %3366 = vrot.lane.b32.xlu0 %v3004_v35, %s6547_s6 }
0x373d   :  { %v3327_v58 = vpop.xlane.xlu0 %3326 }
0x373e   :  { %v3335_v61 = vsub.f32 %v3166_v46, %v3327_v58  ;;  %v3324_v59 = vpop.xlane.xlu1 %3323 }
0x373f   :  { %v3334_v44 = vsub.f32 %v3090_v47, %v3324_v59 }
0x3740   :  { %v3340_v60 = vmul.f32 1.442695, %v3335_v61  ;;  %v3884_v61 = vld [vmem:[%s7699_s1 + $0xa8] sm:$0xf0] }
0x3741   :  { %v3338_v43 = vmul.f32 1.442695, %v3334_v44 }
0x3742   :  { %6479 = vpow2.f32 %v3340_v60 }
0x3743   :  { %6481 = vpow2.f32 %v3338_v43 }
0x374c   :  { %v6480_v39 = vpop.eup %6479 }
0x374d   :  { %v6482_v30 = vpop.eup %6481  ;;  %v3349_v41 = vsel %vm1263_vm10, %v6480_v39, 0.0 }
0x374e   :  { %v3346_v32 = vsel %vm1263_vm10, %v6482_v30, 0.0 }
0x3754   :  { %3350 = vadd.xlane.f32.xlu1 %v3349_v41 }
0x3755   :  { %3347 = vadd.xlane.f32.xlu0 %v3346_v32 }
0x37ac   :  { %v3333_v63 = vpop.xlane.xlu1 %3332 }
0x37ad   :  { %v3337_v19 = vsub.f32 %v3318_v52, %v3333_v63  ;;  %v3330_v21 = vpop.xlane.xlu0 %3329  ;;  %v5674_v63 = vld [vmem:[%s7701_s2 + $0x8] ss:$0 sm:$0xff] }
0x37ae   :  { %v3336_v12 = vsub.f32 %v3242_v29, %v3330_v21 }
0x37af   :  { %v3344_v4 = vmul.f32 1.442695, %v3337_v19 }
0x37b0   :  { %v3342_v7 = vmul.f32 1.442695, %v3336_v12  ;;  %v3443_v2 = vpop.permute.xlu1 %3442  ;;  %v5675_v12 = vld [vmem:[%s7701_s2 + $0x9] ss:$0 sm:$0xff] }
0x37b1   :  { %6483 = vpow2.f32 %v3344_v4  ;;  %6093 = vmatpush3.msra.mxu0 %v3443_v2  ;;  %v3367_v55 = vpop.permute.xlu0 %3366 }
0x37b2   :  { %6485 = vpow2.f32 %v3342_v7  ;;  %6088 = vmatpush3.msra.mxu1 %v3367_v55  ;;  %6102 = vmatprep.subr.mxu0 %v6542_v3  ;;  %v3882_v55 = vld [vmem:[%s7699_s1 + $0xa8] sm:$0xf] }
0x37b3   :  { %6097 = vmatprep.subr.mxu1 %v6542_v3 }
0x37bb   :  { %v6484_v14 = vpop.eup %6483 }
0x37bc   :  { %v6486_v54 = vpop.eup %6485  ;;  %v3355_v40 = vsel %vm1263_vm10, %v6484_v14, 0.0 }
0x37bd   :  { %3356 = vadd.xlane.f32.xlu1 %v3355_v40  ;;  %v3352_v45 = vsel %vm1263_vm10, %v6486_v54, 0.0 }
0x37be   :  { %3353 = vadd.xlane.f32.xlu0 %v3352_v45 }
0x37ce   :  { %3518 = vrot.lane.b32.xlu1 %v7182_v37, %s6547_s6 }
0x37d4   :  { %3594 = vrot.lane.b32.xlu0 %v7179_v36, %s6547_s6 }
0x37e1   :  { %v3351_v10 = vpop.xlane.xlu1 %3350 }
0x37e2   :  { %6487 = vrcp.f32 %v3351_v10  ;;  %v3348_v6 = vpop.xlane.xlu0 %3347 }
0x37e3   :  { %6489 = vrcp.f32 %v3348_v6 }
0x37ec   :  { %v6488_v5 = vpop.eup %6487 }
0x37ed   :  { %v6490_v18 = vpop.eup %6489  ;;  %v3363_v22 = vmul.f32 %v6488_v5, %v6480_v39 }
0x37ee   :  { %v3362_v8 = vmul.f32 %v6490_v18, %v6482_v30 }
0x37ef   :  { %6095 = vmatmul.mubr.msk.f32.vlgmr.msra.gmra.mrb[26].mxu0 %vm1263_vm10, %v3363_v22 }
0x37f0   :  { %6090 = vmatmul.mubr.msk.f32.vlgmr.msra.gmra.mrb[26].mxu1 %vm1263_vm10, %v3362_v8  ;;  %6104 = vmatprep.mubr.msk.f32.mxu0 %vm6541_vm0, %v6542_v3 }
0x37f1   :  { %6099 = vmatprep.mubr.msk.f32.mxu1 %vm6541_vm0, %v6542_v3 }
0x384a   :  { %v3357_v13 = vpop.xlane.xlu1 %3356 }
0x384b   :  { %6491 = vrcp.f32 %v3357_v13  ;;  %v3354_v62 = vpop.xlane.xlu0 %3353 }
0x384c   :  { %6493 = vrcp.f32 %v3354_v62 }
0x384e   :  { %v3519_v11 = vpop.permute.xlu1 %3518 }
0x384f   :  { %6098 = vmatpush3.msra.mxu1 %v3519_v11  ;;  %v3595_v15 = vpop.permute.xlu0 %3594 }
0x3850   :  { %6103 = vmatpush3.msra.mxu0 %v3595_v15  ;;  %6107 = vmatprep.subr.mxu1 %v3671_v23 }
0x3851   :  { %6117 = vmatprep.subr.mxu0 %v6542_v3 }
0x3855   :  { %v6492_v1 = vpop.eup %6491 }
0x3856   :  { %v6494_v16 = vpop.eup %6493  ;;  %v3365_v17 = vmul.f32 %v6492_v1, %v6484_v14 }
0x3857   :  { %v3364_v20 = vmul.f32 %v6494_v16, %v6486_v54  ;;  %v4052_v54 = vld [vmem:[%s7699_s1 + $0xc0] sm:$0xff] }
0x3858   :  { %6105 = vmatmul.mubr.msk.f32.vlgmr.msra.gmra.mrb[28].mxu0 %vm1263_vm10, %v3365_v17 }
0x3859   :  { %6100 = vmatmul.mubr.msk.f32.vlgmr.msra.gmra.mrb[28].mxu1 %vm1263_vm10, %v3364_v20  ;;  %6119 = vmatprep.mubr.msk.f32.mxu0 %vm6541_vm0, %v6542_v3 }
0x385a   :  { %6108 = vmatpush3.msra.mxu1 %v3671_v23 }
0x385b   :  { %6112 = vmatprep.subr.mxu1 %v3670_v24 }
0x38c2   :  { %v3514_v25 = vpop.f32.mrb[26].mxu0 }
0x38c3   :  { %v3438_v26 = vpop.f32.mrb[26].mxu1  ;;  %v6096_v31 = vpop.f32.mrb[27].mxu0 }
0x38c4   :  { %v6091_v33 = vpop.f32.mrb[27].mxu1 }
0x392b   :  { %v3666_v34 = vpop.f32.mrb[28].mxu0 }
0x392c   :  { %v3590_v35 = vpop.f32.mrb[28].mxu1  ;;  %v6106_v36 = vpop.f32.mrb[29].mxu0 }
0x392d   :  { %v6101_v37 = vpop.f32.mrb[29].mxu1  ;;  %6109 = vmatprep.mubr.msk.f32.mxu1 %vm1263_vm10, %v3590_v35 }
0x392e   :  { %6110 = vmatmul.mubr.msk.f32.vlgmr.msra.gmra.mrb[30].mxu1 %vm1263_vm10, %v3666_v34  ;;  %v3883_v34 = vld [vmem:[%s7699_s1 + $0x38] sm:$0xff] }
0x392f   :  { %6114 = vmatprep.mubr.msk.f32.mxu1 %vm1263_vm10, %v3438_v26  ;;  %6113 = vmatpush3.msra.mxu1 %v3670_v24 }
0x3930   :  { %6127 = vmatprep.subr.mxu1 %v6542_v3 }
0x3936   :  { %6115 = vmatmul.mubr.msk.f32.vlgmr.msra.gmra.mrb[30].mxu1 %vm1263_vm10, %v3514_v25 }
0x3937   :  { %6129 = vmatprep.mubr.msk.f32.mxu1 %vm6541_vm0, %v6542_v3 }
0x3a09   :  { %v6116_v27 = vpop.f32.mrb[30].mxu1 }
0x3a0a   :  { %v7250_v42 = vadd.f32 %v6116_v27, %v5673_v38  ;;  %v3825_v9 = vpop.f32.mrb[31].mxu1 }
0x3a0b   :  { %v7252_v46 = vadd.f32 %v5673_v38, %v3825_v9 }
0x3a0c   :  { %v3846_v47 = vsel %vm64_vm2, %v7250_v42, 0.0 }
0x3a0d   :  { %3847 = vadd.xlane.f32.xlu0 %v3846_v47  ;;  %v3843_v48 = vsel %vm64_vm2, %v7252_v46, 0.0  ;;  %v5682_v47 = vld [vmem:[%s7701_s2 + $0xa] ss:$0 sm:$0xff] }
0x3a0e   :  { %3844 = vadd.xlane.f32.xlu1 %v3843_v48 }
0x3a9a   :  { %v3848_v49 = vpop.xlane.xlu0 %3847 }
0x3a9b   :  { %v3851_v50 = vmul.f32 0.0625, %v3848_v49  ;;  %v3845_v51 = vpop.xlane.xlu1 %3844 }
0x3a9c   :  { %v3850_v52 = vmul.f32 0.0625, %v3845_v51 }
0x3a9d   :  { %v3853_v29 = vsub.f32 %v7250_v42, %v3851_v50 }
0x3a9e   :  { %v3852_v53 = vsub.f32 %v7252_v46, %v3850_v52 }
0x3a9f   :  { %v3855_v28 = vmul.f32 %v3853_v29, %v3853_v29 }
0x3aa0   :  { %v3854_v56 = vmul.f32 %v3852_v53, %v3852_v53 }
0x3aa1   :  { %v3859_v57 = vsel %vm64_vm2, %v3855_v28, 0.0 }
0x3aa2   :  { %3860 = vadd.xlane.f32.xlu1 %v3859_v57  ;;  %v3856_v58 = vsel %vm64_vm2, %v3854_v56, 0.0 }
0x3aa3   :  { %3857 = vadd.xlane.f32.xlu0 %v3856_v58 }
0x3ab3   :  { %4055 = vperm.xlu1 %6350, %v4052_v54   ;;  %v5683_v54 = vld [vmem:[%s7701_s2 + $0xb] ss:$0 sm:$0xff] }
0x3ab9   :  { %3887 = vperm.xlu0 %6346, %v3884_v61  }
0x3b2f   :  { %v3861_v59 = vpop.xlane.xlu1 %3860 }
0x3b30   :  { %v3863_v44 = vmul.f32 0.0625, %v3861_v59  ;;  %v3858_v60 = vpop.xlane.xlu0 %3857 }
0x3b31   :  { %v3862_v43 = vmul.f32 0.0625, %v3858_v60 }
0x3b32   :  { %v3865_v39 = vadd.f32 1e-05, %v3863_v44 }
0x3b33   :  { %v3864_v30 = vadd.f32 1e-05, %v3862_v43  ;;  %v4056_v27 = vpop.permute.xlu1 %4055 }
0x3b34   :  { %6495 = vrsqrt.f32 %v3865_v39 }
0x3b35   :  { %6497 = vrsqrt.f32 %v3864_v30 }
0x3b38   :  { %v3888_v40 = vpop.permute.xlu0 %3887 }
0x3b39   :  { %v3889_v45 = vrot.slane %v3888_v40, 4 }
0x3b3e   :  { %v6496_v41 = vpop.eup %6495 }
0x3b3f   :  { %v6498_v32 = vpop.eup %6497  ;;  %v3869_v19 = vmul.f32 %v6496_v41, %v3853_v29 }
0x3b40   :  { %v3868_v21 = vmul.f32 %v6498_v32, %v3852_v53  ;;  %v4257_v32 = vld [vmem:[%s7699_s1 + $0x40] sm:$0xff] }
0x3b41   :  { %v3875_v7 = vmul.f32 %v5674_v63, %v3869_v19 }
0x3b42   :  { %v3874_v4 = vmul.f32 %v5674_v63, %v3868_v21  ;;  %v4258_v63 = vld [vmem:[%s7699_s1 + $0xc8] sm:$0xff] }
0x3b43   :  { %v3881_v14 = vadd.f32 %v5675_v12, %v3875_v7  ;;  %v6248_v19 = vpack.c.bf16 %v4258_v63, %v4257_v32 }
0x3b44   :  { %v3880_v2 = vadd.f32 %v5675_v12, %v3874_v4 }
0x3b46   :  { %6118 = vmatpush3.msra.mxu0 %v3880_v2 }
0x3b47   :  { %6120 = vmatmul.mubr.msk.f32.vlgmr.msra.gmra.mrb[30].mxu0 %vm1263_vm10, %v3882_v55  ;;  %6122 = vmatprep.subr.mxu0 %v6542_v3 }
0x3b48   :  { %6123 = vmatpush3.msra.mxu0 %v3881_v14  ;;  %6124 = vmatprep.mubr.msk.f32.mxu0 %vm6541_vm0, %v6542_v3 }
0x3b49   :  { %6132 = vmatprep.subr.mxu0 %v6542_v3 }
0x3b4b   :  { %6125 = vmatmul.mubr.msk.f32.vlgmr.msra.gmra.mrb[32].mxu0 %vm1263_vm10, %v3882_v55 }
0x3b4c   :  { %6134 = vmatprep.mubr.msk.f32.mxu0 %vm6541_vm0, %v6542_v3 }
0x3c1a   :  { %v3960_v10 = vpop.f32.mrb[30].mxu0 }
0x3c1b   :  { %v3961_v6 = vadd.f32 %v3960_v10, %v3889_v45  ;;  %v6121_v5 = vpop.f32.mrb[31].mxu0 }
0x3c1d   :  { %v4036_v18 = vmul.f32 0.044715, %v3961_v6  ;;  %v4034_v26 = vmul.f32 0.5, %v3961_v6 }
0x3c1e   :  { %v4030_v22 = vpop.f32.mrb[32].mxu0 }
0x3c1f   :  { %v4038_v8 = vmul.f32 %v4036_v18, %v3961_v6  ;;  %v4031_v13 = vadd.f32 %v4030_v22, %v3889_v45  ;;  %v6126_v62 = vpop.f32.mrb[33].mxu0  ;;  %v5684_v45 = vld [vmem:[%s7701_s2 + $0xc] ss:$0 sm:$0xff] }
0x3c20   :  { %v5685_v62 = vld [vmem:[%s7701_s2 + $0xe] ss:$0 sm:$0xff] }
0x3c21   :  { %v4040_v11 = vmul.f32 %v4038_v8, %v3961_v6  ;;  %v4037_v15 = vmul.f32 0.044715, %v4031_v13  ;;  %v4035_v36 = vmul.f32 0.5, %v4031_v13 }
0x3c23   :  { %v4042_v1 = vadd.f32 %v4040_v11, %v3961_v6  ;;  %v4039_v16 = vmul.f32 %v4037_v15, %v4031_v13 }
0x3c25   :  { %v4044_v17 = vmul.f32 0.7978846, %v4042_v1  ;;  %v4041_v20 = vmul.f32 %v4039_v16, %v4031_v13 }
0x3c27   :  { %6499 = vtanh.f32 %v4044_v17  ;;  %v4043_v23 = vadd.f32 %v4041_v20, %v4031_v13  ;;  %v4363_v13 = vld [vmem:[%s7699_s1 + $0x48] sm:$0xf] }
0x3c29   :  { %v4045_v24 = vmul.f32 0.7978846, %v4043_v23 }
0x3c2b   :  { %6501 = vtanh.f32 %v4045_v24 }
0x3c31   :  { %v6500_v25 = vpop.eup %6499 }
0x3c32   :  { %v4048_v31 = vadd.f32 1.0, %v6500_v25 }
0x3c34   :  { %v4050_v33 = vmul.f32 %v4048_v31, %v4034_v26 }
0x3c35   :  { %v6502_v35 = vpop.eup %6501 }
0x3c36   :  { %6128 = vmatpush3.msk.msra.mxu1 %vm1247_vm6, %v4050_v33  ;;  %v4049_v37 = vadd.f32 1.0, %v6502_v35 }
0x3c37   :  { %6130 = vmatmul.mubr.msk.f32.vlgmr.msra.gmra.mrb[32].mxu1 %vm4058_vm11, %v3883_v34  ;;  %6249 = vmatprep.subr.bf16.mxu1 %v6248_v19 }
0x3c38   :  { %v4051_v38 = vmul.f32 %v4049_v37, %v4035_v36  ;;  %6251 = vmatpush3.bf16.msra.mxu1 %v6248_v19 }
0x3c39   :  { %6149 = vmatprep.subr.mxu1 %v6542_v3 }
0x3c3a   :  { %6133 = vmatpush3.msk.msra.mxu0 %vm1247_vm6, %v4051_v38 }
0x3c3b   :  { %6135 = vmatmul.mubr.msk.f32.vlgmr.msra.gmra.mrb[34].mxu0 %vm4058_vm11, %v3883_v34  ;;  %6144 = vmatprep.subr.msk.mxu0 %vm1247_vm6, %v4363_v13 }
0x3c3c   :  { %6145 = vmatpush3.msk.msra.mxu0 %vm1247_vm6, %v4363_v13 }
0x3c3d   :  { %6154 = vmatprep.subr.mxu0 %v6542_v3 }
0x3d0a   :  { %v4131_v9 = vpop.f32.mrb[32].mxu1 }
0x3d0b   :  { %v4132_v48 = vadd.f32 %v4131_v9, %v4056_v27  ;;  %v6131_v49 = vpop.f32.mrb[33].mxu1 }
0x3d0d   :  { %v4213_v50 = vmul.f32 %v5682_v47, %v4132_v48 }
0x3d0e   :  { %v4204_v51 = vpop.f32.mrb[34].mxu0 }
0x3d0f   :  { %v4205_v52 = vadd.f32 %v4204_v51, %v4056_v27  ;;  %v6136_v29 = vpop.f32.mrb[35].mxu0  ;;  %v7296_v53 = vadd.f32 %v4213_v50, %v7252_v46  ;;  %v5688_v50 = vld [vmem:[%s7701_s2 + $0xf] ss:$0 sm:$0xff] }
0x3d11   :  { %v4214_v28 = vmul.f32 %v5682_v47, %v4205_v52  ;;  %v4219_v56 = vsel %vm64_vm2, %v7296_v53, 0.0  ;;  %v5692_v52 = vld [vmem:[%s7701_s2 + $0xd] ss:$0 sm:$0xff] }
0x3d12   :  { %4220 = vadd.xlane.f32.xlu1 %v4219_v56 }
0x3d13   :  { %v7301_v57 = vadd.f32 %v4214_v28, %v7250_v42 }
0x3d15   :  { %v4222_v58 = vsel %vm64_vm2, %v7301_v57, 0.0 }
0x3d16   :  { %4223 = vadd.xlane.f32.xlu0 %v4222_v58 }
0x3d9f   :  { %v4221_v61 = vpop.xlane.xlu1 %4220 }
0x3da0   :  { %v4225_v59 = vmul.f32 0.0625, %v4221_v61 }
0x3da2   :  { %v4227_v44 = vsub.f32 %v7296_v53, %v4225_v59 }
0x3da3   :  { %v4224_v60 = vpop.xlane.xlu0 %4223 }
0x3da4   :  { %v4226_v43 = vmul.f32 0.0625, %v4224_v60  ;;  %v4229_v46 = vmul.f32 %v4227_v44, %v4227_v44 }
0x3da6   :  { %v4228_v39 = vsub.f32 %v7301_v57, %v4226_v43  ;;  %v4231_v30 = vsel %vm64_vm2, %v4229_v46, 0.0 }
0x3da7   :  { %4232 = vadd.xlane.f32.xlu0 %v4231_v30 }
0x3da8   :  { %v4230_v41 = vmul.f32 %v4228_v39, %v4228_v39 }
0x3daa   :  { %v4234_v42 = vsel %vm64_vm2, %v4230_v41, 0.0 }
0x3dab   :  { %4235 = vadd.xlane.f32.xlu1 %v4234_v42 }
0x3e34   :  { %v4233_v21 = vpop.xlane.xlu0 %4232 }
0x3e35   :  { %v4237_v12 = vmul.f32 0.0625, %v4233_v21  ;;  %v4672_v21 = vld [vmem:[%s7699_s1 + $0x50] sm:$0xf0] }
0x3e37   :  { %v4239_v4 = vadd.f32 1e-05, %v4237_v12  ;;  %v4673_v12 = vld [vmem:[%s7699_s1 + $0xd8] sm:$0xf] }
0x3e38   :  { %v4236_v7 = vpop.xlane.xlu1 %4235 }
0x3e39   :  { %6503 = vrsqrt.f32 %v4239_v4  ;;  %v4238_v2 = vmul.f32 0.0625, %v4236_v7  ;;  %v4504_v4 = vld [vmem:[%s7699_s1 + $0x50] sm:$0xf] }
0x3e3b   :  { %v4240_v55 = vadd.f32 1e-05, %v4238_v2 }
0x3e3d   :  { %6505 = vrsqrt.f32 %v4240_v55 }
0x3e43   :  { %v6504_v14 = vpop.eup %6503 }
0x3e44   :  { %v4243_v40 = vmul.f32 %v6504_v14, %v4227_v44 }
0x3e46   :  { %v4249_v10 = vmul.f32 %v5683_v54, %v4243_v40 }
0x3e47   :  { %v6506_v6 = vpop.eup %6505 }
0x3e48   :  { %v4244_v5 = vmul.f32 %v6506_v6, %v4228_v39  ;;  %v4255_v18 = vadd.f32 %v5684_v45, %v4249_v10  ;;  %v5693_v10 = vld [vmem:[%s7701_s2 + $0x10] ss:$0 sm:$0xff] }
0x3e4a   :  { %v4250_v22 = vmul.f32 %v5683_v54, %v4244_v5  ;;  %6141 = vmatprep.mubr.msk.f32.mxu1 %vm64_vm2, %v4255_v18  ;;  %v4502_v18 = vld [vmem:[%s7699_s1 + $0x48] sm:$0xf0] }
0x3e4c   :  { %v4256_v8 = vadd.f32 %v5684_v45, %v4250_v22  ;;  %v5694_v22 = vld [vmem:[%s7701_s2 + $0x11] ss:$0 sm:$0xff] }
0x3e4e   :  { %6142 = vmatmul.mubr.msk.f32.vlgmr.msra.gmra.mrb[34].mxu1 %vm64_vm2, %v4256_v8 }
0x3e4f   :  { %6151 = vmatprep.mubr.msk.f32.mxu1 %vm6541_vm0, %v6542_v3 }
0x3f21   :  { %v6143_v11 = vpop.f32.mrb[34].mxu1 }
0x3f22   :  { %v4342_v15 = vadd.f32 %v6143_v11, %v5685_v62  ;;  %v4336_v1 = vpop.f32.mrb[35].mxu1  ;;  %v4511_v11 = vrot.slane %v4502_v18, 4  ;;  %v4884_v18 = vld [vmem:[%s7699_s1 + $0x58] sm:$0xff] }
0x3f23   :  { %v4337_v16 = vadd.f32 %v5685_v62, %v4336_v1 }
0x3f24   :  { %v4348_v17 = vmul.f32 0.044715, %v4342_v15  ;;  %v4346_v47 = vmul.f32 0.5, %v4342_v15 }
0x3f25   :  { %v4347_v20 = vmul.f32 0.044715, %v4337_v16  ;;  %v4345_v27 = vmul.f32 0.5, %v4337_v16 }
0x3f26   :  { %v4350_v23 = vmul.f32 %v4348_v17, %v4342_v15 }
0x3f27   :  { %v4349_v24 = vmul.f32 %v4347_v20, %v4337_v16 }
0x3f28   :  { %v4352_v25 = vmul.f32 %v4350_v23, %v4342_v15 }
0x3f29   :  { %v4351_v26 = vmul.f32 %v4349_v24, %v4337_v16 }
0x3f2a   :  { %v4354_v31 = vadd.f32 %v4352_v25, %v4342_v15 }
0x3f2b   :  { %v4353_v33 = vadd.f32 %v4351_v26, %v4337_v16 }
0x3f2c   :  { %v4356_v34 = vmul.f32 0.7978846, %v4354_v31 }
0x3f2d   :  { %v4355_v35 = vmul.f32 0.7978846, %v4353_v33 }
0x3f2e   :  { %6507 = vtanh.f32 %v4356_v34 }
0x3f2f   :  { %6509 = vtanh.f32 %v4355_v35 }
0x3f38   :  { %v6508_v36 = vpop.eup %6507 }
0x3f39   :  { %v6510_v37 = vpop.eup %6509  ;;  %v4360_v38 = vadd.f32 1.0, %v6508_v36 }
0x3f3a   :  { %v4359_v9 = vadd.f32 1.0, %v6510_v37 }
0x3f3b   :  { %v4362_v49 = vmul.f32 %v4360_v38, %v4346_v47 }
0x3f3c   :  { %v4361_v48 = vmul.f32 %v4359_v9, %v4345_v27 }
0x3f3e   :  { %6146 = vmatprep.mubr.msk.f32.mxu0 %vm4058_vm11, %v4361_v48 }
0x3f3f   :  { %6147 = vmatmul.mubr.msk.f32.vlgmr.msra.gmra.mrb[36].mxu0 %vm4058_vm11, %v4362_v49 }
0x3f40   :  { %6156 = vmatprep.mubr.msk.f32.mxu0 %vm6541_vm0, %v6542_v3 }
0x4012   :  { %v6148_v51 = vpop.f32.mrb[36].mxu0 }
0x4013   :  { %v4450_v29 = vadd.f32 %v6148_v51, %v5688_v50  ;;  %v4444_v28 = vpop.f32.mrb[37].mxu0 }
0x4014   :  { %v4445_v56 = vadd.f32 %v5688_v50, %v4444_v28 }
0x4015   :  { %v4459_v58 = vmul.f32 %v5692_v52, %v4450_v29 }
0x4016   :  { %v4458_v61 = vmul.f32 %v5692_v52, %v4445_v56  ;;  %v4503_v56 = vld [vmem:[%s7699_s1 + $0xd0] sm:$0xff] }
0x4017   :  { %v7346_v59 = vadd.f32 %v4459_v58, %v7301_v57 }
0x4018   :  { %v7349_v44 = vadd.f32 %v4458_v61, %v7296_v53 }
0x4019   :  { %v4467_v60 = vsel %vm64_vm2, %v7346_v59, 0.0 }
0x401a   :  { %4468 = vadd.xlane.f32.xlu1 %v4467_v60  ;;  %v4464_v43 = vsel %vm64_vm2, %v7349_v44, 0.0 }
0x401b   :  { %4465 = vadd.xlane.f32.xlu0 %v4464_v43 }
0x40a7   :  { %v4469_v46 = vpop.xlane.xlu1 %4468 }
0x40a8   :  { %v4471_v39 = vmul.f32 0.0625, %v4469_v46  ;;  %v4466_v30 = vpop.xlane.xlu0 %4465 }
0x40a9   :  { %v4470_v41 = vmul.f32 0.0625, %v4466_v30 }
0x40aa   :  { %v4473_v42 = vsub.f32 %v7346_v59, %v4471_v39 }
0x40ab   :  { %v4472_v57 = vsub.f32 %v7349_v44, %v4470_v41  ;;  %v5701_v41 = vld [vmem:[%s7701_s2 + $0x12] ss:$0 sm:$0xff] }
0x40ac   :  { %v4475_v32 = vmul.f32 %v4473_v42, %v4473_v42 }
0x40ad   :  { %v4474_v63 = vmul.f32 %v4472_v57, %v4472_v57 }
0x40ae   :  { %v4479_v53 = vsel %vm64_vm2, %v4475_v32, 0.0 }
0x40af   :  { %4480 = vadd.xlane.f32.xlu1 %v4479_v53  ;;  %v4476_v19 = vsel %vm64_vm2, %v4474_v63, 0.0 }
0x40b0   :  { %4477 = vadd.xlane.f32.xlu0 %v4476_v19 }
0x40c0   :  { %4676 = vperm.xlu1 %6350, %v4672_v21  }
0x40c4   :  { %4680 = vperm.xlu1 %6350, %v4673_v12  }
0x40c6   :  { %4507 = vperm.xlu0 %6346, %v4504_v4  }
0x413c   :  { %v4481_v7 = vpop.xlane.xlu1 %4480 }
0x413d   :  { %v4483_v2 = vmul.f32 0.0625, %v4481_v7  ;;  %v4478_v55 = vpop.xlane.xlu0 %4477 }
0x413e   :  { %v4482_v14 = vmul.f32 0.0625, %v4478_v55 }
0x413f   :  { %v4485_v54 = vadd.f32 1e-05, %v4483_v2 }
0x4140   :  { %v4484_v40 = vadd.f32 1e-05, %v4482_v14  ;;  %v4677_v61 = vpop.permute.xlu1 %4676 }
0x4141   :  { %6511 = vrsqrt.f32 %v4485_v54  ;;  %v4682_v46 = vrot.slane %v4677_v61, 4 }
0x4142   :  { %6513 = vrsqrt.f32 %v4484_v40 }
0x4144   :  { %v4681_v60 = vpop.permute.xlu1 %4680 }
0x4145   :  { %v4508_v16 = vpop.permute.xlu0 %4507  ;;  %v4683_v43 = vrot.slane %v4681_v60, 4 }
0x4147   :  { %v4684_v39 = vsel %vm1247_vm6, %v4682_v46, %v4683_v43 }
0x414b   :  { %v6512_v45 = vpop.eup %6511 }
0x414c   :  { %v6514_v6 = vpop.eup %6513  ;;  %v4489_v5 = vmul.f32 %v6512_v45, %v4473_v42 }
0x414d   :  { %v4488_v8 = vmul.f32 %v6514_v6, %v4472_v57 }
0x414e   :  { %v4495_v13 = vmul.f32 %v5693_v10, %v4489_v5 }
0x414f   :  { %v4494_v62 = vmul.f32 %v5693_v10, %v4488_v8 }
0x4150   :  { %v4501_v15 = vadd.f32 %v5694_v22, %v4495_v13 }
0x4151   :  { %v4500_v1 = vadd.f32 %v5694_v22, %v4494_v62  ;;  %v4885_v22 = vld [vmem:[%s7699_s1 + $0xe0] sm:$0xff] }
0x4152   :  { %6155 = vmatpush3.msra.mxu0 %v4501_v15  ;;  %v6252_v8 = vpack.c.bf16 %v4885_v22, %v4884_v18  ;;  %v5711_v22 = vld [vmem:[%s7701_s2 + $0x15] ss:$0 sm:$0xff] }
0x4153   :  { %6150 = vmatpush3.msra.mxu1 %v4500_v1  ;;  %6157 = vmatmul.mubr.msk.f32.vlgmr.msra.gmra.mrb[38].mxu0 %vm1263_vm10, %v4511_v11 }
0x4154   :  { %6152 = vmatmul.mubr.msk.f32.vlgmr.msra.gmra.mrb[36].mxu1 %vm1263_vm10, %v4511_v11  ;;  %6164 = vmatprep.subr.mxu0 %v6542_v3 }
0x4155   :  { %6159 = vmatprep.subr.mxu1 %v6542_v3  ;;  %6166 = vmatprep.mubr.msk.f32.mxu0 %vm6541_vm0, %v6542_v3 }
0x4156   :  { %6161 = vmatprep.mubr.msk.f32.mxu1 %vm6541_vm0, %v6542_v3 }
0x4226   :  { %v4650_v17 = vpop.f32.mrb[38].mxu0 }
0x4227   :  { %v4651_v20 = vadd.f32 %v4650_v17, %v4508_v16  ;;  %v4580_v23 = vpop.f32.mrb[36].mxu1  ;;  %v6158_v24 = vpop.f32.mrb[39].mxu0 }
0x4228   :  { %v4581_v25 = vadd.f32 %v4580_v23, %v4508_v16  ;;  %v6153_v26 = vpop.f32.mrb[37].mxu1  ;;  %v5703_v24 = vld [vmem:[%s7701_s2 + $0x14] ss:$0 sm:$0xff] }
0x4229   :  { %v4657_v31 = vmul.f32 0.044715, %v4651_v20  ;;  %v4655_v50 = vmul.f32 0.5, %v4651_v20 }
0x422a   :  { %v4656_v33 = vmul.f32 0.044715, %v4581_v25  ;;  %v4654_v52 = vmul.f32 0.5, %v4581_v25 }
0x422b   :  { %v4659_v34 = vmul.f32 %v4657_v31, %v4651_v20 }
0x422c   :  { %v4658_v35 = vmul.f32 %v4656_v33, %v4581_v25 }
0x422d   :  { %v4661_v36 = vmul.f32 %v4659_v34, %v4651_v20 }
0x422e   :  { %v4660_v37 = vmul.f32 %v4658_v35, %v4581_v25 }
0x422f   :  { %v4663_v38 = vadd.f32 %v4661_v36, %v4651_v20  ;;  %v5702_v20 = vld [vmem:[%s7701_s2 + $0x13] ss:$0 sm:$0xff]  ;;  %v4990_v36 = vld [vmem:[%s7699_s1 + $0xd8] sm:$0xf0] }
0x4230   :  { %v4662_v27 = vadd.f32 %v4660_v37, %v4581_v25  ;;  %v4997_v37 = vrot.slane %v4990_v36, 4 }
0x4231   :  { %v4665_v9 = vmul.f32 0.7978846, %v4663_v38  ;;  %v5704_v38 = vld [vmem:[%s7701_s2 + $0x16] ss:$0 sm:$0xff] }
0x4232   :  { %v4664_v47 = vmul.f32 0.7978846, %v4662_v27 }
0x4233   :  { %6515 = vtanh.f32 %v4665_v9 }
0x4234   :  { %6517 = vtanh.f32 %v4664_v47 }
0x423d   :  { %v6516_v48 = vpop.eup %6515 }
0x423e   :  { %v6518_v49 = vpop.eup %6517  ;;  %v4669_v51 = vadd.f32 1.0, %v6516_v48 }
0x423f   :  { %v4668_v29 = vadd.f32 1.0, %v6518_v49 }
0x4240   :  { %v4671_v28 = vmul.f32 %v4669_v51, %v4655_v50 }
0x4241   :  { %v4670_v58 = vmul.f32 %v4668_v29, %v4654_v52 }
0x4242   :  { %6165 = vmatpush3.msk.msra.mxu0 %vm1247_vm6, %v4671_v28 }
0x4243   :  { %6160 = vmatpush3.msk.msra.mxu1 %vm1247_vm6, %v4670_v58  ;;  %6167 = vmatmul.mubr.msk.f32.vlgmr.msra.gmra.mrb[40].mxu0 %vm4058_vm11, %v4503_v56 }
0x4244   :  { %6162 = vmatmul.mubr.msk.f32.vlgmr.msra.gmra.mrb[38].mxu1 %vm4058_vm11, %v4503_v56  ;;  %6253 = vmatprep.subr.bf16.mxu1 %v6252_v8 }
0x4245   :  { %6255 = vmatpush3.bf16.msra.mxu1 %v6252_v8  ;;  %6176 = vmatprep.subr.msk.mxu0 %vm1247_vm6, %v4997_v37 }
0x4246   :  { %6177 = vmatpush3.msk.msra.mxu0 %vm1247_vm6, %v4997_v37 }
0x4316   :  { %v4831_v30 = vpop.f32.mrb[40].mxu0 }
0x4317   :  { %v4832_v42 = vadd.f32 %v4831_v30, %v4684_v39  ;;  %v4758_v57 = vpop.f32.mrb[38].mxu1  ;;  %v6168_v32 = vpop.f32.mrb[41].mxu0 }
0x4318   :  { %v4759_v63 = vadd.f32 %v4758_v57, %v4684_v39  ;;  %v6163_v53 = vpop.f32.mrb[39].mxu1 }
0x4319   :  { %v4841_v19 = vmul.f32 %v5701_v41, %v4832_v42  ;;  %v5113_v53 = vld [vmem:[%s7699_s1 + $0xf0] sm:$0xff] }
0x431a   :  { %v4840_v21 = vmul.f32 %v5701_v41, %v4759_v63  ;;  %v5108_v63 = vld [vmem:[%s7699_s1 + $0x68] sm:$0xff] }
0x431b   :  { %v7397_v12 = vadd.f32 %v4841_v19, %v7346_v59  ;;  %v5110_v19 = vld [vmem:[%s7699_s1 + $0x78] sm:$0xff] }
0x431c   :  { %v7400_v4 = vadd.f32 %v4840_v21, %v7349_v44  ;;  %v6256_v21 = vpack.c.bf16 %v5113_v53, %v5108_v63  ;;  %v5442_v63 = vld [vmem:[%s7702_s3 + $0x118] sm:$0xff] }
0x431d   :  { %v4849_v7 = vsel %vm64_vm2, %v7397_v12, 0.0 }
0x431e   :  { %4850 = vadd.xlane.f32.xlu1 %v4849_v7  ;;  %v4846_v2 = vsel %vm64_vm2, %v7400_v4, 0.0  ;;  %v5115_v7 = vld [vmem:[%s7699_s1 + $0x100] sm:$0xff]  ;;  %6257 = vmatprep.subr.bf16.mxu1 %v6256_v21  ;;  %v5428_v21 = vld [vmem:[%s7702_s3 + $0xa8] sm:$0xff] }
0x431f   :  { %4847 = vadd.xlane.f32.xlu0 %v4846_v2  ;;  %v5107_v2 = vld [vmem:[%s7699_s1 + $0x60] sm:$0xff] }
0x43ab   :  { %v4851_v55 = vpop.xlane.xlu1 %4850 }
0x43ac   :  { %v4853_v14 = vmul.f32 0.0625, %v4851_v55  ;;  %v4848_v54 = vpop.xlane.xlu0 %4847  ;;  %v5112_v55 = vld [vmem:[%s7699_s1 + $0xe8] sm:$0xff] }
0x43ad   :  { %v4852_v40 = vmul.f32 0.0625, %v4848_v54  ;;  %v6258_v54 = vpack.c.bf16 %v5112_v55, %v5107_v2  ;;  %v5460_v55 = vld [vmem:[%s7702_s3 + $0x1a8] sm:$0xff] }
0x43ae   :  { %v4855_v45 = vsub.f32 %v7397_v12, %v4853_v14  ;;  %v6260_v14 = vpack.c.bf16 %v5115_v7, %v5110_v19  ;;  %v5427_v19 = vld [vmem:[%s7702_s3 + $0xa0] sm:$0xff] }
0x43af   :  { %v4854_v59 = vsub.f32 %v7400_v4, %v4852_v40  ;;  %v5109_v40 = vld [vmem:[%s7699_s1 + $0x70] sm:$0xff]  ;;  %v5459_v7 = vld [vmem:[%s7702_s3 + $0x1a0] sm:$0xff]  ;;  %v6275_v2 = vpack.c.bf16 %v5428_v21, %v5427_v19 }
0x43b0   :  { %v4857_v6 = vmul.f32 %v4855_v45, %v4855_v45  ;;  %6261 = vmatprep.subr.bf16.mxu0 %v6260_v14  ;;  %v5411_v14 = vld [vmem:[%s7702_s3 + $0x20] sm:$0xff]  ;;  %v5421_v21 = vld [vmem:[%s7702_s3 + $0x70] sm:$0xff] }
0x43b1   :  { %v4856_v10 = vmul.f32 %v4854_v59, %v4854_v59 }
0x43b2   :  { %v4861_v5 = vsel %vm64_vm2, %v4857_v6, 0.0 }
0x43b3   :  { %v4858_v44 = vsel %vm64_vm2, %v4856_v10, 0.0  ;;  %v5423_v10 = vld [vmem:[%s7702_s3 + $0x80] sm:$0xff] }
0x43b4   :  { %4859 = vadd.xlane.f32.xlu0 %v4858_v44  ;;  %v5424_v44 = vld [vmem:[%s7702_s3 + $0x88] sm:$0xff] }
0x43b5   :  { %v6267_v6 = vpack.c.bf16 %v5424_v44, %v5423_v10 }
0x43b8   :  { %4862 = vadd.xlane.f32.xlu0 %v4861_v5  ;;  %v5707_v5 = vld [vmem:[%s7701_s2 + $0x17] ss:$0 sm:$0xff] }
0x4441   :  { %v4860_v13 = vpop.xlane.xlu0 %4859 }
0x4442   :  { %v4864_v62 = vmul.f32 0.0625, %v4860_v13 }
0x4444   :  { %v4866_v11 = vadd.f32 1e-05, %v4864_v62 }
0x4445   :  { %v4863_v15 = vpop.xlane.xlu0 %4862 }
0x4446   :  { %6519 = vrsqrt.f32 %v4866_v11  ;;  %v4865_v1 = vmul.f32 0.0625, %v4863_v15 }
0x4448   :  { %v4867_v16 = vadd.f32 1e-05, %v4865_v1 }
0x444a   :  { %6521 = vrsqrt.f32 %v4867_v16 }
0x4450   :  { %v6520_v17 = vpop.eup %6519 }
0x4451   :  { %v4870_v23 = vmul.f32 %v6520_v17, %v4854_v59 }
0x4453   :  { %v4876_v25 = vmul.f32 %v5702_v20, %v4870_v23 }
0x4454   :  { %v6522_v26 = vpop.eup %6521 }
0x4455   :  { %v4871_v31 = vmul.f32 %v6522_v26, %v4855_v45  ;;  %v4882_v33 = vadd.f32 %v5703_v24, %v4876_v25  ;;  %v5114_v45 = vld [vmem:[%s7699_s1 + $0xf8] sm:$0xff] }
0x4456   :  { %v6262_v59 = vpack.c.bf16 %v5114_v45, %v5109_v40  ;;  %v5412_v40 = vld [vmem:[%s7702_s3 + $0x28] sm:$0xff]  ;;  %v5443_v45 = vld [vmem:[%s7702_s3 + $0x120] sm:$0xff] }
0x4457   :  { %v4877_v34 = vmul.f32 %v5702_v20, %v4871_v31  ;;  %6173 = vmatprep.mubr.msk.f32.mxu1 %vm64_vm2, %v4882_v33  ;;  %v6277_v10 = vpack.c.bf16 %v5412_v40, %v5411_v14  ;;  %v5454_v14 = vld [vmem:[%s7702_s3 + $0x178] sm:$0xff] }
0x4459   :  { %v4883_v35 = vadd.f32 %v5703_v24, %v4877_v34 }
0x445b   :  { %6174 = vmatmul.mubr.msk.f32.vlgmr.msra.gmra.mrb[40].mxu1 %vm64_vm2, %v4883_v35 }
0x445c   :  { %5211 = vmatprep.mubr.f32.mxu1 %v6542_v3  ;;  %6259 = vmatpush1.bf16.msra.mxu1 %v6258_v54  ;;  %v6307_v54 = vpack.c.bf16 %v5460_v55, %v5459_v7  ;;  %v5422_v7 = vld [vmem:[%s7702_s3 + $0x78] sm:$0xff]  ;;  %v5453_v55 = vld [vmem:[%s7702_s3 + $0x170] sm:$0xff] }
0x445d   :  { %6264 = vmatprep.subr.bf16.mxu1 %v6540_v0  ;;  %v6329_v40 = vpack.c.bf16 %v5454_v14, %v5453_v55  ;;  %v5720_v55 = vld [vmem:[%s7701_s2 + $0x18] ss:$0 sm:$0xff] }
0x452e   :  { %v6175_v27 = vpop.f32.mrb[40].mxu1 }
0x452f   :  { %v4969_v9 = vadd.f32 %v6175_v27, %v5704_v38  ;;  %v4963_v47 = vpop.f32.mrb[41].mxu1 }
0x4530   :  { %v4964_v48 = vadd.f32 %v5704_v38, %v4963_v47  ;;  %v5455_v38 = vld [vmem:[%s7702_s3 + $0x180] sm:$0xff] }
0x4531   :  { %v4975_v49 = vmul.f32 0.044715, %v4969_v9  ;;  %v4973_v42 = vmul.f32 0.5, %v4969_v9  ;;  %v5407_v47 = vld [vmem:[%s7702_s3] sm:$0xff] }
0x4532   :  { %v4974_v50 = vmul.f32 0.044715, %v4964_v48  ;;  %v4972_v30 = vmul.f32 0.5, %v4964_v48 }
0x4533   :  { %v4977_v51 = vmul.f32 %v4975_v49, %v4969_v9 }
0x4534   :  { %v4976_v52 = vmul.f32 %v4974_v50, %v4964_v48 }
0x4535   :  { %v4979_v29 = vmul.f32 %v4977_v51, %v4969_v9 }
0x4536   :  { %v4978_v28 = vmul.f32 %v4976_v52, %v4964_v48 }
0x4537   :  { %v4981_v56 = vadd.f32 %v4979_v29, %v4969_v9  ;;  %v5456_v9 = vld [vmem:[%s7702_s3 + $0x188] sm:$0xff] }
0x4538   :  { %v4980_v58 = vadd.f32 %v4978_v28, %v4964_v48  ;;  %v5408_v48 = vld [vmem:[%s7702_s3 + $0x8] sm:$0xff]  ;;  %v6299_v52 = vpack.c.bf16 %v5456_v9, %v5455_v38  ;;  %v5439_v28 = vld [vmem:[%s7702_s3 + $0x100] sm:$0xff]  ;;  %v5466_v9 = vld [vmem:[%s7702_s3 + $0x1d8] sm:$0xff] }
0x4539   :  { %v4983_v61 = vmul.f32 0.7978846, %v4981_v56  ;;  %v6269_v29 = vpack.c.bf16 %v5408_v48, %v5407_v47  ;;  %v5440_v56 = vld [vmem:[%s7702_s3 + $0x108] sm:$0xff]  ;;  %v5417_v47 = vld [vmem:[%s7702_s3 + $0x50] sm:$0xff] }
0x453a   :  { %v4982_v60 = vmul.f32 0.7978846, %v4980_v58 }
0x453b   :  { %6523 = vtanh.f32 %v4983_v61  ;;  %v6301_v61 = vpack.c.bf16 %v5440_v56, %v5439_v28  ;;  %v5467_v28 = vld [vmem:[%s7702_s3 + $0x1e0] sm:$0xff] }
0x453c   :  { %6525 = vtanh.f32 %v4982_v60  ;;  %v5425_v60 = vld [vmem:[%s7702_s3 + $0x90] sm:$0xff] }
0x4545   :  { %v6524_v43 = vpop.eup %6523 }
0x4546   :  { %v6526_v46 = vpop.eup %6525  ;;  %v4987_v39 = vadd.f32 1.0, %v6524_v43  ;;  %v5426_v43 = vld [vmem:[%s7702_s3 + $0x98] sm:$0xff] }
0x4547   :  { %v4986_v41 = vadd.f32 1.0, %v6526_v46  ;;  %v5457_v46 = vld [vmem:[%s7702_s3 + $0x190] sm:$0xff] }
0x4548   :  { %v4989_v32 = vmul.f32 %v4987_v39, %v4973_v42  ;;  %v6271_v39 = vpack.c.bf16 %v5426_v43, %v5425_v60  ;;  %v5410_v42 = vld [vmem:[%s7702_s3 + $0x18] sm:$0xff]  ;;  %v5419_v43 = vld [vmem:[%s7702_s3 + $0x60] sm:$0xff] }
0x4549   :  { %v4988_v57 = vmul.f32 %v4986_v41, %v4972_v30  ;;  %v5409_v30 = vld [vmem:[%s7702_s3 + $0x10] sm:$0xff] }
0x454b   :  { %6178 = vmatprep.mubr.msk.f32.mxu0 %vm4058_vm11, %v4988_v57  ;;  %v6273_v57 = vpack.c.bf16 %v5410_v42, %v5409_v30  ;;  %v5452_v30 = vld [vmem:[%s7702_s3 + $0x168] sm:$0xff]  ;;  %v5438_v42 = vld [vmem:[%s7702_s3 + $0xf8] sm:$0xff] }
0x454c   :  { %6179 = vmatmul.mubr.msk.f32.vlgmr.msra.gmra.mrb[42].mxu0 %vm4058_vm11, %v4989_v32  ;;  %v5441_v32 = vld [vmem:[%s7702_s3 + $0x110] sm:$0xff] }
0x454d   :  { %5282 = vmatprep.mubr.f32.mxu0 %v6542_v3  ;;  %6263 = vmatpush1.bf16.msra.mxu0 %v6262_v59  ;;  %v6305_v53 = vpack.c.bf16 %v5442_v63, %v5441_v32  ;;  %v5444_v59 = vld [vmem:[%s7702_s3 + $0x128] sm:$0xff]  ;;  %v5470_v32 = vld [vmem:[%s7702_s3 + $0x1f8] sm:$0xff] }
0x454e   :  { %6268 = vmatprep.subr.bf16.mxu0 %v6267_v6  ;;  %v6309_v44 = vpack.c.bf16 %v5444_v59, %v5443_v45  ;;  %v5429_v6 = vld [vmem:[%s7702_s3 + $0xb0] sm:$0xff]  ;;  %v5714_v59 = vld [vmem:[%s7699_s1 + $0x180] ss:$0 sm:$0xff] }
0x454f   :  { %v5712_v45 = vld [vmem:[%s7699_s1 + $0x170] ss:$0 sm:$0xff] }
0x461f   :  { %v6180_v18 = vpop.f32.mrb[42].mxu0 }
0x4620   :  { %v5078_v0 = vadd.f32 %v6180_v18, %v5707_v5  ;;  %v5072_v8 = vpop.f32.mrb[43].mxu0  ;;  %v5461_v18 = vld [vmem:[%s7702_s3 + $0x1b0] sm:$0xff] }
0x4621   :  { %v5073_v13 = vadd.f32 %v5707_v5, %v5072_v8  ;;  %v5430_v5 = vld [vmem:[%s7702_s3 + $0xb8] sm:$0xff]  ;;  %v5413_v8 = vld [vmem:[%s7702_s3 + $0x30] sm:$0xff] }
0x4622   :  { %v5087_v62 = vmul.f32 %v5711_v22, %v5078_v0  ;;  %v5462_v0 = vld [vmem:[%s7702_s3 + $0x1b8] sm:$0xff] }
0x4623   :  { %v5086_v11 = vmul.f32 %v5711_v22, %v5073_v13  ;;  %v6279_v22 = vpack.c.bf16 %v5430_v5, %v5429_v6  ;;  %v5414_v13 = vld [vmem:[%s7702_s3 + $0x38] sm:$0xff] }
0x4624   :  { %v5089_v15 = vadd.f32 %v5087_v62, %v7397_v12  ;;  %v5111_v12 = vld [vmem:[%s7699_s1 + $0x80] sm:$0xff]  ;;  %v6311_v62 = vpack.c.bf16 %v5462_v0, %v5461_v18 }
0x4625   :  { %v5088_v1 = vadd.f32 %v5086_v11, %v7400_v4  ;;  %v5116_v4 = vld [vmem:[%s7699_s1 + $0x108] sm:$0xff]  ;;  %v6281_v11 = vpack.c.bf16 %v5414_v13, %v5413_v8 }
0x4626   :  { %v5097_v16 = vsel %vm64_vm2, %v5089_v15, 0.0  ;;  %v6265_v51 = vpack.c.bf16 %v5116_v4, %v5111_v12  ;;  %v5445_v15 = vld [vmem:[%s7702_s3 + $0x130] sm:$0xff]  ;;  %v5434_v12 = vld [vmem:[%s7702_s3 + $0xd8] sm:$0xff] }
0x4627   :  { %v5098_v17 = vrot.slane %v5097_v16, 4  ;;  %v5090_v20 = vsel %vm64_vm2, %v5088_v1, 0.0  ;;  %v5446_v1 = vld [vmem:[%s7702_s3 + $0x138] sm:$0xff] }
0x4628   :  { %v5091_v23 = vrot.slane %v5090_v20, 4 }
0x4629   :  { %v5099_v24 = vadd.f32 %v5098_v17, %v5097_v16  ;;  %v5431_v16 = vld [vmem:[%s7702_s3 + $0xc0] sm:$0xff]  ;;  %v6313_v17 = vpack.c.bf16 %v5446_v1, %v5445_v15 }
0x462a   :  { %v5092_v25 = vadd.f32 %v5091_v23, %v5090_v20  ;;  %v5432_v20 = vld [vmem:[%s7702_s3 + $0xc8] sm:$0xff]  ;;  %v5463_v23 = vld [vmem:[%s7702_s3 + $0x1c0] sm:$0xff] }
0x462b   :  { %v5100_v26 = vrot.slane %v5099_v24, 2 }
0x462c   :  { %v5093_v31 = vrot.slane %v5092_v25, 2 }
0x462d   :  { %v5101_v33 = vadd.f32 %v5100_v26, %v5099_v24  ;;  %v5464_v24 = vld [vmem:[%s7702_s3 + $0x1c8] sm:$0xff] }
0x462e   :  { %v5094_v34 = vadd.f32 %v5093_v31, %v5092_v25  ;;  %v6283_v25 = vpack.c.bf16 %v5432_v20, %v5431_v16  ;;  %v6315_v26 = vpack.c.bf16 %v5464_v24, %v5463_v23  ;;  %v5415_v31 = vld [vmem:[%s7702_s3 + $0x40] sm:$0xff] }
0x462f   :  { %v5102_v35 = vrot.slane %v5101_v33, 1 }
0x4630   :  { %v5095_v36 = vrot.slane %v5094_v34, 1 }
0x4631   :  { %v5103_v37 = vadd.f32 %v5102_v35, %v5101_v33  ;;  %v5416_v33 = vld [vmem:[%s7702_s3 + $0x48] sm:$0xff] }
0x4632   :  { %v5096_v27 = vadd.f32 %v5095_v36, %v5094_v34  ;;  %v5447_v34 = vld [vmem:[%s7702_s3 + $0x140] sm:$0xff]  ;;  %v6285_v35 = vpack.c.bf16 %v5416_v33, %v5415_v31  ;;  %v5448_v36 = vld [vmem:[%s7702_s3 + $0x148] sm:$0xff] }
0x4633   :  { %v5106_v49 = vmul.f32 0.125, %v5103_v37  ;;  %v5433_v37 = vld [vmem:[%s7702_s3 + $0xd0] sm:$0xff]  ;;  %v6317_v4 = vpack.c.bf16 %v5448_v36, %v5447_v34 }
0x4634   :  { %v5105_v50 = vmul.f32 0.125, %v5096_v27  ;;  %v6287_v38 = vpack.c.bf16 %v5434_v12, %v5433_v37  ;;  %v5465_v27 = vld [vmem:[%s7702_s3 + $0x1d0] sm:$0xff] }
0x4635   :  { %v6319_v48 = vpack.c.bf16 %v5466_v9, %v5465_v27 }
0x4636   :  { %v5144_v58 = vsel %vm208_vm1, %v5106_v49, %v5105_v50  ;;  %v5418_v49 = vld [vmem:[%s7702_s3 + $0x58] sm:$0xff]  ;;  %v5449_v50 = vld [vmem:[%s7702_s3 + $0x150] sm:$0xff] }
0x4637   :  { %5717 = vmatmul.mubr.msk.f32.vlgmr.msra.gmra.mrb[42].mxu1 %vm64_vm2, %v5144_v58  ;;  %5718 = vmatmul.mubr.msk.f32.vlgmr.msra.gmra.mrb[44].mxu0 %vm64_vm2, %v5144_v58  ;;  %v6289_v56 = vpack.c.bf16 %v5418_v49, %v5417_v47 }
0x4638   :  { %6266 = vmatpush3.bf16.msra.mxu1 %v6265_v51  ;;  %6185 = vmatprep.mubr.msk.f32.mxu1 %vm6541_vm0, %v6542_v3  ;;  %v5458_v3 = vld [vmem:[%s7702_s3 + $0x198] sm:$0xff] }
0x4639   :  { %6300 = vmatprep.subr.bf16.mxu1 %v6299_v52  ;;  %6270 = vmatpush3.bf16.msra.mxu0 %v6269_v29  ;;  %v6303_v41 = vpack.c.bf16 %v5458_v3, %v5457_v46  ;;  %v5450_v51 = vld [vmem:[%s7702_s3 + $0x158] sm:$0xff]  ;;  %v5435_v52 = vld [vmem:[%s7702_s3 + $0xe0] sm:$0xff]  ;;  %v5436_v29 = vld [vmem:[%s7702_s3 + $0xe8] sm:$0xff] }
0x463a   :  { %6272 = vmatprep.subr.bf16.mxu0 %v6271_v39  ;;  %v6291_v60 = vpack.c.bf16 %v5436_v29, %v5435_v52  ;;  %v5420_v46 = vld [vmem:[%s7702_s3 + $0x68] sm:$0xff]  ;;  %v5451_v39 = vld [vmem:[%s7702_s3 + $0x160] sm:$0xff] }
0x463b   :  { %6186 = vmatmul.mubr.msk.f32.vlgmr.msra.gmra.mrb[44].mxu1 %vm64_vm2, %v5144_v58  ;;  %v5468_v58 = vld [vmem:[%s7702_s3 + $0x1e8] sm:$0xff]  ;;  %v6293_v63 = vpack.c.bf16 %v5420_v46, %v5419_v43 }
0x463c   :  { %6302 = vmatpush3.bf16.msra.mxu1 %v6301_v61  ;;  %v6321_v61 = vpack.c.bf16 %v5450_v51, %v5449_v50  ;;  %v6323_v3 = vpack.c.bf16 %v5468_v58, %v5467_v28 }
0x463d   :  { %6304 = vmatprep.subr.bf16.mxu1 %v6303_v41  ;;  %6274 = vmatpush3.bf16.msra.mxu0 %v6273_v57  ;;  %v5437_v41 = vld [vmem:[%s7702_s3 + $0xf0] sm:$0xff] }
0x463e   :  { %6276 = vmatprep.subr.bf16.mxu0 %v6275_v2  ;;  %v5469_v57 = vld [vmem:[%s7702_s3 + $0x1f0] sm:$0xff]  ;;  %v6295_v19 = vpack.c.bf16 %v5438_v42, %v5437_v41 }
0x463f   :  { %v6327_v2 = vpack.c.bf16 %v5470_v32, %v5469_v57 }
0x4640   :  { %6306 = vmatpush3.bf16.msra.mxu1 %v6305_v53  ;;  %v6325_v53 = vpack.c.bf16 %v5452_v30, %v5451_v39 }
0x4641   :  { %6308 = vmatprep.subr.bf16.mxu1 %v6307_v54  ;;  %6278 = vmatpush3.bf16.msra.mxu0 %v6277_v10  ;;  %v6297_v54 = vpack.c.bf16 %v5422_v7, %v5421_v21  ;;  %v5713_v10 = vld [vmem:[%s7699_s1 + $0x178] ss:$0 sm:$0xff] }
0x4642   :  { %6280 = vmatprep.subr.bf16.mxu0 %v6279_v22 }
0x4644   :  { %6310 = vmatpush3.bf16.msra.mxu1 %v6309_v44  ;;  %v5715_v44 = vld [vmem:[%s7699_s1 + $0x188] ss:$0 sm:$0xff] }
0x4645   :  { %6312 = vmatprep.subr.bf16.mxu1 %v6311_v62  ;;  %6282 = vmatpush3.bf16.msra.mxu0 %v6281_v11  ;;  %v5716_v11 = vld [vmem:[%s7699_s1 + $0x190] ss:$0 sm:$0xff] }
0x4646   :  { %6284 = vmatprep.subr.bf16.mxu0 %v6283_v25 }
0x4648   :  { %6314 = vmatpush3.bf16.msra.mxu1 %v6313_v17 }
0x4649   :  { %6316 = vmatprep.subr.bf16.mxu1 %v6315_v26  ;;  %6286 = vmatpush3.bf16.msra.mxu0 %v6285_v35 }
0x464a   :  { %6288 = vmatprep.subr.bf16.mxu0 %v6287_v38 }
0x464c   :  { %6318 = vmatpush3.bf16.msra.mxu1 %v6317_v4 }
0x464d   :  { %6320 = vmatprep.subr.bf16.mxu1 %v6319_v48  ;;  %6290 = vmatpush3.bf16.msra.mxu0 %v6289_v56 }
0x464e   :  { %6292 = vmatprep.subr.bf16.mxu0 %v6291_v60 }
0x4650   :  { %6322 = vmatpush3.bf16.msra.mxu1 %v6321_v61 }
0x4651   :  { %6324 = vmatprep.subr.bf16.mxu1 %v6323_v3  ;;  %6294 = vmatpush3.bf16.msra.mxu0 %v6293_v63 }
0x4652   :  { %6296 = vmatprep.subr.bf16.mxu0 %v6295_v19 }
0x4654   :  { %6326 = vmatpush3.bf16.msra.mxu1 %v6325_v53 }
0x4655   :  { %6328 = vmatprep.subr.bf16.mxu1 %v6327_v2  ;;  %6298 = vmatpush3.bf16.msra.mxu0 %v6297_v54 }
0x4658   :  { %6330 = vmatpush3.bf16.msra.mxu1 %v6329_v40 }
0x470a   :  { %v5213_v6 = vpop.f32.mrb[42].mxu1  ;;  %v5284_v5 = vpop.f32.mrb[44].mxu0 }
0x470b   :  { %v5214_v18 = vadd.f32 %v5712_v45, %v5213_v6  ;;  %v5285_v22 = vadd.f32 %v5714_v59, %v5284_v5  ;;  %v5215_v0 = vpop.f32.mrb[43].mxu1  ;;  %v5286_v8 = vpop.f32.mrb[45].mxu0 }
0x470c   :  { %v5216_v13 = vadd.f32 %v5713_v10, %v5215_v0  ;;  %v5287_v62 = vadd.f32 %v5715_v44, %v5286_v8 }
0x470d   :  { %v5363_v15 = vmul.f32 0.044715, %v5214_v18  ;;  %v5365_v1 = vmul.f32 0.044715, %v5285_v22  ;;  %v5359_v46 = vmul.f32 0.5, %v5214_v18  ;;  %v5361_v3 = vmul.f32 0.5, %v5285_v22 }
0x470e   :  { %v5364_v16 = vmul.f32 0.044715, %v5216_v13  ;;  %v5366_v17 = vmul.f32 0.044715, %v5287_v62  ;;  %v5355_v20 = vpop.f32.mrb[44].mxu1  ;;  %v5360_v56 = vmul.f32 0.5, %v5216_v13 }
0x470f   :  { %v5367_v23 = vmul.f32 %v5363_v15, %v5214_v18  ;;  %v5369_v24 = vmul.f32 %v5365_v1, %v5285_v22  ;;  %v5356_v25 = vadd.f32 %v5716_v11, %v5355_v20  ;;  %v6187_v26 = vpop.f32.mrb[45].mxu1  ;;  %v5362_v60 = vmul.f32 0.5, %v5287_v62 }
0x4710   :  { %v5368_v31 = vmul.f32 %v5364_v16, %v5216_v13  ;;  %v5370_v33 = vmul.f32 %v5366_v17, %v5287_v62 }
0x4711   :  { %v5371_v34 = vmul.f32 %v5367_v23, %v5214_v18  ;;  %v5373_v35 = vmul.f32 %v5369_v24, %v5285_v22  ;;  %v5396_v36 = vsel %vm5395_vm12, %v5356_v25, -inf }
0x4712   :  { %5397 = vmax.xlane.f32.xlu1 %v5396_v36  ;;  %v5372_v37 = vmul.f32 %v5368_v31, %v5216_v13  ;;  %v5374_v12 = vmul.f32 %v5370_v33, %v5287_v62 }
0x4713   :  { %v5375_v4 = vadd.f32 %v5371_v34, %v5214_v18  ;;  %v5377_v38 = vadd.f32 %v5373_v35, %v5285_v22 }
0x4714   :  { %v5376_v27 = vadd.f32 %v5372_v37, %v5216_v13  ;;  %v5378_v9 = vadd.f32 %v5374_v12, %v5287_v62 }
0x4715   :  { %v5379_v47 = vmul.f32 0.7978846, %v5375_v4  ;;  %v5381_v50 = vmul.f32 0.7978846, %v5377_v38 }
0x4716   :  { %v5380_v48 = vmul.f32 0.7978846, %v5376_v27  ;;  %v5382_v49 = vmul.f32 0.7978846, %v5378_v9 }
0x4717   :  { %6527 = vtanh.f32 %v5379_v47 }
0x4718   :  { %6529 = vtanh.f32 %v5380_v48 }
0x4719   :  { %6531 = vtanh.f32 %v5382_v49 }
0x471a   :  { %6533 = vtanh.f32 %v5381_v50 }
0x4721   :  { %v6528_v51 = vpop.eup %6527 }
0x4722   :  { %v6530_v52 = vpop.eup %6529  ;;  %v5387_v29 = vadd.f32 1.0, %v6528_v51 }
0x4723   :  { %v6532_v28 = vpop.eup %6531  ;;  %v5388_v58 = vadd.f32 1.0, %v6530_v52 }
0x4724   :  { %v6534_v61 = vpop.eup %6533  ;;  %v5390_v43 = vadd.f32 1.0, %v6532_v28  ;;  %v5391_v42 = vmul.f32 %v5387_v29, %v5359_v46 }
0x4725   :  { %v5392_v39 = vmul.f32 %v5388_v58, %v5360_v56  ;;  %v5389_v30 = vadd.f32 1.0, %v6534_v61 }
0x4726   :  { %v5394_v41 = vmul.f32 %v5390_v43, %v5362_v60 }
0x4727   :  { %5540 = vmatprep.mubr.f32.mxu0 %v5392_v39  ;;  %v5393_v57 = vmul.f32 %v5389_v30, %v5361_v3 }
0x4728   :  { %5610 = vmatprep.mubr.f32.mxu1 %v5394_v41  ;;  %5541 = vmatmul.mubr.f32.vlgmr.msra.gmra.mrb[46].mxu0 %v5391_v42 }
0x4729   :  { %5611 = vmatmul.mubr.f32.vlgmr.msra.gmra.mrb[46].mxu1 %v5393_v57 }
0x479f   :  { %v5398_v32 = vpop.xlane.xlu1 %5397 }
0x47a0   :  { %v5399_v63 = vsub.f32 %v5356_v25, %v5398_v32 }
0x47a2   :  { %v5400_v53 = vmul.f32 1.442695, %v5399_v63 }
0x47a4   :  { %6535 = vpow2.f32 %v5400_v53 }
0x47ae   :  { %v6536_v19 = vpop.eup %6535 }
0x47af   :  { %v5402_v21 = vsel %vm5395_vm12, %v6536_v19, 0.0 }
0x47b0   :  { %5403 = vadd.xlane.f32.xlu0 %v5402_v21 }
0x47fb   :  { %v5876_v7 = vpop.f32.mrb[46].mxu0 }
0x47fc   :  { %v5911_v2 = vpop.f32.mrb[46].mxu1  ;;  %v5877_v14 = vpop.f32.mrb[47].mxu0 }
0x47fd   :  { %v5878_v54 = vadd.f32 %v5877_v14, %v5876_v7  ;;  %v5912_v40 = vpop.f32.mrb[47].mxu1 }
0x47fe   :  { %v5913_v45 = vadd.f32 %v5912_v40, %v5911_v2 }
0x47ff   :  { %v5543_v59 = vadd.f32 %v5878_v54, %v5720_v55 }
0x4801   :  { %v5613_v10 = vadd.f32 %v5913_v45, %v5543_v59 }
0x483d   :  { %v5404_v44 = vpop.xlane.xlu0 %5403 }
0x483e   :  { %6537 = vrcp.f32 %v5404_v44 }
0x4848   :  { %v6538_v6 = vpop.eup %6537 }
0x4849   :  { %v5406_v5 = vmul.f32 %v6538_v6, %v6536_v19 }
0x484b   :  { %v5616_v18 = vmul.f32 %v5613_v10, %v5406_v5 }
0x484d   :  { %v5617_v22 = vsel %vm5395_vm12, %v5616_v18, 0.0 }
0x484e   :  { %5618 = vadd.xlane.f32.xlu1 %v5617_v22 }
0x48db   :  { %v5619_v0 = vpop.xlane.xlu1 %5618 }
0x48dc   :  { %5621 = vst.msk [vmem:[%s7703_s4] sm:$0x3] %vm5620_vm13, %v5619_v0 }

</bundles_post_ra>
